<compile_context>
chip_gen: v6e
topology: v6e:2x2x1
jax: 0.10.0
libtpu: 0.0.40
codegen_flags: <defaults>
</compile_context>

<pallas_src>
import functools
import math

import jax
import jax.numpy as jnp
import numpy as np
from jax.experimental import pallas as pl
from jax.experimental.pallas import tpu as pltpu


def _round_up(x, m):
    return ((x + m - 1) // m) * m


# ----------------------------------------------------------------------------
# Parameter-prep helpers (run once at construction time).
# ----------------------------------------------------------------------------
def _pad_gate_cols(w, h, hp):
    """(rows, 4h) -> (rows, 4hp): pad each gate's columns to hp lanes."""
    r = w.shape[0]
    return jnp.pad(w.reshape(r, 4, h), ((0, 0), (0, 0), (0, hp - h))).reshape(r, 4 * hp)


def _pad_w_ih(w_ih, in_dims, in_pads, h, hp):
    """w_ih (4h, sum(in_dims)) -> (sum(in_pads), 4hp), structured row padding.

    Each input feature part (e.g. the fwd / rev halves of the previous
    bidirectional layer's output) is padded to its own lane-aligned width so
    the kernel can consume the lane-padded layer outputs directly (no slicing
    or re-concat pass between layers)."""
    wt = w_ih.T
    parts, off = [], 0
    for dsz, dpad in zip(in_dims, in_pads):
        parts.append(jnp.pad(wt[off:off + dsz], ((0, dpad - dsz), (0, 0))))
        off += dsz
    return _pad_gate_cols(jnp.concatenate(parts, axis=0), h, hp)


# ----------------------------------------------------------------------------
# Pallas kernel: one LSTM layer, both directions stacked, tc timesteps/chunk.
#
# Arrays are passed time-flattened: x is (t_pad*Bp, Dp) with row r = t*Bp + b,
# so chunk c is exactly rows [c*tc*Bp, (c+1)*tc*Bp) and no in-kernel reshapes
# are needed.  Direction 0 walks chunks forward, direction 1 walks them
# backward (reverse index_map) with a mirrored in-chunk index, so y comes out
# in natural time order for both directions without any host-side flip.
# ----------------------------------------------------------------------------
def _lstm_rec_kernel(*refs, tc, bp, hp, ndirs):
    n = ndirs
    x_refs = refs[0 * n:1 * n]              # (tc*bp, dp) bf16 per direction
    wih_refs = refs[1 * n:2 * n]            # (dp, 4hp)  bf16 per direction
    whh_refs = refs[2 * n:3 * n]            # (hp, 4hp)  bf16 per direction
    b_refs = refs[3 * n:4 * n]              # (1, 4hp)   f32  per direction
    len_ref = refs[4 * n]                   # (bp, 1)    int32
    y_refs = refs[4 * n + 1:5 * n + 1]      # (tc*bp, hp) bf16 per direction
    hout_refs = refs[5 * n + 1:6 * n + 1]   # (bp, hp)   f32  per direction
    cout_refs = refs[6 * n + 1:7 * n + 1]
    gx_scs = refs[7 * n + 1:8 * n + 1]      # VMEM (tc*bp, 4hp) f32 per dir
    h_scs = refs[8 * n + 1:9 * n + 1]       # VMEM (bp, hp) f32 per dir
    c_scs = refs[9 * n + 1:10 * n + 1]

    c_idx = pl.program_id(0)
    nc = pl.num_programs(0)
    t0 = c_idx * tc
    t_pad = nc * tc
    lens = len_ref[...]                     # (bp, 1) valid length per row

    @pl.when(c_idx == 0)
    def _():
        for d in range(ndirs):
            h_scs[d][...] = jnp.zeros_like(h_scs[d])
            c_scs[d][...] = jnp.zeros_like(c_scs[d])

    # ---- chunk-level input projection (parallel part): one MXU matmul over
    # all tc steps per direction; gx never touches HBM.  bf16 x bf16 -> f32.
    for d in range(ndirs):
        gx = jnp.dot(x_refs[d][...], wih_refs[d][...],
                     preferred_element_type=jnp.float32)
        gx_scs[d][...] = gx + b_refs[d][...]

    # Hoist the recurrent weights out of the unrolled step loop.
    # TODO(synk): could stage W_hh in MXU weight regs via pltpu.matmul_push_rhs.
    whh = [whh_refs[d][...] for d in range(ndirs)]

    def step(tt, carry):
        hs, cs = carry
        h_nxt, c_nxt = [], []
        for d in range(ndirs):
            if d == 0:                       # forward chain
                tin = tt
                t_cur = t0 + tt              # original time index
            else:                            # reverse chain (mirrored index)
                tin = tc - 1 - tt
                t_cur = t_pad - 1 - (t0 + tt)
            row0 = pl.multiple_of(tin * bp, bp)
            gates = gx_scs[d][pl.ds(row0, bp), :] + jnp.dot(
                hs[d].astype(jnp.bfloat16), whh[d],
                preferred_element_type=jnp.float32)
            i_g = jax.nn.sigmoid(gates[:, 0 * hp:1 * hp])   # lane-aligned
            f_g = jax.nn.sigmoid(gates[:, 1 * hp:2 * hp])
            g_g = jnp.tanh(gates[:, 2 * hp:3 * hp])
            o_g = jax.nn.sigmoid(gates[:, 3 * hp:4 * hp])
            c_new = f_g * cs[d] + i_g * g_g
            h_new = o_g * jnp.tanh(c_new)
            # Packed-sequence semantics: outside [0, len) freeze state, emit 0.
            valid = t_cur < lens             # (bp, 1) bool
            h_nxt.append(jnp.where(valid, h_new, hs[d]))
            c_nxt.append(jnp.where(valid, c_new, cs[d]))
            y_refs[d][pl.ds(row0, bp), :] = jnp.where(
                valid, h_new, 0.0).astype(y_refs[d].dtype)
        return tuple(h_nxt), tuple(c_nxt)

    init = (tuple(h_scs[d][...] for d in range(ndirs)),
            tuple(c_scs[d][...] for d in range(ndirs)))
    h_fin, c_fin = jax.lax.fori_loop(0, tc, step, init, unroll=True)

    for d in range(ndirs):
        h_scs[d][...] = h_fin[d]
        c_scs[d][...] = c_fin[d]

    @pl.when(c_idx == nc - 1)
    def _():
        for d in range(ndirs):
            hout_refs[d][...] = h_fin[d]
            cout_refs[d][...] = c_fin[d]


# ----------------------------------------------------------------------------
# One LSTM layer (both directions in one pallas_call when bidirectional).
# ----------------------------------------------------------------------------
def _lstm_layer(x_flat, lens_col, w_ih_list, w_hh_list, b_list, *,
                t_pad, bp, hp, tc):
    ndirs = len(w_ih_list)
    dp = x_flat.shape[1]
    assert t_pad % tc == 0
    nc = t_pad // tc
    rows = tc * bp

    x_spec_f = pl.BlockSpec((rows, dp), lambda c: (c, 0))
    x_spec_r = pl.BlockSpec((rows, dp), lambda c: (nc - 1 - c, 0))
    y_spec_f = pl.BlockSpec((rows, hp), lambda c: (c, 0))
    y_spec_r = pl.BlockSpec((rows, hp), lambda c: (nc - 1 - c, 0))

    in_specs = ([x_spec_f] + ([x_spec_r] if ndirs == 2 else [])
                + [pl.BlockSpec((dp, 4 * hp), lambda c: (0, 0))] * ndirs
                + [pl.BlockSpec((hp, 4 * hp), lambda c: (0, 0))] * ndirs
                + [pl.BlockSpec((1, 4 * hp), lambda c: (0, 0))] * ndirs
                + [pl.BlockSpec((bp, 1), lambda c: (0, 0))])
    out_specs = ([y_spec_f] + ([y_spec_r] if ndirs == 2 else [])
                 + [pl.BlockSpec((bp, hp), lambda c: (0, 0))] * (2 * ndirs))
    out_shape = tuple([jax.ShapeDtypeStruct((t_pad * bp, hp), jnp.bfloat16)] * ndirs
                      + [jax.ShapeDtypeStruct((bp, hp), jnp.float32)] * (2 * ndirs))
    scratch_shapes = ([pltpu.VMEM((rows, 4 * hp), jnp.float32)] * ndirs
                      + [pltpu.VMEM((bp, hp), jnp.float32)] * (2 * ndirs))

    # VMEM budget estimate (blocks are double-buffered by the pipeline).
    est = (2 * ndirs * rows * dp * 2          # x chunk blocks (bf16)
           + 2 * ndirs * rows * hp * 2        # y chunk blocks (bf16)
           + 2 * ndirs * (dp + hp + 2) * 4 * hp * 2   # weights + bias
           + ndirs * rows * 4 * hp * 4        # gx scratch (f32)
           + 6 * ndirs * bp * hp * 4          # h/c scratch + h/c outputs
           + 2 * bp * 4)
    vmem_limit = int(min(max(2 * est, 32 * 2 ** 20), 48 * 2 ** 20))

    kernel = functools.partial(_lstm_rec_kernel, tc=tc, bp=bp, hp=hp,
                               ndirs=ndirs)
    args = (tuple([x_flat] * ndirs) + tuple(w_ih_list) + tuple(w_hh_list)
            + tuple(b_list) + (lens_col,))

    outs = pl.pallas_call(
        kernel,
        out_shape=out_shape,
        grid_spec=pltpu.PrefetchScalarGridSpec(
            num_scalar_prefetch=0,
            grid=(nc,),
            in_specs=in_specs,
            out_specs=out_specs,
            scratch_shapes=scratch_shapes,
        ),
        compiler_params=pltpu.CompilerParams(
            dimension_semantics=("arbitrary",),   # serial recurrence
            vmem_limit_bytes=vmem_limit),
    )(*args)

    ys = list(outs[:ndirs])                     # (t_pad*bp, hp) bf16 each
    h_n = list(outs[ndirs:2 * ndirs])           # (bp, hp) f32 each
    c_n = list(outs[2 * ndirs:3 * ndirs])
    return ys, h_n, c_n


# ----------------------------------------------------------------------------
# rnn_encoder equivalent
# ----------------------------------------------------------------------------
class RNNEncoder:
    def __init__(self, input_size, hidden_size, num_layers, dropout,
                 bidirectional, key, time_chunk=32):
        self.input_size = input_size
        self.hidden_size = hidden_size
        self.num_layers = num_layers
        self.dropout = dropout
        self.bidirectional = bidirectional
        self.num_dirs = 2 if bidirectional else 1
        self.time_chunk = time_chunk
        self.h_pad = _round_up(hidden_size, 128)     # per-gate lane padding
        self.in_pad = _round_up(input_size, 128)

        # Same shapes / init range as nn.LSTM.
        k = 1.0 / math.sqrt(hidden_size)
        self.params = {}
        for l in range(num_layers):
            in_l = input_size if l == 0 else hidden_size * self.num_dirs
            for d in range(self.num_dirs):
                key, k1, k2, k3, k4 = jax.random.split(key, 5)
                w_ih = jax.random.uniform(k1, (4 * hidden_size, in_l),
                                          jnp.float32, -k, k)
                w_hh = jax.random.uniform(k2, (4 * hidden_size, hidden_size),
                                          jnp.float32, -k, k)
                b_ih = jax.random.uniform(k3, (4 * hidden_size,),
                                          jnp.float32, -k, k)
                b_hh = jax.random.uniform(k4, (4 * hidden_size,),
                                          jnp.float32, -k, k)
                self.params[(l, d)] = (w_ih, w_hh, b_ih, b_hh)

        # Pad / transpose the weights ONCE (bf16 storage, f32 bias).
        H, Hp = hidden_size, self.h_pad
        self.padded = []
        for l in range(num_layers):
            if l == 0:
                in_dims, in_pads = [input_size], [self.in_pad]
            else:
                in_dims = [hidden_size] * self.num_dirs
                in_pads = [Hp] * self.num_dirs
            wi, wh, bb = [], [], []
            for d in range(self.num_dirs):
                w_ih, w_hh, b_ih, b_hh = self.params[(l, d)]
                wi.append(_pad_w_ih(w_ih, in_dims, in_pads, H, Hp)
                          .astype(jnp.bfloat16))
                wh.append(_pad_gate_cols(jnp.pad(w_hh.T, ((0, Hp - H), (0, 0))),
                                         H, Hp).astype(jnp.bfloat16))
                bb.append(_pad_gate_cols((b_ih + b_hh).reshape(1, 4 * H), H, Hp))
            self.padded.append((wi, wh, bb))

    def __call__(self, inp, lengths):
        """inp: (B, T, input_size) batch-first; lengths: host ints.

        NOTE: like pack_padded_sequence, lengths are concretized on the host;
        this call is not meant to be jitted with traced lengths."""
        lengths = [int(v) for v in lengths]
        T = max(lengths)
        B = inp.shape[0]
        H, Hp = self.hidden_size, self.h_pad
        nd = self.num_dirs

        tc = max(1, min(self.time_chunk, T))
        t_pad = pl.cdiv(T, tc) * tc
        Bp = _round_up(B, 8)

        # Time-major, batch/lane/time padded, bf16, then time-flattened rows.
        x = jnp.transpose(inp[:, :T], (1, 0, 2))               # (T, B, D)
        x = jnp.pad(x, ((0, t_pad - T), (0, Bp - B),
                        (0, self.in_pad - self.input_size)))
        layer_in = x.astype(jnp.bfloat16).reshape(t_pad * Bp, self.in_pad)
        lens_col = jnp.pad(jnp.asarray(lengths, jnp.int32),
                           (0, Bp - B)).reshape(Bp, 1)

        hs, cs, ys = [], [], None
        for l in range(self.num_layers):
            wi, wh, bb = self.padded[l]
            ys, h_n, c_n = _lstm_layer(layer_in, lens_col, wi, wh, bb,
                                       t_pad=t_pad, bp=Bp, hp=Hp, tc=tc)
            hs.append(h_n)
            cs.append(c_n)
            if l + 1 < self.num_layers:
                # Lane-padded outputs feed the next layer directly (its W_ih
                # was padded in the matching structured layout): no slicing /
                # re-pad pass between layers.
                layer_in = (jnp.concatenate(ys, axis=-1) if nd == 2 else ys[0])
                # TODO(synk): inter-layer dropout omitted (eval-mode semantics).

        # Final outputs: back to (B, T, nd*H) in the module's dtype.
        y3 = [y.reshape(t_pad, Bp, Hp)[:T, :B, :H] for y in ys]
        out_td = jnp.concatenate(y3, axis=-1) if nd == 2 else y3[0]
        outputs = jnp.transpose(out_td, (1, 0, 2)).astype(inp.dtype)

        if self.bidirectional:
            h = jnp.stack([jnp.concatenate([hl[0][:B, :H], hl[1][:B, :H]], -1)
                           for hl in hs], axis=0)                # (L, B, 2H)
            c = jnp.stack([jnp.concatenate([cl[0][:B, :H], cl[1][:B, :H]], -1)
                           for cl in cs], axis=0)
        else:
            h = jnp.stack([hl[0][:B, :H] for hl in hs], axis=0)  # (L, B, H)
            c = jnp.stack([cl[0][:B, :H] for cl in cs], axis=0)
        return outputs, (h.astype(inp.dtype), c.astype(inp.dtype))


# ----------------------------------------------------------------------------
# Pure-JAX reference (lax.scan, f32, HIGHEST precision) for correctness check.
# ----------------------------------------------------------------------------
def _ref_layer_direction(x_tbd, len_arr, w_ih, w_hh, bias, *, reverse):
    T, B, _ = x_tbd.shape
    H = w_hh.shape[1]
    hi = jax.lax.Precision.HIGHEST
    gx = jnp.einsum("tbd,gd->tbg", x_tbd, w_ih, precision=hi) + bias
    order = jnp.arange(T - 1, -1, -1) if reverse else jnp.arange(T)

    def step(carry, t):
        h, c = carry
        gates = gx[t] + jnp.dot(h, w_hh.T, precision=hi)
        i = jax.nn.sigmoid(gates[:, 0 * H:1 * H])
        f = jax.nn.sigmoid(gates[:, 1 * H:2 * H])
        g = jnp.tanh(gates[:, 2 * H:3 * H])
        o = jax.nn.sigmoid(gates[:, 3 * H:4 * H])
        c_new = f * c + i * g
        h_new = o * jnp.tanh(c_new)
        m = (t < len_arr)[:, None]
        return (jnp.where(m, h_new, h), jnp.where(m, c_new, c)), \
               (t, jnp.where(m, h_new, 0.0))

    init = (jnp.zeros((B, H), jnp.float32), jnp.zeros((B, H), jnp.float32))
    (h_n, c_n), (ts, ys) = jax.lax.scan(step, init, order)
    y = jnp.zeros((T, B, H), jnp.float32).at[ts].set(ys)
    return y, h_n, c_n


def reference_forward(enc, inp, lengths):
    lengths = [int(v) for v in lengths]
    max_len = max(lengths)
    B = inp.shape[0]
    x = jnp.transpose(inp[:, :max_len], (1, 0, 2))
    len_arr = jnp.asarray(lengths, jnp.int32)
    hs, cs = [], []
    layer_in = x
    for l in range(enc.num_layers):
        outs = []
        for d in range(enc.num_dirs):
            w_ih, w_hh, b_ih, b_hh = enc.params[(l, d)]
            y, h_n, c_n = _ref_layer_direction(layer_in, len_arr, w_ih, w_hh,
                                               b_ih + b_hh, reverse=(d == 1))
            outs.append(y)
            hs.append(h_n)
            cs.append(c_n)
        layer_in = jnp.concatenate(outs, -1) if enc.num_dirs == 2 else outs[0]
    outputs = jnp.transpose(layer_in, (1, 0, 2))
    h = jnp.stack(hs, axis=0)
    c = jnp.stack(cs, axis=0)
    if enc.bidirectional:
        h = h.reshape(enc.num_layers, 2, B, enc.hidden_size)
        h = jnp.concatenate([h[:, 0], h[:, 1]], axis=-1)
        c = c.reshape(enc.num_layers, 2, B, enc.hidden_size)
        c = jnp.concatenate([c[:, 0], c[:, 1]], axis=-1)
    return outputs, (h, c)


# ----------------------------------------------------------------------------
if __name__ == "__main__":
    key = jax.random.PRNGKey(0)
    kp, kp2, kx = jax.random.split(key, 3)

    batch, seq, input_size, hidden_size, num_layers = 4, 8, 16, 32, 2
    lengths = [8, 6, 5, 3]   # sorted descending, as pack_padded_sequence expects
    x = jax.random.normal(kx, (batch, seq, input_size), jnp.float32)

    # Tolerance reflects bf16 storage + default MXU precision in-kernel vs the
    # f32 / HIGHEST-precision scan reference (documented, per review).
    TOL = 4e-2

    # ---- bidirectional, 2 layers -------------------------------------------
    enc = RNNEncoder(input_size, hidden_size, num_layers,
                     dropout=0.0, bidirectional=True, key=kp)
    outputs, (h, c) = enc(x, lengths)
    jax.block_until_ready((outputs, h, c))

    out_dim = 2 * hidden_size
    assert outputs.shape == (batch, max(lengths), out_dim)
    assert h.shape == (num_layers, batch, out_dim)
    assert c.shape == h.shape
    # packed-sequence semantics: padded positions must be exactly zero
    assert float(jnp.abs(outputs[-1, lengths[-1]:]).max()) == 0.0

    ref_out, (ref_h, ref_c) = reference_forward(enc, x, lengths)
    np.testing.assert_allclose(np.asarray(outputs), np.asarray(ref_out),
                               atol=TOL, rtol=0)
    np.testing.assert_allclose(np.asarray(h), np.asarray(ref_h), atol=TOL, rtol=0)
    np.testing.assert_allclose(np.asarray(c), np.asarray(ref_c), atol=TOL, rtol=0)

    # ---- unidirectional, 1 layer (exercise the ndirs == 1 path) -------------
    enc1 = RNNEncoder(input_size, hidden_size, 1,
                      dropout=0.0, bidirectional=False, key=kp2)
    out1, (h1, c1) = enc1(x, lengths)
    jax.block_until_ready((out1, h1, c1))
    assert out1.shape == (batch, max(lengths), hidden_size)
    assert h1.shape == (1, batch, hidden_size)
    r_out1, (r_h1, r_c1) = reference_forward(enc1, x, lengths)
    np.testing.assert_allclose(np.asarray(out1), np.asarray(r_out1), atol=TOL, rtol=0)
    np.testing.assert_allclose(np.asarray(h1), np.asarray(r_h1), atol=TOL, rtol=0)
    np.testing.assert_allclose(np.asarray(c1), np.asarray(r_c1), atol=TOL, rtol=0)

    print("KERNEL_OK")
</pallas_src>

<mosaic_0001>
module attributes {stable_mosaic.version = 11 : i64} {
  func.func @_lstm_rec_kernel(%arg0: i32, %arg1: memref<64x128xbf16, #tpu.memory_space<vmem>>, %arg2: memref<64x128xbf16, #tpu.memory_space<vmem>>, %arg3: memref<128x512xbf16, #tpu.memory_space<vmem>>, %arg4: memref<128x512xbf16, #tpu.memory_space<vmem>>, %arg5: memref<128x512xbf16, #tpu.memory_space<vmem>>, %arg6: memref<128x512xbf16, #tpu.memory_space<vmem>>, %arg7: memref<1x512xf32, #tpu.memory_space<vmem>>, %arg8: memref<1x512xf32, #tpu.memory_space<vmem>>, %arg9: memref<8x1xi32, #tpu.memory_space<vmem>>, %arg10: memref<64x128xbf16, #tpu.memory_space<vmem>>, %arg11: memref<64x128xbf16, #tpu.memory_space<vmem>>, %arg12: memref<8x128xf32, #tpu.memory_space<vmem>>, %arg13: memref<8x128xf32, #tpu.memory_space<vmem>>, %arg14: memref<8x128xf32, #tpu.memory_space<vmem>>, %arg15: memref<8x128xf32, #tpu.memory_space<vmem>>, %arg16: memref<64x512xf32, #tpu.memory_space<vmem>>, %arg17: memref<64x512xf32, #tpu.memory_space<vmem>>, %arg18: memref<8x128xf32, #tpu.memory_space<vmem>>, %arg19: memref<8x128xf32, #tpu.memory_space<vmem>>, %arg20: memref<8x128xf32, #tpu.memory_space<vmem>>, %arg21: memref<8x128xf32, #tpu.memory_space<vmem>>) attributes {dimension_semantics = [#tpu.dimension_semantics<arbitrary>], iteration_bounds = array<i64: 1>, scalar_prefetch = 0 : i64, scratch_operands = 6 : i64, tpu.core_type = #tpu.core_type<tc>, window_params = [{transform_indices = @transform_0, window_bounds = array<i64: 64, 128>}, {transform_indices = @transform_1, window_bounds = array<i64: 64, 128>}, {pipeline_mode = #tpu.pipeline_mode<synchronous>, transform_indices = @transform_2, window_bounds = array<i64: 128, 512>}, {pipeline_mode = #tpu.pipeline_mode<synchronous>, transform_indices = @transform_3, window_bounds = array<i64: 128, 512>}, {pipeline_mode = #tpu.pipeline_mode<synchronous>, transform_indices = @transform_4, window_bounds = array<i64: 128, 512>}, {pipeline_mode = #tpu.pipeline_mode<synchronous>, transform_indices = @transform_5, window_bounds = array<i64: 128, 512>}, {pipeline_mode = #tpu.pipeline_mode<synchronous>, transform_indices = @transform_6, window_bounds = array<i64: 1, 512>}, {pipeline_mode = #tpu.pipeline_mode<synchronous>, transform_indices = @transform_7, window_bounds = array<i64: 1, 512>}, {pipeline_mode = #tpu.pipeline_mode<synchronous>, transform_indices = @transform_8, window_bounds = array<i64: 8, 1>}, {transform_indices = @transform_9, window_bounds = array<i64: 64, 128>}, {transform_indices = @transform_10, window_bounds = array<i64: 64, 128>}, {pipeline_mode = #tpu.pipeline_mode<synchronous>, transform_indices = @transform_11, window_bounds = array<i64: 8, 128>}, {pipeline_mode = #tpu.pipeline_mode<synchronous>, transform_indices = @transform_12, window_bounds = array<i64: 8, 128>}, {pipeline_mode = #tpu.pipeline_mode<synchronous>, transform_indices = @transform_13, window_bounds = array<i64: 8, 128>}, {pipeline_mode = #tpu.pipeline_mode<synchronous>, transform_indices = @transform_14, window_bounds = array<i64: 8, 128>}]} {
    %c8_i32 = arith.constant 8 : i32
    %0 = arith.muli %arg0, %c8_i32 : i32
    %c0 = arith.constant 0 : index
    %c0_0 = arith.constant 0 : index
    %1 = vector.load %arg9[%c0, %c0_0] : memref<8x1xi32, #tpu.memory_space<vmem>>, vector<8x1xi32>
    %c0_i32 = arith.constant 0 : i32
    %2 = arith.cmpi eq, %arg0, %c0_i32 : i32
    %3 = arith.extui %2 : i1 to i32
    %c0_i32_1 = arith.constant 0 : i32
    %4 = arith.cmpi ne, %3, %c0_i32_1 : i32
    scf.if %4 {
      %cst_187 = arith.constant 0.000000e+00 : f32
      %816 = vector.broadcast %cst_187 : f32 to vector<8x128xf32>
      %c0_188 = arith.constant 0 : index
      %c0_189 = arith.constant 0 : index
      %817 = vector.load %arg18[%c0_188, %c0_189] : memref<8x128xf32, #tpu.memory_space<vmem>>, vector<8x128xf32>
      tpu.vector_store %arg18[%c0_188, %c0_189], %816 {strides = array<i32>} : memref<8x128xf32, #tpu.memory_space<vmem>>, vector<8x128xf32>,
      %cst_190 = arith.constant 0.000000e+00 : f32
      %818 = vector.broadcast %cst_190 : f32 to vector<8x128xf32>
      %c0_191 = arith.constant 0 : index
      %c0_192 = arith.constant 0 : index
      %819 = vector.load %arg20[%c0_191, %c0_192] : memref<8x128xf32, #tpu.memory_space<vmem>>, vector<8x128xf32>
      tpu.vector_store %arg20[%c0_191, %c0_192], %818 {strides = array<i32>} : memref<8x128xf32, #tpu.memory_space<vmem>>, vector<8x128xf32>,
      %cst_193 = arith.constant 0.000000e+00 : f32
      %820 = vector.broadcast %cst_193 : f32 to vector<8x128xf32>
      %c0_194 = arith.constant 0 : index
      %c0_195 = arith.constant 0 : index
      %821 = vector.load %arg19[%c0_194, %c0_195] : memref<8x128xf32, #tpu.memory_space<vmem>>, vector<8x128xf32>
      tpu.vector_store %arg19[%c0_194, %c0_195], %820 {strides = array<i32>} : memref<8x128xf32, #tpu.memory_space<vmem>>, vector<8x128xf32>,
      %cst_196 = arith.constant 0.000000e+00 : f32
      %822 = vector.broadcast %cst_196 : f32 to vector<8x128xf32>
      %c0_197 = arith.constant 0 : index
      %c0_198 = arith.constant 0 : index
      %823 = vector.load %arg21[%c0_197, %c0_198] : memref<8x128xf32, #tpu.memory_space<vmem>>, vector<8x128xf32>
      tpu.vector_store %arg21[%c0_197, %c0_198], %822 {strides = array<i32>} : memref<8x128xf32, #tpu.memory_space<vmem>>, vector<8x128xf32>,
    } else {
    }
    %c0_2 = arith.constant 0 : index
    %c0_3 = arith.constant 0 : index
    %5 = vector.load %arg1[%c0_2, %c0_3] : memref<64x128xbf16, #tpu.memory_space<vmem>>, vector<64x128xbf16>
    %c0_4 = arith.constant 0 : index
    %c0_5 = arith.constant 0 : index
    %6 = vector.load %arg3[%c0_4, %c0_5] : memref<128x512xbf16, #tpu.memory_space<vmem>>, vector<128x512xbf16>
    %cst = arith.constant dense<0.000000e+00> : vector<64x512xf32>
    %7 = tpu.matmul %5, %6, %cst {dimension_numbers = #tpu.dot_dimension_numbers<[1], [0], [0], [1], [0, 0, 1, 1], [], []>} : vector<64x128xbf16>, vector<128x512xbf16>, vector<64x512xf32> -> vector<64x512xf32>
    %c0_6 = arith.constant 0 : index
    %c0_7 = arith.constant 0 : index
    %8 = vector.load %arg7[%c0_6, %c0_7] : memref<1x512xf32, #tpu.memory_space<vmem>>, vector<1x512xf32>
    %9 = vector.broadcast %8 : vector<1x512xf32> to vector<64x512xf32>
    %10 = arith.addf %7, %9 : vector<64x512xf32>
    %c0_8 = arith.constant 0 : index
    %c0_9 = arith.constant 0 : index
    %11 = vector.load %arg16[%c0_8, %c0_9] : memref<64x512xf32, #tpu.memory_space<vmem>>, vector<64x512xf32>
    tpu.vector_store %arg16[%c0_8, %c0_9], %10 {strides = array<i32>} : memref<64x512xf32, #tpu.memory_space<vmem>>, vector<64x512xf32>,
    %c0_10 = arith.constant 0 : index
    %c0_11 = arith.constant 0 : index
    %12 = vector.load %arg2[%c0_10, %c0_11] : memref<64x128xbf16, #tpu.memory_space<vmem>>, vector<64x128xbf16>
    %c0_12 = arith.constant 0 : index
    %c0_13 = arith.constant 0 : index
    %13 = vector.load %arg4[%c0_12, %c0_13] : memref<128x512xbf16, #tpu.memory_space<vmem>>, vector<128x512xbf16>
    %cst_14 = arith.constant dense<0.000000e+00> : vector<64x512xf32>
    %14 = tpu.matmul %12, %13, %cst_14 {dimension_numbers = #tpu.dot_dimension_numbers<[1], [0], [0], [1], [0, 0, 1, 1], [], []>} : vector<64x128xbf16>, vector<128x512xbf16>, vector<64x512xf32> -> vector<64x512xf32>
    %c0_15 = arith.constant 0 : index
    %c0_16 = arith.constant 0 : index
    %15 = vector.load %arg8[%c0_15, %c0_16] : memref<1x512xf32, #tpu.memory_space<vmem>>, vector<1x512xf32>
    %16 = vector.broadcast %15 : vector<1x512xf32> to vector<64x512xf32>
    %17 = arith.addf %14, %16 : vector<64x512xf32>
    %c0_17 = arith.constant 0 : index
    %c0_18 = arith.constant 0 : index
    %18 = vector.load %arg17[%c0_17, %c0_18] : memref<64x512xf32, #tpu.memory_space<vmem>>, vector<64x512xf32>
    tpu.vector_store %arg17[%c0_17, %c0_18], %17 {strides = array<i32>} : memref<64x512xf32, #tpu.memory_space<vmem>>, vector<64x512xf32>,
    %c0_19 = arith.constant 0 : index
    %c0_20 = arith.constant 0 : index
    %19 = vector.load %arg5[%c0_19, %c0_20] : memref<128x512xbf16, #tpu.memory_space<vmem>>, vector<128x512xbf16>
    %c0_21 = arith.constant 0 : index
    %c0_22 = arith.constant 0 : index
    %20 = vector.load %arg6[%c0_21, %c0_22] : memref<128x512xbf16, #tpu.memory_space<vmem>>, vector<128x512xbf16>
    %c0_23 = arith.constant 0 : index
    %c0_24 = arith.constant 0 : index
    %21 = vector.load %arg18[%c0_23, %c0_24] : memref<8x128xf32, #tpu.memory_space<vmem>>, vector<8x128xf32>
    %c0_25 = arith.constant 0 : index
    %c0_26 = arith.constant 0 : index
    %22 = vector.load %arg19[%c0_25, %c0_26] : memref<8x128xf32, #tpu.memory_space<vmem>>, vector<8x128xf32>
    %c0_27 = arith.constant 0 : index
    %c0_28 = arith.constant 0 : index
    %23 = vector.load %arg20[%c0_27, %c0_28] : memref<8x128xf32, #tpu.memory_space<vmem>>, vector<8x128xf32>
    %c0_29 = arith.constant 0 : index
    %c0_30 = arith.constant 0 : index
    %24 = vector.load %arg21[%c0_29, %c0_30] : memref<8x128xf32, #tpu.memory_space<vmem>>, vector<8x128xf32>
    %c0_i32_31 = arith.constant 0 : i32
    %25 = arith.addi %0, %c0_i32_31 : i32
    %c8_i32_32 = arith.constant 8 : i32
    %26 = arith.muli %c0_i32_31, %c8_i32_32 : i32
    %27 = tpu.assume_multiple %26, 8 : i32
    %28 = arith.index_cast %27 : i32 to index
    %c0_33 = arith.constant 0 : index
    %29 = vector.load %arg16[%28, %c0_33] : memref<64x512xf32, #tpu.memory_space<vmem>>, vector<8x512xf32>
    %30 = arith.truncf %21 : vector<8x128xf32> to vector<8x128xbf16>
    %cst_34 = arith.constant dense<0.000000e+00> : vector<8x512xf32>
    %31 = tpu.matmul %30, %19, %cst_34 {dimension_numbers = #tpu.dot_dimension_numbers<[1], [0], [0], [1], [0, 0, 1, 1], [], []>} : vector<8x128xbf16>, vector<128x512xbf16>, vector<8x512xf32> -> vector<8x512xf32>
    %32 = arith.addf %29, %31 : vector<8x512xf32>
    %33 = vector.extract_strided_slice %32 {offsets = [0, 0], sizes = [8, 128], strides = [1, 1]} : vector<8x512xf32> to vector<8x128xf32>
    %34 = arith.negf %33 : vector<8x128xf32>
    %35 = math.exp %34 : vector<8x128xf32>
    %cst_35 = arith.constant 1.000000e+00 : f32
    %36 = vector.broadcast %cst_35 : f32 to vector<8x128xf32>
    %37 = arith.addf %36, %35 : vector<8x128xf32>
    %38 = arith.divf %36, %37 : vector<8x128xf32>
    %39 = vector.extract_strided_slice %32 {offsets = [0, 128], sizes = [8, 128], strides = [1, 1]} : vector<8x512xf32> to vector<8x128xf32>
    %40 = arith.negf %39 : vector<8x128xf32>
    %41 = math.exp %40 : vector<8x128xf32>
    %cst_36 = arith.constant 1.000000e+00 : f32
    %42 = vector.broadcast %cst_36 : f32 to vector<8x128xf32>
    %43 = arith.addf %42, %41 : vector<8x128xf32>
    %44 = arith.divf %42, %43 : vector<8x128xf32>
    %45 = vector.extract_strided_slice %32 {offsets = [0, 256], sizes = [8, 128], strides = [1, 1]} : vector<8x512xf32> to vector<8x128xf32>
    %46 = math.tanh %45 : vector<8x128xf32>
    %47 = vector.extract_strided_slice %32 {offsets = [0, 384], sizes = [8, 128], strides = [1, 1]} : vector<8x512xf32> to vector<8x128xf32>
    %48 = arith.negf %47 : vector<8x128xf32>
    %49 = math.exp %48 : vector<8x128xf32>
    %cst_37 = arith.constant 1.000000e+00 : f32
    %50 = vector.broadcast %cst_37 : f32 to vector<8x128xf32>
    %51 = arith.addf %50, %49 : vector<8x128xf32>
    %52 = arith.divf %50, %51 : vector<8x128xf32>
    %53 = arith.mulf %44, %23 : vector<8x128xf32>
    %54 = arith.mulf %38, %46 : vector<8x128xf32>
    %55 = arith.addf %53, %54 : vector<8x128xf32>
    %56 = math.tanh %55 : vector<8x128xf32>
    %57 = arith.mulf %52, %56 : vector<8x128xf32>
    %58 = vector.broadcast %25 : i32 to vector<8x1xi32>
    %59 = arith.cmpi slt, %58, %1 : vector<8x1xi32>
    %60 = vector.shape_cast %59 : vector<8x1xi1> to vector<8x1xi1>
    %61 = vector.broadcast %60 : vector<8x1xi1> to vector<8x128xi1>
    %62 = arith.select %61, %57, %21 : vector<8x128xi1>, vector<8x128xf32>
    %63 = vector.shape_cast %59 : vector<8x1xi1> to vector<8x1xi1>
    %64 = vector.broadcast %63 : vector<8x1xi1> to vector<8x128xi1>
    %65 = arith.select %64, %55, %23 : vector<8x128xi1>, vector<8x128xf32>
    %cst_38 = arith.constant 0.000000e+00 : f32
    %66 = vector.shape_cast %59 : vector<8x1xi1> to vector<8x1xi1>
    %67 = vector.broadcast %66 : vector<8x1xi1> to vector<8x128xi1>
    %68 = vector.broadcast %cst_38 : f32 to vector<8x128xf32>
    %69 = arith.select %67, %57, %68 : vector<8x128xi1>, vector<8x128xf32>
    %70 = arith.truncf %69 : vector<8x128xf32> to vector<8x128xbf16>
    %71 = arith.index_cast %27 : i32 to index
    %c0_39 = arith.constant 0 : index
    %72 = vector.load %arg10[%71, %c0_39] : memref<64x128xbf16, #tpu.memory_space<vmem>>, vector<8x128xbf16>
    tpu.vector_store %arg10[%71, %c0_39], %70 {strides = array<i32>} : memref<64x128xbf16, #tpu.memory_space<vmem>>, vector<8x128xbf16>,
    %c7_i32 = arith.constant 7 : i32
    %73 = arith.subi %c7_i32, %c0_i32_31 : i32
    %74 = arith.addi %0, %c0_i32_31 : i32
    %c7_i32_40 = arith.constant 7 : i32
    %75 = arith.subi %c7_i32_40, %74 : i32
    %c8_i32_41 = arith.constant 8 : i32
    %76 = arith.muli %73, %c8_i32_41 : i32
    %77 = tpu.assume_multiple %76, 8 : i32
    %78 = arith.index_cast %77 : i32 to index
    %c0_42 = arith.constant 0 : index
    %79 = vector.load %arg17[%78, %c0_42] : memref<64x512xf32, #tpu.memory_space<vmem>>, vector<8x512xf32>
    %80 = arith.truncf %22 : vector<8x128xf32> to vector<8x128xbf16>
    %cst_43 = arith.constant dense<0.000000e+00> : vector<8x512xf32>
    %81 = tpu.matmul %80, %20, %cst_43 {dimension_numbers = #tpu.dot_dimension_numbers<[1], [0], [0], [1], [0, 0, 1, 1], [], []>} : vector<8x128xbf16>, vector<128x512xbf16>, vector<8x512xf32> -> vector<8x512xf32>
    %82 = arith.addf %79, %81 : vector<8x512xf32>
    %83 = vector.extract_strided_slice %82 {offsets = [0, 0], sizes = [8, 128], strides = [1, 1]} : vector<8x512xf32> to vector<8x128xf32>
    %84 = arith.negf %83 : vector<8x128xf32>
    %85 = math.exp %84 : vector<8x128xf32>
    %cst_44 = arith.constant 1.000000e+00 : f32
    %86 = vector.broadcast %cst_44 : f32 to vector<8x128xf32>
    %87 = arith.addf %86, %85 : vector<8x128xf32>
    %88 = arith.divf %86, %87 : vector<8x128xf32>
    %89 = vector.extract_strided_slice %82 {offsets = [0, 128], sizes = [8, 128], strides = [1, 1]} : vector<8x512xf32> to vector<8x128xf32>
    %90 = arith.negf %89 : vector<8x128xf32>
    %91 = math.exp %90 : vector<8x128xf32>
    %cst_45 = arith.constant 1.000000e+00 : f32
    %92 = vector.broadcast %cst_45 : f32 to vector<8x128xf32>
    %93 = arith.addf %92, %91 : vector<8x128xf32>
    %94 = arith.divf %92, %93 : vector<8x128xf32>
    %95 = vector.extract_strided_slice %82 {offsets = [0, 256], sizes = [8, 128], strides = [1, 1]} : vector<8x512xf32> to vector<8x128xf32>
    %96 = math.tanh %95 : vector<8x128xf32>
    %97 = vector.extract_strided_slice %82 {offsets = [0, 384], sizes = [8, 128], strides = [1, 1]} : vector<8x512xf32> to vector<8x128xf32>
    %98 = arith.negf %97 : vector<8x128xf32>
    %99 = math.exp %98 : vector<8x128xf32>
    %cst_46 = arith.constant 1.000000e+00 : f32
    %100 = vector.broadcast %cst_46 : f32 to vector<8x128xf32>
    %101 = arith.addf %100, %99 : vector<8x128xf32>
    %102 = arith.divf %100, %101 : vector<8x128xf32>
    %103 = arith.mulf %94, %24 : vector<8x128xf32>
    %104 = arith.mulf %88, %96 : vector<8x128xf32>
    %105 = arith.addf %103, %104 : vector<8x128xf32>
    %106 = math.tanh %105 : vector<8x128xf32>
    %107 = arith.mulf %102, %106 : vector<8x128xf32>
    %108 = vector.broadcast %75 : i32 to vector<8x1xi32>
    %109 = arith.cmpi slt, %108, %1 : vector<8x1xi32>
    %110 = vector.shape_cast %109 : vector<8x1xi1> to vector<8x1xi1>
    %111 = vector.broadcast %110 : vector<8x1xi1> to vector<8x128xi1>
    %112 = arith.select %111, %107, %22 : vector<8x128xi1>, vector<8x128xf32>
    %113 = vector.shape_cast %109 : vector<8x1xi1> to vector<8x1xi1>
    %114 = vector.broadcast %113 : vector<8x1xi1> to vector<8x128xi1>
    %115 = arith.select %114, %105, %24 : vector<8x128xi1>, vector<8x128xf32>
    %cst_47 = arith.constant 0.000000e+00 : f32
    %116 = vector.shape_cast %109 : vector<8x1xi1> to vector<8x1xi1>
    %117 = vector.broadcast %116 : vector<8x1xi1> to vector<8x128xi1>
    %118 = vector.broadcast %cst_47 : f32 to vector<8x128xf32>
    %119 = arith.select %117, %107, %118 : vector<8x128xi1>, vector<8x128xf32>
    %120 = arith.truncf %119 : vector<8x128xf32> to vector<8x128xbf16>
    %121 = arith.index_cast %77 : i32 to index
    %c0_48 = arith.constant 0 : index
    %122 = vector.load %arg11[%121, %c0_48] : memref<64x128xbf16, #tpu.memory_space<vmem>>, vector<8x128xbf16>
    tpu.vector_store %arg11[%121, %c0_48], %120 {strides = array<i32>} : memref<64x128xbf16, #tpu.memory_space<vmem>>, vector<8x128xbf16>,
    %c1_i32 = arith.constant 1 : i32
    %123 = arith.addi %0, %c1_i32 : i32
    %c8_i32_49 = arith.constant 8 : i32
    %124 = arith.muli %c1_i32, %c8_i32_49 : i32
    %125 = tpu.assume_multiple %124, 8 : i32
    %126 = arith.index_cast %125 : i32 to index
    %c0_50 = arith.constant 0 : index
    %127 = vector.load %arg16[%126, %c0_50] : memref<64x512xf32, #tpu.memory_space<vmem>>, vector<8x512xf32>
    %128 = arith.truncf %62 : vector<8x128xf32> to vector<8x128xbf16>
    %cst_51 = arith.constant dense<0.000000e+00> : vector<8x512xf32>
    %129 = tpu.matmul %128, %19, %cst_51 {dimension_numbers = #tpu.dot_dimension_numbers<[1], [0], [0], [1], [0, 0, 1, 1], [], []>} : vector<8x128xbf16>, vector<128x512xbf16>, vector<8x512xf32> -> vector<8x512xf32>
    %130 = arith.addf %127, %129 : vector<8x512xf32>
    %131 = vector.extract_strided_slice %130 {offsets = [0, 0], sizes = [8, 128], strides = [1, 1]} : vector<8x512xf32> to vector<8x128xf32>
    %132 = arith.negf %131 : vector<8x128xf32>
    %133 = math.exp %132 : vector<8x128xf32>
    %cst_52 = arith.constant 1.000000e+00 : f32
    %134 = vector.broadcast %cst_52 : f32 to vector<8x128xf32>
    %135 = arith.addf %134, %133 : vector<8x128xf32>
    %136 = arith.divf %134, %135 : vector<8x128xf32>
    %137 = vector.extract_strided_slice %130 {offsets = [0, 128], sizes = [8, 128], strides = [1, 1]} : vector<8x512xf32> to vector<8x128xf32>
    %138 = arith.negf %137 : vector<8x128xf32>
    %139 = math.exp %138 : vector<8x128xf32>
    %cst_53 = arith.constant 1.000000e+00 : f32
    %140 = vector.broadcast %cst_53 : f32 to vector<8x128xf32>
    %141 = arith.addf %140, %139 : vector<8x128xf32>
    %142 = arith.divf %140, %141 : vector<8x128xf32>
    %143 = vector.extract_strided_slice %130 {offsets = [0, 256], sizes = [8, 128], strides = [1, 1]} : vector<8x512xf32> to vector<8x128xf32>
    %144 = math.tanh %143 : vector<8x128xf32>
    %145 = vector.extract_strided_slice %130 {offsets = [0, 384], sizes = [8, 128], strides = [1, 1]} : vector<8x512xf32> to vector<8x128xf32>
    %146 = arith.negf %145 : vector<8x128xf32>
    %147 = math.exp %146 : vector<8x128xf32>
    %cst_54 = arith.constant 1.000000e+00 : f32
    %148 = vector.broadcast %cst_54 : f32 to vector<8x128xf32>
    %149 = arith.addf %148, %147 : vector<8x128xf32>
    %150 = arith.divf %148, %149 : vector<8x128xf32>
    %151 = arith.mulf %142, %65 : vector<8x128xf32>
    %152 = arith.mulf %136, %144 : vector<8x128xf32>
    %153 = arith.addf %151, %152 : vector<8x128xf32>
    %154 = math.tanh %153 : vector<8x128xf32>
    %155 = arith.mulf %150, %154 : vector<8x128xf32>
    %156 = vector.broadcast %123 : i32 to vector<8x1xi32>
    %157 = arith.cmpi slt, %156, %1 : vector<8x1xi32>
    %158 = vector.shape_cast %157 : vector<8x1xi1> to vector<8x1xi1>
    %159 = vector.broadcast %158 : vector<8x1xi1> to vector<8x128xi1>
    %160 = arith.select %159, %155, %62 : vector<8x128xi1>, vector<8x128xf32>
    %161 = vector.shape_cast %157 : vector<8x1xi1> to vector<8x1xi1>
    %162 = vector.broadcast %161 : vector<8x1xi1> to vector<8x128xi1>
    %163 = arith.select %162, %153, %65 : vector<8x128xi1>, vector<8x128xf32>
    %cst_55 = arith.constant 0.000000e+00 : f32
    %164 = vector.shape_cast %157 : vector<8x1xi1> to vector<8x1xi1>
    %165 = vector.broadcast %164 : vector<8x1xi1> to vector<8x128xi1>
    %166 = vector.broadcast %cst_55 : f32 to vector<8x128xf32>
    %167 = arith.select %165, %155, %166 : vector<8x128xi1>, vector<8x128xf32>
    %168 = arith.truncf %167 : vector<8x128xf32> to vector<8x128xbf16>
    %169 = arith.index_cast %125 : i32 to index
    %c0_56 = arith.constant 0 : index
    %170 = vector.load %arg10[%169, %c0_56] : memref<64x128xbf16, #tpu.memory_space<vmem>>, vector<8x128xbf16>
    tpu.vector_store %arg10[%169, %c0_56], %168 {strides = array<i32>} : memref<64x128xbf16, #tpu.memory_space<vmem>>, vector<8x128xbf16>,
    %c7_i32_57 = arith.constant 7 : i32
    %171 = arith.subi %c7_i32_57, %c1_i32 : i32
    %172 = arith.addi %0, %c1_i32 : i32
    %c7_i32_58 = arith.constant 7 : i32
    %173 = arith.subi %c7_i32_58, %172 : i32
    %c8_i32_59 = arith.constant 8 : i32
    %174 = arith.muli %171, %c8_i32_59 : i32
    %175 = tpu.assume_multiple %174, 8 : i32
    %176 = arith.index_cast %175 : i32 to index
    %c0_60 = arith.constant 0 : index
    %177 = vector.load %arg17[%176, %c0_60] : memref<64x512xf32, #tpu.memory_space<vmem>>, vector<8x512xf32>
    %178 = arith.truncf %112 : vector<8x128xf32> to vector<8x128xbf16>
    %cst_61 = arith.constant dense<0.000000e+00> : vector<8x512xf32>
    %179 = tpu.matmul %178, %20, %cst_61 {dimension_numbers = #tpu.dot_dimension_numbers<[1], [0], [0], [1], [0, 0, 1, 1], [], []>} : vector<8x128xbf16>, vector<128x512xbf16>, vector<8x512xf32> -> vector<8x512xf32>
    %180 = arith.addf %177, %179 : vector<8x512xf32>
    %181 = vector.extract_strided_slice %180 {offsets = [0, 0], sizes = [8, 128], strides = [1, 1]} : vector<8x512xf32> to vector<8x128xf32>
    %182 = arith.negf %181 : vector<8x128xf32>
    %183 = math.exp %182 : vector<8x128xf32>
    %cst_62 = arith.constant 1.000000e+00 : f32
    %184 = vector.broadcast %cst_62 : f32 to vector<8x128xf32>
    %185 = arith.addf %184, %183 : vector<8x128xf32>
    %186 = arith.divf %184, %185 : vector<8x128xf32>
    %187 = vector.extract_strided_slice %180 {offsets = [0, 128], sizes = [8, 128], strides = [1, 1]} : vector<8x512xf32> to vector<8x128xf32>
    %188 = arith.negf %187 : vector<8x128xf32>
    %189 = math.exp %188 : vector<8x128xf32>
    %cst_63 = arith.constant 1.000000e+00 : f32
    %190 = vector.broadcast %cst_63 : f32 to vector<8x128xf32>
    %191 = arith.addf %190, %189 : vector<8x128xf32>
    %192 = arith.divf %190, %191 : vector<8x128xf32>
    %193 = vector.extract_strided_slice %180 {offsets = [0, 256], sizes = [8, 128], strides = [1, 1]} : vector<8x512xf32> to vector<8x128xf32>
    %194 = math.tanh %193 : vector<8x128xf32>
    %195 = vector.extract_strided_slice %180 {offsets = [0, 384], sizes = [8, 128], strides = [1, 1]} : vector<8x512xf32> to vector<8x128xf32>
    %196 = arith.negf %195 : vector<8x128xf32>
    %197 = math.exp %196 : vector<8x128xf32>
    %cst_64 = arith.constant 1.000000e+00 : f32
    %198 = vector.broadcast %cst_64 : f32 to vector<8x128xf32>
    %199 = arith.addf %198, %197 : vector<8x128xf32>
    %200 = arith.divf %198, %199 : vector<8x128xf32>
    %201 = arith.mulf %192, %115 : vector<8x128xf32>
    %202 = arith.mulf %186, %194 : vector<8x128xf32>
    %203 = arith.addf %201, %202 : vector<8x128xf32>
    %204 = math.tanh %203 : vector<8x128xf32>
    %205 = arith.mulf %200, %204 : vector<8x128xf32>
    %206 = vector.broadcast %173 : i32 to vector<8x1xi32>
    %207 = arith.cmpi slt, %206, %1 : vector<8x1xi32>
    %208 = vector.shape_cast %207 : vector<8x1xi1> to vector<8x1xi1>
    %209 = vector.broadcast %208 : vector<8x1xi1> to vector<8x128xi1>
    %210 = arith.select %209, %205, %112 : vector<8x128xi1>, vector<8x128xf32>
    %211 = vector.shape_cast %207 : vector<8x1xi1> to vector<8x1xi1>
    %212 = vector.broadcast %211 : vector<8x1xi1> to vector<8x128xi1>
    %213 = arith.select %212, %203, %115 : vector<8x128xi1>, vector<8x128xf32>
    %cst_65 = arith.constant 0.000000e+00 : f32
    %214 = vector.shape_cast %207 : vector<8x1xi1> to vector<8x1xi1>
    %215 = vector.broadcast %214 : vector<8x1xi1> to vector<8x128xi1>
    %216 = vector.broadcast %cst_65 : f32 to vector<8x128xf32>
    %217 = arith.select %215, %205, %216 : vector<8x128xi1>, vector<8x128xf32>
    %218 = arith.truncf %217 : vector<8x128xf32> to vector<8x128xbf16>
    %219 = arith.index_cast %175 : i32 to index
    %c0_66 = arith.constant 0 : index
    %220 = vector.load %arg11[%219, %c0_66] : memref<64x128xbf16, #tpu.memory_space<vmem>>, vector<8x128xbf16>
    tpu.vector_store %arg11[%219, %c0_66], %218 {strides = array<i32>} : memref<64x128xbf16, #tpu.memory_space<vmem>>, vector<8x128xbf16>,
    %c2_i32 = arith.constant 2 : i32
    %221 = arith.addi %0, %c2_i32 : i32
    %c8_i32_67 = arith.constant 8 : i32
    %222 = arith.muli %c2_i32, %c8_i32_67 : i32
    %223 = tpu.assume_multiple %222, 8 : i32
    %224 = arith.index_cast %223 : i32 to index
    %c0_68 = arith.constant 0 : index
    %225 = vector.load %arg16[%224, %c0_68] : memref<64x512xf32, #tpu.memory_space<vmem>>, vector<8x512xf32>
    %226 = arith.truncf %160 : vector<8x128xf32> to vector<8x128xbf16>
    %cst_69 = arith.constant dense<0.000000e+00> : vector<8x512xf32>
    %227 = tpu.matmul %226, %19, %cst_69 {dimension_numbers = #tpu.dot_dimension_numbers<[1], [0], [0], [1], [0, 0, 1, 1], [], []>} : vector<8x128xbf16>, vector<128x512xbf16>, vector<8x512xf32> -> vector<8x512xf32>
    %228 = arith.addf %225, %227 : vector<8x512xf32>
    %229 = vector.extract_strided_slice %228 {offsets = [0, 0], sizes = [8, 128], strides = [1, 1]} : vector<8x512xf32> to vector<8x128xf32>
    %230 = arith.negf %229 : vector<8x128xf32>
    %231 = math.exp %230 : vector<8x128xf32>
    %cst_70 = arith.constant 1.000000e+00 : f32
    %232 = vector.broadcast %cst_70 : f32 to vector<8x128xf32>
    %233 = arith.addf %232, %231 : vector<8x128xf32>
    %234 = arith.divf %232, %233 : vector<8x128xf32>
    %235 = vector.extract_strided_slice %228 {offsets = [0, 128], sizes = [8, 128], strides = [1, 1]} : vector<8x512xf32> to vector<8x128xf32>
    %236 = arith.negf %235 : vector<8x128xf32>
    %237 = math.exp %236 : vector<8x128xf32>
    %cst_71 = arith.constant 1.000000e+00 : f32
    %238 = vector.broadcast %cst_71 : f32 to vector<8x128xf32>
    %239 = arith.addf %238, %237 : vector<8x128xf32>
    %240 = arith.divf %238, %239 : vector<8x128xf32>
    %241 = vector.extract_strided_slice %228 {offsets = [0, 256], sizes = [8, 128], strides = [1, 1]} : vector<8x512xf32> to vector<8x128xf32>
    %242 = math.tanh %241 : vector<8x128xf32>
    %243 = vector.extract_strided_slice %228 {offsets = [0, 384], sizes = [8, 128], strides = [1, 1]} : vector<8x512xf32> to vector<8x128xf32>
    %244 = arith.negf %243 : vector<8x128xf32>
    %245 = math.exp %244 : vector<8x128xf32>
    %cst_72 = arith.constant 1.000000e+00 : f32
    %246 = vector.broadcast %cst_72 : f32 to vector<8x128xf32>
    %247 = arith.addf %246, %245 : vector<8x128xf32>
    %248 = arith.divf %246, %247 : vector<8x128xf32>
    %249 = arith.mulf %240, %163 : vector<8x128xf32>
    %250 = arith.mulf %234, %242 : vector<8x128xf32>
    %251 = arith.addf %249, %250 : vector<8x128xf32>
    %252 = math.tanh %251 : vector<8x128xf32>
    %253 = arith.mulf %248, %252 : vector<8x128xf32>
    %254 = vector.broadcast %221 : i32 to vector<8x1xi32>
    %255 = arith.cmpi slt, %254, %1 : vector<8x1xi32>
    %256 = vector.shape_cast %255 : vector<8x1xi1> to vector<8x1xi1>
    %257 = vector.broadcast %256 : vector<8x1xi1> to vector<8x128xi1>
    %258 = arith.select %257, %253, %160 : vector<8x128xi1>, vector<8x128xf32>
    %259 = vector.shape_cast %255 : vector<8x1xi1> to vector<8x1xi1>
    %260 = vector.broadcast %259 : vector<8x1xi1> to vector<8x128xi1>
    %261 = arith.select %260, %251, %163 : vector<8x128xi1>, vector<8x128xf32>
    %cst_73 = arith.constant 0.000000e+00 : f32
    %262 = vector.shape_cast %255 : vector<8x1xi1> to vector<8x1xi1>
    %263 = vector.broadcast %262 : vector<8x1xi1> to vector<8x128xi1>
    %264 = vector.broadcast %cst_73 : f32 to vector<8x128xf32>
    %265 = arith.select %263, %253, %264 : vector<8x128xi1>, vector<8x128xf32>
    %266 = arith.truncf %265 : vector<8x128xf32> to vector<8x128xbf16>
    %267 = arith.index_cast %223 : i32 to index
    %c0_74 = arith.constant 0 : index
    %268 = vector.load %arg10[%267, %c0_74] : memref<64x128xbf16, #tpu.memory_space<vmem>>, vector<8x128xbf16>
    tpu.vector_store %arg10[%267, %c0_74], %266 {strides = array<i32>} : memref<64x128xbf16, #tpu.memory_space<vmem>>, vector<8x128xbf16>,
    %c7_i32_75 = arith.constant 7 : i32
    %269 = arith.subi %c7_i32_75, %c2_i32 : i32
    %270 = arith.addi %0, %c2_i32 : i32
    %c7_i32_76 = arith.constant 7 : i32
    %271 = arith.subi %c7_i32_76, %270 : i32
    %c8_i32_77 = arith.constant 8 : i32
    %272 = arith.muli %269, %c8_i32_77 : i32
    %273 = tpu.assume_multiple %272, 8 : i32
    %274 = arith.index_cast %273 : i32 to index
    %c0_78 = arith.constant 0 : index
    %275 = vector.load %arg17[%274, %c0_78] : memref<64x512xf32, #tpu.memory_space<vmem>>, vector<8x512xf32>
    %276 = arith.truncf %210 : vector<8x128xf32> to vector<8x128xbf16>
    %cst_79 = arith.constant dense<0.000000e+00> : vector<8x512xf32>
    %277 = tpu.matmul %276, %20, %cst_79 {dimension_numbers = #tpu.dot_dimension_numbers<[1], [0], [0], [1], [0, 0, 1, 1], [], []>} : vector<8x128xbf16>, vector<128x512xbf16>, vector<8x512xf32> -> vector<8x512xf32>
    %278 = arith.addf %275, %277 : vector<8x512xf32>
    %279 = vector.extract_strided_slice %278 {offsets = [0, 0], sizes = [8, 128], strides = [1, 1]} : vector<8x512xf32> to vector<8x128xf32>
    %280 = arith.negf %279 : vector<8x128xf32>
    %281 = math.exp %280 : vector<8x128xf32>
    %cst_80 = arith.constant 1.000000e+00 : f32
    %282 = vector.broadcast %cst_80 : f32 to vector<8x128xf32>
    %283 = arith.addf %282, %281 : vector<8x128xf32>
    %284 = arith.divf %282, %283 : vector<8x128xf32>
    %285 = vector.extract_strided_slice %278 {offsets = [0, 128], sizes = [8, 128], strides = [1, 1]} : vector<8x512xf32> to vector<8x128xf32>
    %286 = arith.negf %285 : vector<8x128xf32>
    %287 = math.exp %286 : vector<8x128xf32>
    %cst_81 = arith.constant 1.000000e+00 : f32
    %288 = vector.broadcast %cst_81 : f32 to vector<8x128xf32>
    %289 = arith.addf %288, %287 : vector<8x128xf32>
    %290 = arith.divf %288, %289 : vector<8x128xf32>
    %291 = vector.extract_strided_slice %278 {offsets = [0, 256], sizes = [8, 128], strides = [1, 1]} : vector<8x512xf32> to vector<8x128xf32>
    %292 = math.tanh %291 : vector<8x128xf32>
    %293 = vector.extract_strided_slice %278 {offsets = [0, 384], sizes = [8, 128], strides = [1, 1]} : vector<8x512xf32> to vector<8x128xf32>
    %294 = arith.negf %293 : vector<8x128xf32>
    %295 = math.exp %294 : vector<8x128xf32>
    %cst_82 = arith.constant 1.000000e+00 : f32
    %296 = vector.broadcast %cst_82 : f32 to vector<8x128xf32>
    %297 = arith.addf %296, %295 : vector<8x128xf32>
    %298 = arith.divf %296, %297 : vector<8x128xf32>
    %299 = arith.mulf %290, %213 : vector<8x128xf32>
    %300 = arith.mulf %284, %292 : vector<8x128xf32>
    %301 = arith.addf %299, %300 : vector<8x128xf32>
    %302 = math.tanh %301 : vector<8x128xf32>
    %303 = arith.mulf %298, %302 : vector<8x128xf32>
    %304 = vector.broadcast %271 : i32 to vector<8x1xi32>
    %305 = arith.cmpi slt, %304, %1 : vector<8x1xi32>
    %306 = vector.shape_cast %305 : vector<8x1xi1> to vector<8x1xi1>
    %307 = vector.broadcast %306 : vector<8x1xi1> to vector<8x128xi1>
    %308 = arith.select %307, %303, %210 : vector<8x128xi1>, vector<8x128xf32>
    %309 = vector.shape_cast %305 : vector<8x1xi1> to vector<8x1xi1>
    %310 = vector.broadcast %309 : vector<8x1xi1> to vector<8x128xi1>
    %311 = arith.select %310, %301, %213 : vector<8x128xi1>, vector<8x128xf32>
    %cst_83 = arith.constant 0.000000e+00 : f32
    %312 = vector.shape_cast %305 : vector<8x1xi1> to vector<8x1xi1>
    %313 = vector.broadcast %312 : vector<8x1xi1> to vector<8x128xi1>
    %314 = vector.broadcast %cst_83 : f32 to vector<8x128xf32>
    %315 = arith.select %313, %303, %314 : vector<8x128xi1>, vector<8x128xf32>
    %316 = arith.truncf %315 : vector<8x128xf32> to vector<8x128xbf16>
    %317 = arith.index_cast %273 : i32 to index
    %c0_84 = arith.constant 0 : index
    %318 = vector.load %arg11[%317, %c0_84] : memref<64x128xbf16, #tpu.memory_space<vmem>>, vector<8x128xbf16>
    tpu.vector_store %arg11[%317, %c0_84], %316 {strides = array<i32>} : memref<64x128xbf16, #tpu.memory_space<vmem>>, vector<8x128xbf16>,
    %c3_i32 = arith.constant 3 : i32
    %319 = arith.addi %0, %c3_i32 : i32
    %c8_i32_85 = arith.constant 8 : i32
    %320 = arith.muli %c3_i32, %c8_i32_85 : i32
    %321 = tpu.assume_multiple %320, 8 : i32
    %322 = arith.index_cast %321 : i32 to index
    %c0_86 = arith.constant 0 : index
    %323 = vector.load %arg16[%322, %c0_86] : memref<64x512xf32, #tpu.memory_space<vmem>>, vector<8x512xf32>
    %324 = arith.truncf %258 : vector<8x128xf32> to vector<8x128xbf16>
    %cst_87 = arith.constant dense<0.000000e+00> : vector<8x512xf32>
    %325 = tpu.matmul %324, %19, %cst_87 {dimension_numbers = #tpu.dot_dimension_numbers<[1], [0], [0], [1], [0, 0, 1, 1], [], []>} : vector<8x128xbf16>, vector<128x512xbf16>, vector<8x512xf32> -> vector<8x512xf32>
    %326 = arith.addf %323, %325 : vector<8x512xf32>
    %327 = vector.extract_strided_slice %326 {offsets = [0, 0], sizes = [8, 128], strides = [1, 1]} : vector<8x512xf32> to vector<8x128xf32>
    %328 = arith.negf %327 : vector<8x128xf32>
    %329 = math.exp %328 : vector<8x128xf32>
    %cst_88 = arith.constant 1.000000e+00 : f32
    %330 = vector.broadcast %cst_88 : f32 to vector<8x128xf32>
    %331 = arith.addf %330, %329 : vector<8x128xf32>
    %332 = arith.divf %330, %331 : vector<8x128xf32>
    %333 = vector.extract_strided_slice %326 {offsets = [0, 128], sizes = [8, 128], strides = [1, 1]} : vector<8x512xf32> to vector<8x128xf32>
    %334 = arith.negf %333 : vector<8x128xf32>
    %335 = math.exp %334 : vector<8x128xf32>
    %cst_89 = arith.constant 1.000000e+00 : f32
    %336 = vector.broadcast %cst_89 : f32 to vector<8x128xf32>
    %337 = arith.addf %336, %335 : vector<8x128xf32>
    %338 = arith.divf %336, %337 : vector<8x128xf32>
    %339 = vector.extract_strided_slice %326 {offsets = [0, 256], sizes = [8, 128], strides = [1, 1]} : vector<8x512xf32> to vector<8x128xf32>
    %340 = math.tanh %339 : vector<8x128xf32>
    %341 = vector.extract_strided_slice %326 {offsets = [0, 384], sizes = [8, 128], strides = [1, 1]} : vector<8x512xf32> to vector<8x128xf32>
    %342 = arith.negf %341 : vector<8x128xf32>
    %343 = math.exp %342 : vector<8x128xf32>
    %cst_90 = arith.constant 1.000000e+00 : f32
    %344 = vector.broadcast %cst_90 : f32 to vector<8x128xf32>
    %345 = arith.addf %344, %343 : vector<8x128xf32>
    %346 = arith.divf %344, %345 : vector<8x128xf32>
    %347 = arith.mulf %338, %261 : vector<8x128xf32>
    %348 = arith.mulf %332, %340 : vector<8x128xf32>
    %349 = arith.addf %347, %348 : vector<8x128xf32>
    %350 = math.tanh %349 : vector<8x128xf32>
    %351 = arith.mulf %346, %350 : vector<8x128xf32>
    %352 = vector.broadcast %319 : i32 to vector<8x1xi32>
    %353 = arith.cmpi slt, %352, %1 : vector<8x1xi32>
    %354 = vector.shape_cast %353 : vector<8x1xi1> to vector<8x1xi1>
    %355 = vector.broadcast %354 : vector<8x1xi1> to vector<8x128xi1>
    %356 = arith.select %355, %351, %258 : vector<8x128xi1>, vector<8x128xf32>
    %357 = vector.shape_cast %353 : vector<8x1xi1> to vector<8x1xi1>
    %358 = vector.broadcast %357 : vector<8x1xi1> to vector<8x128xi1>
    %359 = arith.select %358, %349, %261 : vector<8x128xi1>, vector<8x128xf32>
    %cst_91 = arith.constant 0.000000e+00 : f32
    %360 = vector.shape_cast %353 : vector<8x1xi1> to vector<8x1xi1>
    %361 = vector.broadcast %360 : vector<8x1xi1> to vector<8x128xi1>
    %362 = vector.broadcast %cst_91 : f32 to vector<8x128xf32>
    %363 = arith.select %361, %351, %362 : vector<8x128xi1>, vector<8x128xf32>
    %364 = arith.truncf %363 : vector<8x128xf32> to vector<8x128xbf16>
    %365 = arith.index_cast %321 : i32 to index
    %c0_92 = arith.constant 0 : index
    %366 = vector.load %arg10[%365, %c0_92] : memref<64x128xbf16, #tpu.memory_space<vmem>>, vector<8x128xbf16>
    tpu.vector_store %arg10[%365, %c0_92], %364 {strides = array<i32>} : memref<64x128xbf16, #tpu.memory_space<vmem>>, vector<8x128xbf16>,
    %c7_i32_93 = arith.constant 7 : i32
    %367 = arith.subi %c7_i32_93, %c3_i32 : i32
    %368 = arith.addi %0, %c3_i32 : i32
    %c7_i32_94 = arith.constant 7 : i32
    %369 = arith.subi %c7_i32_94, %368 : i32
    %c8_i32_95 = arith.constant 8 : i32
    %370 = arith.muli %367, %c8_i32_95 : i32
    %371 = tpu.assume_multiple %370, 8 : i32
    %372 = arith.index_cast %371 : i32 to index
    %c0_96 = arith.constant 0 : index
    %373 = vector.load %arg17[%372, %c0_96] : memref<64x512xf32, #tpu.memory_space<vmem>>, vector<8x512xf32>
    %374 = arith.truncf %308 : vector<8x128xf32> to vector<8x128xbf16>
    %cst_97 = arith.constant dense<0.000000e+00> : vector<8x512xf32>
    %375 = tpu.matmul %374, %20, %cst_97 {dimension_numbers = #tpu.dot_dimension_numbers<[1], [0], [0], [1], [0, 0, 1, 1], [], []>} : vector<8x128xbf16>, vector<128x512xbf16>, vector<8x512xf32> -> vector<8x512xf32>
    %376 = arith.addf %373, %375 : vector<8x512xf32>
    %377 = vector.extract_strided_slice %376 {offsets = [0, 0], sizes = [8, 128], strides = [1, 1]} : vector<8x512xf32> to vector<8x128xf32>
    %378 = arith.negf %377 : vector<8x128xf32>
    %379 = math.exp %378 : vector<8x128xf32>
    %cst_98 = arith.constant 1.000000e+00 : f32
    %380 = vector.broadcast %cst_98 : f32 to vector<8x128xf32>
    %381 = arith.addf %380, %379 : vector<8x128xf32>
    %382 = arith.divf %380, %381 : vector<8x128xf32>
    %383 = vector.extract_strided_slice %376 {offsets = [0, 128], sizes = [8, 128], strides = [1, 1]} : vector<8x512xf32> to vector<8x128xf32>
    %384 = arith.negf %383 : vector<8x128xf32>
    %385 = math.exp %384 : vector<8x128xf32>
    %cst_99 = arith.constant 1.000000e+00 : f32
    %386 = vector.broadcast %cst_99 : f32 to vector<8x128xf32>
    %387 = arith.addf %386, %385 : vector<8x128xf32>
    %388 = arith.divf %386, %387 : vector<8x128xf32>
    %389 = vector.extract_strided_slice %376 {offsets = [0, 256], sizes = [8, 128], strides = [1, 1]} : vector<8x512xf32> to vector<8x128xf32>
    %390 = math.tanh %389 : vector<8x128xf32>
    %391 = vector.extract_strided_slice %376 {offsets = [0, 384], sizes = [8, 128], strides = [1, 1]} : vector<8x512xf32> to vector<8x128xf32>
    %392 = arith.negf %391 : vector<8x128xf32>
    %393 = math.exp %392 : vector<8x128xf32>
    %cst_100 = arith.constant 1.000000e+00 : f32
    %394 = vector.broadcast %cst_100 : f32 to vector<8x128xf32>
    %395 = arith.addf %394, %393 : vector<8x128xf32>
    %396 = arith.divf %394, %395 : vector<8x128xf32>
    %397 = arith.mulf %388, %311 : vector<8x128xf32>
    %398 = arith.mulf %382, %390 : vector<8x128xf32>
    %399 = arith.addf %397, %398 : vector<8x128xf32>
    %400 = math.tanh %399 : vector<8x128xf32>
    %401 = arith.mulf %396, %400 : vector<8x128xf32>
    %402 = vector.broadcast %369 : i32 to vector<8x1xi32>
    %403 = arith.cmpi slt, %402, %1 : vector<8x1xi32>
    %404 = vector.shape_cast %403 : vector<8x1xi1> to vector<8x1xi1>
    %405 = vector.broadcast %404 : vector<8x1xi1> to vector<8x128xi1>
    %406 = arith.select %405, %401, %308 : vector<8x128xi1>, vector<8x128xf32>
    %407 = vector.shape_cast %403 : vector<8x1xi1> to vector<8x1xi1>
    %408 = vector.broadcast %407 : vector<8x1xi1> to vector<8x128xi1>
    %409 = arith.select %408, %399, %311 : vector<8x128xi1>, vector<8x128xf32>
    %cst_101 = arith.constant 0.000000e+00 : f32
    %410 = vector.shape_cast %403 : vector<8x1xi1> to vector<8x1xi1>
    %411 = vector.broadcast %410 : vector<8x1xi1> to vector<8x128xi1>
    %412 = vector.broadcast %cst_101 : f32 to vector<8x128xf32>
    %413 = arith.select %411, %401, %412 : vector<8x128xi1>, vector<8x128xf32>
    %414 = arith.truncf %413 : vector<8x128xf32> to vector<8x128xbf16>
    %415 = arith.index_cast %371 : i32 to index
    %c0_102 = arith.constant 0 : index
    %416 = vector.load %arg11[%415, %c0_102] : memref<64x128xbf16, #tpu.memory_space<vmem>>, vector<8x128xbf16>
    tpu.vector_store %arg11[%415, %c0_102], %414 {strides = array<i32>} : memref<64x128xbf16, #tpu.memory_space<vmem>>, vector<8x128xbf16>,
    %c4_i32 = arith.constant 4 : i32
    %417 = arith.addi %0, %c4_i32 : i32
    %c8_i32_103 = arith.constant 8 : i32
    %418 = arith.muli %c4_i32, %c8_i32_103 : i32
    %419 = tpu.assume_multiple %418, 8 : i32
    %420 = arith.index_cast %419 : i32 to index
    %c0_104 = arith.constant 0 : index
    %421 = vector.load %arg16[%420, %c0_104] : memref<64x512xf32, #tpu.memory_space<vmem>>, vector<8x512xf32>
    %422 = arith.truncf %356 : vector<8x128xf32> to vector<8x128xbf16>
    %cst_105 = arith.constant dense<0.000000e+00> : vector<8x512xf32>
    %423 = tpu.matmul %422, %19, %cst_105 {dimension_numbers = #tpu.dot_dimension_numbers<[1], [0], [0], [1], [0, 0, 1, 1], [], []>} : vector<8x128xbf16>, vector<128x512xbf16>, vector<8x512xf32> -> vector<8x512xf32>
    %424 = arith.addf %421, %423 : vector<8x512xf32>
    %425 = vector.extract_strided_slice %424 {offsets = [0, 0], sizes = [8, 128], strides = [1, 1]} : vector<8x512xf32> to vector<8x128xf32>
    %426 = arith.negf %425 : vector<8x128xf32>
    %427 = math.exp %426 : vector<8x128xf32>
    %cst_106 = arith.constant 1.000000e+00 : f32
    %428 = vector.broadcast %cst_106 : f32 to vector<8x128xf32>
    %429 = arith.addf %428, %427 : vector<8x128xf32>
    %430 = arith.divf %428, %429 : vector<8x128xf32>
    %431 = vector.extract_strided_slice %424 {offsets = [0, 128], sizes = [8, 128], strides = [1, 1]} : vector<8x512xf32> to vector<8x128xf32>
    %432 = arith.negf %431 : vector<8x128xf32>
    %433 = math.exp %432 : vector<8x128xf32>
    %cst_107 = arith.constant 1.000000e+00 : f32
    %434 = vector.broadcast %cst_107 : f32 to vector<8x128xf32>
    %435 = arith.addf %434, %433 : vector<8x128xf32>
    %436 = arith.divf %434, %435 : vector<8x128xf32>
    %437 = vector.extract_strided_slice %424 {offsets = [0, 256], sizes = [8, 128], strides = [1, 1]} : vector<8x512xf32> to vector<8x128xf32>
    %438 = math.tanh %437 : vector<8x128xf32>
    %439 = vector.extract_strided_slice %424 {offsets = [0, 384], sizes = [8, 128], strides = [1, 1]} : vector<8x512xf32> to vector<8x128xf32>
    %440 = arith.negf %439 : vector<8x128xf32>
    %441 = math.exp %440 : vector<8x128xf32>
    %cst_108 = arith.constant 1.000000e+00 : f32
    %442 = vector.broadcast %cst_108 : f32 to vector<8x128xf32>
    %443 = arith.addf %442, %441 : vector<8x128xf32>
    %444 = arith.divf %442, %443 : vector<8x128xf32>
    %445 = arith.mulf %436, %359 : vector<8x128xf32>
    %446 = arith.mulf %430, %438 : vector<8x128xf32>
    %447 = arith.addf %445, %446 : vector<8x128xf32>
    %448 = math.tanh %447 : vector<8x128xf32>
    %449 = arith.mulf %444, %448 : vector<8x128xf32>
    %450 = vector.broadcast %417 : i32 to vector<8x1xi32>
    %451 = arith.cmpi slt, %450, %1 : vector<8x1xi32>
    %452 = vector.shape_cast %451 : vector<8x1xi1> to vector<8x1xi1>
    %453 = vector.broadcast %452 : vector<8x1xi1> to vector<8x128xi1>
    %454 = arith.select %453, %449, %356 : vector<8x128xi1>, vector<8x128xf32>
    %455 = vector.shape_cast %451 : vector<8x1xi1> to vector<8x1xi1>
    %456 = vector.broadcast %455 : vector<8x1xi1> to vector<8x128xi1>
    %457 = arith.select %456, %447, %359 : vector<8x128xi1>, vector<8x128xf32>
    %cst_109 = arith.constant 0.000000e+00 : f32
    %458 = vector.shape_cast %451 : vector<8x1xi1> to vector<8x1xi1>
    %459 = vector.broadcast %458 : vector<8x1xi1> to vector<8x128xi1>
    %460 = vector.broadcast %cst_109 : f32 to vector<8x128xf32>
    %461 = arith.select %459, %449, %460 : vector<8x128xi1>, vector<8x128xf32>
    %462 = arith.truncf %461 : vector<8x128xf32> to vector<8x128xbf16>
    %463 = arith.index_cast %419 : i32 to index
    %c0_110 = arith.constant 0 : index
    %464 = vector.load %arg10[%463, %c0_110] : memref<64x128xbf16, #tpu.memory_space<vmem>>, vector<8x128xbf16>
    tpu.vector_store %arg10[%463, %c0_110], %462 {strides = array<i32>} : memref<64x128xbf16, #tpu.memory_space<vmem>>, vector<8x128xbf16>,
    %c7_i32_111 = arith.constant 7 : i32
    %465 = arith.subi %c7_i32_111, %c4_i32 : i32
    %466 = arith.addi %0, %c4_i32 : i32
    %c7_i32_112 = arith.constant 7 : i32
    %467 = arith.subi %c7_i32_112, %466 : i32
    %c8_i32_113 = arith.constant 8 : i32
    %468 = arith.muli %465, %c8_i32_113 : i32
    %469 = tpu.assume_multiple %468, 8 : i32
    %470 = arith.index_cast %469 : i32 to index
    %c0_114 = arith.constant 0 : index
    %471 = vector.load %arg17[%470, %c0_114] : memref<64x512xf32, #tpu.memory_space<vmem>>, vector<8x512xf32>
    %472 = arith.truncf %406 : vector<8x128xf32> to vector<8x128xbf16>
    %cst_115 = arith.constant dense<0.000000e+00> : vector<8x512xf32>
    %473 = tpu.matmul %472, %20, %cst_115 {dimension_numbers = #tpu.dot_dimension_numbers<[1], [0], [0], [1], [0, 0, 1, 1], [], []>} : vector<8x128xbf16>, vector<128x512xbf16>, vector<8x512xf32> -> vector<8x512xf32>
    %474 = arith.addf %471, %473 : vector<8x512xf32>
    %475 = vector.extract_strided_slice %474 {offsets = [0, 0], sizes = [8, 128], strides = [1, 1]} : vector<8x512xf32> to vector<8x128xf32>
    %476 = arith.negf %475 : vector<8x128xf32>
    %477 = math.exp %476 : vector<8x128xf32>
    %cst_116 = arith.constant 1.000000e+00 : f32
    %478 = vector.broadcast %cst_116 : f32 to vector<8x128xf32>
    %479 = arith.addf %478, %477 : vector<8x128xf32>
    %480 = arith.divf %478, %479 : vector<8x128xf32>
    %481 = vector.extract_strided_slice %474 {offsets = [0, 128], sizes = [8, 128], strides = [1, 1]} : vector<8x512xf32> to vector<8x128xf32>
    %482 = arith.negf %481 : vector<8x128xf32>
    %483 = math.exp %482 : vector<8x128xf32>
    %cst_117 = arith.constant 1.000000e+00 : f32
    %484 = vector.broadcast %cst_117 : f32 to vector<8x128xf32>
    %485 = arith.addf %484, %483 : vector<8x128xf32>
    %486 = arith.divf %484, %485 : vector<8x128xf32>
    %487 = vector.extract_strided_slice %474 {offsets = [0, 256], sizes = [8, 128], strides = [1, 1]} : vector<8x512xf32> to vector<8x128xf32>
    %488 = math.tanh %487 : vector<8x128xf32>
    %489 = vector.extract_strided_slice %474 {offsets = [0, 384], sizes = [8, 128], strides = [1, 1]} : vector<8x512xf32> to vector<8x128xf32>
    %490 = arith.negf %489 : vector<8x128xf32>
    %491 = math.exp %490 : vector<8x128xf32>
    %cst_118 = arith.constant 1.000000e+00 : f32
    %492 = vector.broadcast %cst_118 : f32 to vector<8x128xf32>
    %493 = arith.addf %492, %491 : vector<8x128xf32>
    %494 = arith.divf %492, %493 : vector<8x128xf32>
    %495 = arith.mulf %486, %409 : vector<8x128xf32>
    %496 = arith.mulf %480, %488 : vector<8x128xf32>
    %497 = arith.addf %495, %496 : vector<8x128xf32>
    %498 = math.tanh %497 : vector<8x128xf32>
    %499 = arith.mulf %494, %498 : vector<8x128xf32>
    %500 = vector.broadcast %467 : i32 to vector<8x1xi32>
    %501 = arith.cmpi slt, %500, %1 : vector<8x1xi32>
    %502 = vector.shape_cast %501 : vector<8x1xi1> to vector<8x1xi1>
    %503 = vector.broadcast %502 : vector<8x1xi1> to vector<8x128xi1>
    %504 = arith.select %503, %499, %406 : vector<8x128xi1>, vector<8x128xf32>
    %505 = vector.shape_cast %501 : vector<8x1xi1> to vector<8x1xi1>
    %506 = vector.broadcast %505 : vector<8x1xi1> to vector<8x128xi1>
    %507 = arith.select %506, %497, %409 : vector<8x128xi1>, vector<8x128xf32>
    %cst_119 = arith.constant 0.000000e+00 : f32
    %508 = vector.shape_cast %501 : vector<8x1xi1> to vector<8x1xi1>
    %509 = vector.broadcast %508 : vector<8x1xi1> to vector<8x128xi1>
    %510 = vector.broadcast %cst_119 : f32 to vector<8x128xf32>
    %511 = arith.select %509, %499, %510 : vector<8x128xi1>, vector<8x128xf32>
    %512 = arith.truncf %511 : vector<8x128xf32> to vector<8x128xbf16>
    %513 = arith.index_cast %469 : i32 to index
    %c0_120 = arith.constant 0 : index
    %514 = vector.load %arg11[%513, %c0_120] : memref<64x128xbf16, #tpu.memory_space<vmem>>, vector<8x128xbf16>
    tpu.vector_store %arg11[%513, %c0_120], %512 {strides = array<i32>} : memref<64x128xbf16, #tpu.memory_space<vmem>>, vector<8x128xbf16>,
    %c5_i32 = arith.constant 5 : i32
    %515 = arith.addi %0, %c5_i32 : i32
    %c8_i32_121 = arith.constant 8 : i32
    %516 = arith.muli %c5_i32, %c8_i32_121 : i32
    %517 = tpu.assume_multiple %516, 8 : i32
    %518 = arith.index_cast %517 : i32 to index
    %c0_122 = arith.constant 0 : index
    %519 = vector.load %arg16[%518, %c0_122] : memref<64x512xf32, #tpu.memory_space<vmem>>, vector<8x512xf32>
    %520 = arith.truncf %454 : vector<8x128xf32> to vector<8x128xbf16>
    %cst_123 = arith.constant dense<0.000000e+00> : vector<8x512xf32>
    %521 = tpu.matmul %520, %19, %cst_123 {dimension_numbers = #tpu.dot_dimension_numbers<[1], [0], [0], [1], [0, 0, 1, 1], [], []>} : vector<8x128xbf16>, vector<128x512xbf16>, vector<8x512xf32> -> vector<8x512xf32>
    %522 = arith.addf %519, %521 : vector<8x512xf32>
    %523 = vector.extract_strided_slice %522 {offsets = [0, 0], sizes = [8, 128], strides = [1, 1]} : vector<8x512xf32> to vector<8x128xf32>
    %524 = arith.negf %523 : vector<8x128xf32>
    %525 = math.exp %524 : vector<8x128xf32>
    %cst_124 = arith.constant 1.000000e+00 : f32
    %526 = vector.broadcast %cst_124 : f32 to vector<8x128xf32>
    %527 = arith.addf %526, %525 : vector<8x128xf32>
    %528 = arith.divf %526, %527 : vector<8x128xf32>
    %529 = vector.extract_strided_slice %522 {offsets = [0, 128], sizes = [8, 128], strides = [1, 1]} : vector<8x512xf32> to vector<8x128xf32>
    %530 = arith.negf %529 : vector<8x128xf32>
    %531 = math.exp %530 : vector<8x128xf32>
    %cst_125 = arith.constant 1.000000e+00 : f32
    %532 = vector.broadcast %cst_125 : f32 to vector<8x128xf32>
    %533 = arith.addf %532, %531 : vector<8x128xf32>
    %534 = arith.divf %532, %533 : vector<8x128xf32>
    %535 = vector.extract_strided_slice %522 {offsets = [0, 256], sizes = [8, 128], strides = [1, 1]} : vector<8x512xf32> to vector<8x128xf32>
    %536 = math.tanh %535 : vector<8x128xf32>
    %537 = vector.extract_strided_slice %522 {offsets = [0, 384], sizes = [8, 128], strides = [1, 1]} : vector<8x512xf32> to vector<8x128xf32>
    %538 = arith.negf %537 : vector<8x128xf32>
    %539 = math.exp %538 : vector<8x128xf32>
    %cst_126 = arith.constant 1.000000e+00 : f32
    %540 = vector.broadcast %cst_126 : f32 to vector<8x128xf32>
    %541 = arith.addf %540, %539 : vector<8x128xf32>
    %542 = arith.divf %540, %541 : vector<8x128xf32>
    %543 = arith.mulf %534, %457 : vector<8x128xf32>
    %544 = arith.mulf %528, %536 : vector<8x128xf32>
    %545 = arith.addf %543, %544 : vector<8x128xf32>
    %546 = math.tanh %545 : vector<8x128xf32>
    %547 = arith.mulf %542, %546 : vector<8x128xf32>
    %548 = vector.broadcast %515 : i32 to vector<8x1xi32>
    %549 = arith.cmpi slt, %548, %1 : vector<8x1xi32>
    %550 = vector.shape_cast %549 : vector<8x1xi1> to vector<8x1xi1>
    %551 = vector.broadcast %550 : vector<8x1xi1> to vector<8x128xi1>
    %552 = arith.select %551, %547, %454 : vector<8x128xi1>, vector<8x128xf32>
    %553 = vector.shape_cast %549 : vector<8x1xi1> to vector<8x1xi1>
    %554 = vector.broadcast %553 : vector<8x1xi1> to vector<8x128xi1>
    %555 = arith.select %554, %545, %457 : vector<8x128xi1>, vector<8x128xf32>
    %cst_127 = arith.constant 0.000000e+00 : f32
    %556 = vector.shape_cast %549 : vector<8x1xi1> to vector<8x1xi1>
    %557 = vector.broadcast %556 : vector<8x1xi1> to vector<8x128xi1>
    %558 = vector.broadcast %cst_127 : f32 to vector<8x128xf32>
    %559 = arith.select %557, %547, %558 : vector<8x128xi1>, vector<8x128xf32>
    %560 = arith.truncf %559 : vector<8x128xf32> to vector<8x128xbf16>
    %561 = arith.index_cast %517 : i32 to index
    %c0_128 = arith.constant 0 : index
    %562 = vector.load %arg10[%561, %c0_128] : memref<64x128xbf16, #tpu.memory_space<vmem>>, vector<8x128xbf16>
    tpu.vector_store %arg10[%561, %c0_128], %560 {strides = array<i32>} : memref<64x128xbf16, #tpu.memory_space<vmem>>, vector<8x128xbf16>,
    %c7_i32_129 = arith.constant 7 : i32
    %563 = arith.subi %c7_i32_129, %c5_i32 : i32
    %564 = arith.addi %0, %c5_i32 : i32
    %c7_i32_130 = arith.constant 7 : i32
    %565 = arith.subi %c7_i32_130, %564 : i32
    %c8_i32_131 = arith.constant 8 : i32
    %566 = arith.muli %563, %c8_i32_131 : i32
    %567 = tpu.assume_multiple %566, 8 : i32
    %568 = arith.index_cast %567 : i32 to index
    %c0_132 = arith.constant 0 : index
    %569 = vector.load %arg17[%568, %c0_132] : memref<64x512xf32, #tpu.memory_space<vmem>>, vector<8x512xf32>
    %570 = arith.truncf %504 : vector<8x128xf32> to vector<8x128xbf16>
    %cst_133 = arith.constant dense<0.000000e+00> : vector<8x512xf32>
    %571 = tpu.matmul %570, %20, %cst_133 {dimension_numbers = #tpu.dot_dimension_numbers<[1], [0], [0], [1], [0, 0, 1, 1], [], []>} : vector<8x128xbf16>, vector<128x512xbf16>, vector<8x512xf32> -> vector<8x512xf32>
    %572 = arith.addf %569, %571 : vector<8x512xf32>
    %573 = vector.extract_strided_slice %572 {offsets = [0, 0], sizes = [8, 128], strides = [1, 1]} : vector<8x512xf32> to vector<8x128xf32>
    %574 = arith.negf %573 : vector<8x128xf32>
    %575 = math.exp %574 : vector<8x128xf32>
    %cst_134 = arith.constant 1.000000e+00 : f32
    %576 = vector.broadcast %cst_134 : f32 to vector<8x128xf32>
    %577 = arith.addf %576, %575 : vector<8x128xf32>
    %578 = arith.divf %576, %577 : vector<8x128xf32>
    %579 = vector.extract_strided_slice %572 {offsets = [0, 128], sizes = [8, 128], strides = [1, 1]} : vector<8x512xf32> to vector<8x128xf32>
    %580 = arith.negf %579 : vector<8x128xf32>
    %581 = math.exp %580 : vector<8x128xf32>
    %cst_135 = arith.constant 1.000000e+00 : f32
    %582 = vector.broadcast %cst_135 : f32 to vector<8x128xf32>
    %583 = arith.addf %582, %581 : vector<8x128xf32>
    %584 = arith.divf %582, %583 : vector<8x128xf32>
    %585 = vector.extract_strided_slice %572 {offsets = [0, 256], sizes = [8, 128], strides = [1, 1]} : vector<8x512xf32> to vector<8x128xf32>
    %586 = math.tanh %585 : vector<8x128xf32>
    %587 = vector.extract_strided_slice %572 {offsets = [0, 384], sizes = [8, 128], strides = [1, 1]} : vector<8x512xf32> to vector<8x128xf32>
    %588 = arith.negf %587 : vector<8x128xf32>
    %589 = math.exp %588 : vector<8x128xf32>
    %cst_136 = arith.constant 1.000000e+00 : f32
    %590 = vector.broadcast %cst_136 : f32 to vector<8x128xf32>
    %591 = arith.addf %590, %589 : vector<8x128xf32>
    %592 = arith.divf %590, %591 : vector<8x128xf32>
    %593 = arith.mulf %584, %507 : vector<8x128xf32>
    %594 = arith.mulf %578, %586 : vector<8x128xf32>
    %595 = arith.addf %593, %594 : vector<8x128xf32>
    %596 = math.tanh %595 : vector<8x128xf32>
    %597 = arith.mulf %592, %596 : vector<8x128xf32>
    %598 = vector.broadcast %565 : i32 to vector<8x1xi32>
    %599 = arith.cmpi slt, %598, %1 : vector<8x1xi32>
    %600 = vector.shape_cast %599 : vector<8x1xi1> to vector<8x1xi1>
    %601 = vector.broadcast %600 : vector<8x1xi1> to vector<8x128xi1>
    %602 = arith.select %601, %597, %504 : vector<8x128xi1>, vector<8x128xf32>
    %603 = vector.shape_cast %599 : vector<8x1xi1> to vector<8x1xi1>
    %604 = vector.broadcast %603 : vector<8x1xi1> to vector<8x128xi1>
    %605 = arith.select %604, %595, %507 : vector<8x128xi1>, vector<8x128xf32>
    %cst_137 = arith.constant 0.000000e+00 : f32
    %606 = vector.shape_cast %599 : vector<8x1xi1> to vector<8x1xi1>
    %607 = vector.broadcast %606 : vector<8x1xi1> to vector<8x128xi1>
    %608 = vector.broadcast %cst_137 : f32 to vector<8x128xf32>
    %609 = arith.select %607, %597, %608 : vector<8x128xi1>, vector<8x128xf32>
    %610 = arith.truncf %609 : vector<8x128xf32> to vector<8x128xbf16>
    %611 = arith.index_cast %567 : i32 to index
    %c0_138 = arith.constant 0 : index
    %612 = vector.load %arg11[%611, %c0_138] : memref<64x128xbf16, #tpu.memory_space<vmem>>, vector<8x128xbf16>
    tpu.vector_store %arg11[%611, %c0_138], %610 {strides = array<i32>} : memref<64x128xbf16, #tpu.memory_space<vmem>>, vector<8x128xbf16>,
    %c6_i32 = arith.constant 6 : i32
    %613 = arith.addi %0, %c6_i32 : i32
    %c8_i32_139 = arith.constant 8 : i32
    %614 = arith.muli %c6_i32, %c8_i32_139 : i32
    %615 = tpu.assume_multiple %614, 8 : i32
    %616 = arith.index_cast %615 : i32 to index
    %c0_140 = arith.constant 0 : index
    %617 = vector.load %arg16[%616, %c0_140] : memref<64x512xf32, #tpu.memory_space<vmem>>, vector<8x512xf32>
    %618 = arith.truncf %552 : vector<8x128xf32> to vector<8x128xbf16>
    %cst_141 = arith.constant dense<0.000000e+00> : vector<8x512xf32>
    %619 = tpu.matmul %618, %19, %cst_141 {dimension_numbers = #tpu.dot_dimension_numbers<[1], [0], [0], [1], [0, 0, 1, 1], [], []>} : vector<8x128xbf16>, vector<128x512xbf16>, vector<8x512xf32> -> vector<8x512xf32>
    %620 = arith.addf %617, %619 : vector<8x512xf32>
    %621 = vector.extract_strided_slice %620 {offsets = [0, 0], sizes = [8, 128], strides = [1, 1]} : vector<8x512xf32> to vector<8x128xf32>
    %622 = arith.negf %621 : vector<8x128xf32>
    %623 = math.exp %622 : vector<8x128xf32>
    %cst_142 = arith.constant 1.000000e+00 : f32
    %624 = vector.broadcast %cst_142 : f32 to vector<8x128xf32>
    %625 = arith.addf %624, %623 : vector<8x128xf32>
    %626 = arith.divf %624, %625 : vector<8x128xf32>
    %627 = vector.extract_strided_slice %620 {offsets = [0, 128], sizes = [8, 128], strides = [1, 1]} : vector<8x512xf32> to vector<8x128xf32>
    %628 = arith.negf %627 : vector<8x128xf32>
    %629 = math.exp %628 : vector<8x128xf32>
    %cst_143 = arith.constant 1.000000e+00 : f32
    %630 = vector.broadcast %cst_143 : f32 to vector<8x128xf32>
    %631 = arith.addf %630, %629 : vector<8x128xf32>
    %632 = arith.divf %630, %631 : vector<8x128xf32>
    %633 = vector.extract_strided_slice %620 {offsets = [0, 256], sizes = [8, 128], strides = [1, 1]} : vector<8x512xf32> to vector<8x128xf32>
    %634 = math.tanh %633 : vector<8x128xf32>
    %635 = vector.extract_strided_slice %620 {offsets = [0, 384], sizes = [8, 128], strides = [1, 1]} : vector<8x512xf32> to vector<8x128xf32>
    %636 = arith.negf %635 : vector<8x128xf32>
    %637 = math.exp %636 : vector<8x128xf32>
    %cst_144 = arith.constant 1.000000e+00 : f32
    %638 = vector.broadcast %cst_144 : f32 to vector<8x128xf32>
    %639 = arith.addf %638, %637 : vector<8x128xf32>
    %640 = arith.divf %638, %639 : vector<8x128xf32>
    %641 = arith.mulf %632, %555 : vector<8x128xf32>
    %642 = arith.mulf %626, %634 : vector<8x128xf32>
    %643 = arith.addf %641, %642 : vector<8x128xf32>
    %644 = math.tanh %643 : vector<8x128xf32>
    %645 = arith.mulf %640, %644 : vector<8x128xf32>
    %646 = vector.broadcast %613 : i32 to vector<8x1xi32>
    %647 = arith.cmpi slt, %646, %1 : vector<8x1xi32>
    %648 = vector.shape_cast %647 : vector<8x1xi1> to vector<8x1xi1>
    %649 = vector.broadcast %648 : vector<8x1xi1> to vector<8x128xi1>
    %650 = arith.select %649, %645, %552 : vector<8x128xi1>, vector<8x128xf32>
    %651 = vector.shape_cast %647 : vector<8x1xi1> to vector<8x1xi1>
    %652 = vector.broadcast %651 : vector<8x1xi1> to vector<8x128xi1>
    %653 = arith.select %652, %643, %555 : vector<8x128xi1>, vector<8x128xf32>
    %cst_145 = arith.constant 0.000000e+00 : f32
    %654 = vector.shape_cast %647 : vector<8x1xi1> to vector<8x1xi1>
    %655 = vector.broadcast %654 : vector<8x1xi1> to vector<8x128xi1>
    %656 = vector.broadcast %cst_145 : f32 to vector<8x128xf32>
    %657 = arith.select %655, %645, %656 : vector<8x128xi1>, vector<8x128xf32>
    %658 = arith.truncf %657 : vector<8x128xf32> to vector<8x128xbf16>
    %659 = arith.index_cast %615 : i32 to index
    %c0_146 = arith.constant 0 : index
    %660 = vector.load %arg10[%659, %c0_146] : memref<64x128xbf16, #tpu.memory_space<vmem>>, vector<8x128xbf16>
    tpu.vector_store %arg10[%659, %c0_146], %658 {strides = array<i32>} : memref<64x128xbf16, #tpu.memory_space<vmem>>, vector<8x128xbf16>,
    %c7_i32_147 = arith.constant 7 : i32
    %661 = arith.subi %c7_i32_147, %c6_i32 : i32
    %662 = arith.addi %0, %c6_i32 : i32
    %c7_i32_148 = arith.constant 7 : i32
    %663 = arith.subi %c7_i32_148, %662 : i32
    %c8_i32_149 = arith.constant 8 : i32
    %664 = arith.muli %661, %c8_i32_149 : i32
    %665 = tpu.assume_multiple %664, 8 : i32
    %666 = arith.index_cast %665 : i32 to index
    %c0_150 = arith.constant 0 : index
    %667 = vector.load %arg17[%666, %c0_150] : memref<64x512xf32, #tpu.memory_space<vmem>>, vector<8x512xf32>
    %668 = arith.truncf %602 : vector<8x128xf32> to vector<8x128xbf16>
    %cst_151 = arith.constant dense<0.000000e+00> : vector<8x512xf32>
    %669 = tpu.matmul %668, %20, %cst_151 {dimension_numbers = #tpu.dot_dimension_numbers<[1], [0], [0], [1], [0, 0, 1, 1], [], []>} : vector<8x128xbf16>, vector<128x512xbf16>, vector<8x512xf32> -> vector<8x512xf32>
    %670 = arith.addf %667, %669 : vector<8x512xf32>
    %671 = vector.extract_strided_slice %670 {offsets = [0, 0], sizes = [8, 128], strides = [1, 1]} : vector<8x512xf32> to vector<8x128xf32>
    %672 = arith.negf %671 : vector<8x128xf32>
    %673 = math.exp %672 : vector<8x128xf32>
    %cst_152 = arith.constant 1.000000e+00 : f32
    %674 = vector.broadcast %cst_152 : f32 to vector<8x128xf32>
    %675 = arith.addf %674, %673 : vector<8x128xf32>
    %676 = arith.divf %674, %675 : vector<8x128xf32>
    %677 = vector.extract_strided_slice %670 {offsets = [0, 128], sizes = [8, 128], strides = [1, 1]} : vector<8x512xf32> to vector<8x128xf32>
    %678 = arith.negf %677 : vector<8x128xf32>
    %679 = math.exp %678 : vector<8x128xf32>
    %cst_153 = arith.constant 1.000000e+00 : f32
    %680 = vector.broadcast %cst_153 : f32 to vector<8x128xf32>
    %681 = arith.addf %680, %679 : vector<8x128xf32>
    %682 = arith.divf %680, %681 : vector<8x128xf32>
    %683 = vector.extract_strided_slice %670 {offsets = [0, 256], sizes = [8, 128], strides = [1, 1]} : vector<8x512xf32> to vector<8x128xf32>
    %684 = math.tanh %683 : vector<8x128xf32>
    %685 = vector.extract_strided_slice %670 {offsets = [0, 384], sizes = [8, 128], strides = [1, 1]} : vector<8x512xf32> to vector<8x128xf32>
    %686 = arith.negf %685 : vector<8x128xf32>
    %687 = math.exp %686 : vector<8x128xf32>
    %cst_154 = arith.constant 1.000000e+00 : f32
    %688 = vector.broadcast %cst_154 : f32 to vector<8x128xf32>
    %689 = arith.addf %688, %687 : vector<8x128xf32>
    %690 = arith.divf %688, %689 : vector<8x128xf32>
    %691 = arith.mulf %682, %605 : vector<8x128xf32>
    %692 = arith.mulf %676, %684 : vector<8x128xf32>
    %693 = arith.addf %691, %692 : vector<8x128xf32>
    %694 = math.tanh %693 : vector<8x128xf32>
    %695 = arith.mulf %690, %694 : vector<8x128xf32>
    %696 = vector.broadcast %663 : i32 to vector<8x1xi32>
    %697 = arith.cmpi slt, %696, %1 : vector<8x1xi32>
    %698 = vector.shape_cast %697 : vector<8x1xi1> to vector<8x1xi1>
    %699 = vector.broadcast %698 : vector<8x1xi1> to vector<8x128xi1>
    %700 = arith.select %699, %695, %602 : vector<8x128xi1>, vector<8x128xf32>
    %701 = vector.shape_cast %697 : vector<8x1xi1> to vector<8x1xi1>
    %702 = vector.broadcast %701 : vector<8x1xi1> to vector<8x128xi1>
    %703 = arith.select %702, %693, %605 : vector<8x128xi1>, vector<8x128xf32>
    %cst_155 = arith.constant 0.000000e+00 : f32
    %704 = vector.shape_cast %697 : vector<8x1xi1> to vector<8x1xi1>
    %705 = vector.broadcast %704 : vector<8x1xi1> to vector<8x128xi1>
    %706 = vector.broadcast %cst_155 : f32 to vector<8x128xf32>
    %707 = arith.select %705, %695, %706 : vector<8x128xi1>, vector<8x128xf32>
    %708 = arith.truncf %707 : vector<8x128xf32> to vector<8x128xbf16>
    %709 = arith.index_cast %665 : i32 to index
    %c0_156 = arith.constant 0 : index
    %710 = vector.load %arg11[%709, %c0_156] : memref<64x128xbf16, #tpu.memory_space<vmem>>, vector<8x128xbf16>
    tpu.vector_store %arg11[%709, %c0_156], %708 {strides = array<i32>} : memref<64x128xbf16, #tpu.memory_space<vmem>>, vector<8x128xbf16>,
    %c7_i32_157 = arith.constant 7 : i32
    %711 = arith.addi %0, %c7_i32_157 : i32
    %c8_i32_158 = arith.constant 8 : i32
    %712 = arith.muli %c7_i32_157, %c8_i32_158 : i32
    %713 = tpu.assume_multiple %712, 8 : i32
    %714 = arith.index_cast %713 : i32 to index
    %c0_159 = arith.constant 0 : index
    %715 = vector.load %arg16[%714, %c0_159] : memref<64x512xf32, #tpu.memory_space<vmem>>, vector<8x512xf32>
    %716 = arith.truncf %650 : vector<8x128xf32> to vector<8x128xbf16>
    %cst_160 = arith.constant dense<0.000000e+00> : vector<8x512xf32>
    %717 = tpu.matmul %716, %19, %cst_160 {dimension_numbers = #tpu.dot_dimension_numbers<[1], [0], [0], [1], [0, 0, 1, 1], [], []>} : vector<8x128xbf16>, vector<128x512xbf16>, vector<8x512xf32> -> vector<8x512xf32>
    %718 = arith.addf %715, %717 : vector<8x512xf32>
    %719 = vector.extract_strided_slice %718 {offsets = [0, 0], sizes = [8, 128], strides = [1, 1]} : vector<8x512xf32> to vector<8x128xf32>
    %720 = arith.negf %719 : vector<8x128xf32>
    %721 = math.exp %720 : vector<8x128xf32>
    %cst_161 = arith.constant 1.000000e+00 : f32
    %722 = vector.broadcast %cst_161 : f32 to vector<8x128xf32>
    %723 = arith.addf %722, %721 : vector<8x128xf32>
    %724 = arith.divf %722, %723 : vector<8x128xf32>
    %725 = vector.extract_strided_slice %718 {offsets = [0, 128], sizes = [8, 128], strides = [1, 1]} : vector<8x512xf32> to vector<8x128xf32>
    %726 = arith.negf %725 : vector<8x128xf32>
    %727 = math.exp %726 : vector<8x128xf32>
    %cst_162 = arith.constant 1.000000e+00 : f32
    %728 = vector.broadcast %cst_162 : f32 to vector<8x128xf32>
    %729 = arith.addf %728, %727 : vector<8x128xf32>
    %730 = arith.divf %728, %729 : vector<8x128xf32>
    %731 = vector.extract_strided_slice %718 {offsets = [0, 256], sizes = [8, 128], strides = [1, 1]} : vector<8x512xf32> to vector<8x128xf32>
    %732 = math.tanh %731 : vector<8x128xf32>
    %733 = vector.extract_strided_slice %718 {offsets = [0, 384], sizes = [8, 128], strides = [1, 1]} : vector<8x512xf32> to vector<8x128xf32>
    %734 = arith.negf %733 : vector<8x128xf32>
    %735 = math.exp %734 : vector<8x128xf32>
    %cst_163 = arith.constant 1.000000e+00 : f32
    %736 = vector.broadcast %cst_163 : f32 to vector<8x128xf32>
    %737 = arith.addf %736, %735 : vector<8x128xf32>
    %738 = arith.divf %736, %737 : vector<8x128xf32>
    %739 = arith.mulf %730, %653 : vector<8x128xf32>
    %740 = arith.mulf %724, %732 : vector<8x128xf32>
    %741 = arith.addf %739, %740 : vector<8x128xf32>
    %742 = math.tanh %741 : vector<8x128xf32>
    %743 = arith.mulf %738, %742 : vector<8x128xf32>
    %744 = vector.broadcast %711 : i32 to vector<8x1xi32>
    %745 = arith.cmpi slt, %744, %1 : vector<8x1xi32>
    %746 = vector.shape_cast %745 : vector<8x1xi1> to vector<8x1xi1>
    %747 = vector.broadcast %746 : vector<8x1xi1> to vector<8x128xi1>
    %748 = arith.select %747, %743, %650 : vector<8x128xi1>, vector<8x128xf32>
    %749 = vector.shape_cast %745 : vector<8x1xi1> to vector<8x1xi1>
    %750 = vector.broadcast %749 : vector<8x1xi1> to vector<8x128xi1>
    %751 = arith.select %750, %741, %653 : vector<8x128xi1>, vector<8x128xf32>
    %cst_164 = arith.constant 0.000000e+00 : f32
    %752 = vector.shape_cast %745 : vector<8x1xi1> to vector<8x1xi1>
    %753 = vector.broadcast %752 : vector<8x1xi1> to vector<8x128xi1>
    %754 = vector.broadcast %cst_164 : f32 to vector<8x128xf32>
    %755 = arith.select %753, %743, %754 : vector<8x128xi1>, vector<8x128xf32>
    %756 = arith.truncf %755 : vector<8x128xf32> to vector<8x128xbf16>
    %757 = arith.index_cast %713 : i32 to index
    %c0_165 = arith.constant 0 : index
    %758 = vector.load %arg10[%757, %c0_165] : memref<64x128xbf16, #tpu.memory_space<vmem>>, vector<8x128xbf16>
    tpu.vector_store %arg10[%757, %c0_165], %756 {strides = array<i32>} : memref<64x128xbf16, #tpu.memory_space<vmem>>, vector<8x128xbf16>,
    %c7_i32_166 = arith.constant 7 : i32
    %759 = arith.subi %c7_i32_166, %c7_i32_157 : i32
    %760 = arith.addi %0, %c7_i32_157 : i32
    %c7_i32_167 = arith.constant 7 : i32
    %761 = arith.subi %c7_i32_167, %760 : i32
    %c8_i32_168 = arith.constant 8 : i32
    %762 = arith.muli %759, %c8_i32_168 : i32
    %763 = tpu.assume_multiple %762, 8 : i32
    %764 = arith.index_cast %763 : i32 to index
    %c0_169 = arith.constant 0 : index
    %765 = vector.load %arg17[%764, %c0_169] : memref<64x512xf32, #tpu.memory_space<vmem>>, vector<8x512xf32>
    %766 = arith.truncf %700 : vector<8x128xf32> to vector<8x128xbf16>
    %cst_170 = arith.constant dense<0.000000e+00> : vector<8x512xf32>
    %767 = tpu.matmul %766, %20, %cst_170 {dimension_numbers = #tpu.dot_dimension_numbers<[1], [0], [0], [1], [0, 0, 1, 1], [], []>} : vector<8x128xbf16>, vector<128x512xbf16>, vector<8x512xf32> -> vector<8x512xf32>
    %768 = arith.addf %765, %767 : vector<8x512xf32>
    %769 = vector.extract_strided_slice %768 {offsets = [0, 0], sizes = [8, 128], strides = [1, 1]} : vector<8x512xf32> to vector<8x128xf32>
    %770 = arith.negf %769 : vector<8x128xf32>
    %771 = math.exp %770 : vector<8x128xf32>
    %cst_171 = arith.constant 1.000000e+00 : f32
    %772 = vector.broadcast %cst_171 : f32 to vector<8x128xf32>
    %773 = arith.addf %772, %771 : vector<8x128xf32>
    %774 = arith.divf %772, %773 : vector<8x128xf32>
    %775 = vector.extract_strided_slice %768 {offsets = [0, 128], sizes = [8, 128], strides = [1, 1]} : vector<8x512xf32> to vector<8x128xf32>
    %776 = arith.negf %775 : vector<8x128xf32>
    %777 = math.exp %776 : vector<8x128xf32>
    %cst_172 = arith.constant 1.000000e+00 : f32
    %778 = vector.broadcast %cst_172 : f32 to vector<8x128xf32>
    %779 = arith.addf %778, %777 : vector<8x128xf32>
    %780 = arith.divf %778, %779 : vector<8x128xf32>
    %781 = vector.extract_strided_slice %768 {offsets = [0, 256], sizes = [8, 128], strides = [1, 1]} : vector<8x512xf32> to vector<8x128xf32>
    %782 = math.tanh %781 : vector<8x128xf32>
    %783 = vector.extract_strided_slice %768 {offsets = [0, 384], sizes = [8, 128], strides = [1, 1]} : vector<8x512xf32> to vector<8x128xf32>
    %784 = arith.negf %783 : vector<8x128xf32>
    %785 = math.exp %784 : vector<8x128xf32>
    %cst_173 = arith.constant 1.000000e+00 : f32
    %786 = vector.broadcast %cst_173 : f32 to vector<8x128xf32>
    %787 = arith.addf %786, %785 : vector<8x128xf32>
    %788 = arith.divf %786, %787 : vector<8x128xf32>
    %789 = arith.mulf %780, %703 : vector<8x128xf32>
    %790 = arith.mulf %774, %782 : vector<8x128xf32>
    %791 = arith.addf %789, %790 : vector<8x128xf32>
    %792 = math.tanh %791 : vector<8x128xf32>
    %793 = arith.mulf %788, %792 : vector<8x128xf32>
    %794 = vector.broadcast %761 : i32 to vector<8x1xi32>
    %795 = arith.cmpi slt, %794, %1 : vector<8x1xi32>
    %796 = vector.shape_cast %795 : vector<8x1xi1> to vector<8x1xi1>
    %797 = vector.broadcast %796 : vector<8x1xi1> to vector<8x128xi1>
    %798 = arith.select %797, %793, %700 : vector<8x128xi1>, vector<8x128xf32>
    %799 = vector.shape_cast %795 : vector<8x1xi1> to vector<8x1xi1>
    %800 = vector.broadcast %799 : vector<8x1xi1> to vector<8x128xi1>
    %801 = arith.select %800, %791, %703 : vector<8x128xi1>, vector<8x128xf32>
    %cst_174 = arith.constant 0.000000e+00 : f32
    %802 = vector.shape_cast %795 : vector<8x1xi1> to vector<8x1xi1>
    %803 = vector.broadcast %802 : vector<8x1xi1> to vector<8x128xi1>
    %804 = vector.broadcast %cst_174 : f32 to vector<8x128xf32>
    %805 = arith.select %803, %793, %804 : vector<8x128xi1>, vector<8x128xf32>
    %806 = arith.truncf %805 : vector<8x128xf32> to vector<8x128xbf16>
    %807 = arith.index_cast %763 : i32 to index
    %c0_175 = arith.constant 0 : index
    %808 = vector.load %arg11[%807, %c0_175] : memref<64x128xbf16, #tpu.memory_space<vmem>>, vector<8x128xbf16>
    tpu.vector_store %arg11[%807, %c0_175], %806 {strides = array<i32>} : memref<64x128xbf16, #tpu.memory_space<vmem>>, vector<8x128xbf16>,
    %c8_i32_176 = arith.constant 8 : i32
    %c0_177 = arith.constant 0 : index
    %c0_178 = arith.constant 0 : index
    %809 = vector.load %arg18[%c0_177, %c0_178] : memref<8x128xf32, #tpu.memory_space<vmem>>, vector<8x128xf32>
    tpu.vector_store %arg18[%c0_177, %c0_178], %748 {strides = array<i32>} : memref<8x128xf32, #tpu.memory_space<vmem>>, vector<8x128xf32>,
    %c0_179 = arith.constant 0 : index
    %c0_180 = arith.constant 0 : index
    %810 = vector.load %arg20[%c0_179, %c0_180] : memref<8x128xf32, #tpu.memory_space<vmem>>, vector<8x128xf32>
    tpu.vector_store %arg20[%c0_179, %c0_180], %751 {strides = array<i32>} : memref<8x128xf32, #tpu.memory_space<vmem>>, vector<8x128xf32>,
    %c0_181 = arith.constant 0 : index
    %c0_182 = arith.constant 0 : index
    %811 = vector.load %arg19[%c0_181, %c0_182] : memref<8x128xf32, #tpu.memory_space<vmem>>, vector<8x128xf32>
    tpu.vector_store %arg19[%c0_181, %c0_182], %798 {strides = array<i32>} : memref<8x128xf32, #tpu.memory_space<vmem>>, vector<8x128xf32>,
    %c0_183 = arith.constant 0 : index
    %c0_184 = arith.constant 0 : index
    %812 = vector.load %arg21[%c0_183, %c0_184] : memref<8x128xf32, #tpu.memory_space<vmem>>, vector<8x128xf32>
    tpu.vector_store %arg21[%c0_183, %c0_184], %801 {strides = array<i32>} : memref<8x128xf32, #tpu.memory_space<vmem>>, vector<8x128xf32>,
    %c0_i32_185 = arith.constant 0 : i32
    %813 = arith.cmpi eq, %arg0, %c0_i32_185 : i32
    %814 = arith.extui %813 : i1 to i32
    %c0_i32_186 = arith.constant 0 : i32
    %815 = arith.cmpi ne, %814, %c0_i32_186 : i32
    scf.if %815 {
      %c0_187 = arith.constant 0 : index
      %c0_188 = arith.constant 0 : index
      %816 = vector.load %arg12[%c0_187, %c0_188] : memref<8x128xf32, #tpu.memory_space<vmem>>, vector<8x128xf32>
      tpu.vector_store %arg12[%c0_187, %c0_188], %748 {strides = array<i32>} : memref<8x128xf32, #tpu.memory_space<vmem>>, vector<8x128xf32>,
      %c0_189 = arith.constant 0 : index
      %c0_190 = arith.constant 0 : index
      %817 = vector.load %arg14[%c0_189, %c0_190] : memref<8x128xf32, #tpu.memory_space<vmem>>, vector<8x128xf32>
      tpu.vector_store %arg14[%c0_189, %c0_190], %751 {strides = array<i32>} : memref<8x128xf32, #tpu.memory_space<vmem>>, vector<8x128xf32>,
      %c0_191 = arith.constant 0 : index
      %c0_192 = arith.constant 0 : index
      %818 = vector.load %arg13[%c0_191, %c0_192] : memref<8x128xf32, #tpu.memory_space<vmem>>, vector<8x128xf32>
      tpu.vector_store %arg13[%c0_191, %c0_192], %798 {strides = array<i32>} : memref<8x128xf32, #tpu.memory_space<vmem>>, vector<8x128xf32>,
      %c0_193 = arith.constant 0 : index
      %c0_194 = arith.constant 0 : index
      %819 = vector.load %arg15[%c0_193, %c0_194] : memref<8x128xf32, #tpu.memory_space<vmem>>, vector<8x128xf32>
      tpu.vector_store %arg15[%c0_193, %c0_194], %801 {strides = array<i32>} : memref<8x128xf32, #tpu.memory_space<vmem>>, vector<8x128xf32>,
    } else {
    }
    return
  }
  func.func @transform_0(%arg0: i32) -> (i32, i32) {
    %c0_i32 = arith.constant 0 : i32
    %c0_i32_0 = arith.constant 0 : i32
    return %arg0, %c0_i32 : i32, i32
  }
  func.func @transform_1(%arg0: i32) -> (i32, i32) {
    %c0_i32 = arith.constant 0 : i32
    %0 = arith.subi %c0_i32, %arg0 : i32
    %c0_i32_0 = arith.constant 0 : i32
    %c0_i32_1 = arith.constant 0 : i32
    return %0, %c0_i32_0 : i32, i32
  }
  func.func @transform_2(%arg0: i32) -> (i32, i32) {
    %c0_i32 = arith.constant 0 : i32
    %c0_i32_0 = arith.constant 0 : i32
    %c0_i32_1 = arith.constant 0 : i32
    return %c0_i32, %c0_i32_0 : i32, i32
  }
  func.func @transform_3(%arg0: i32) -> (i32, i32) {
    %c0_i32 = arith.constant 0 : i32
    %c0_i32_0 = arith.constant 0 : i32
    %c0_i32_1 = arith.constant 0 : i32
    return %c0_i32, %c0_i32_0 : i32, i32
  }
  func.func @transform_4(%arg0: i32) -> (i32, i32) {
    %c0_i32 = arith.constant 0 : i32
    %c0_i32_0 = arith.constant 0 : i32
    %c0_i32_1 = arith.constant 0 : i32
    return %c0_i32, %c0_i32_0 : i32, i32
  }
  func.func @transform_5(%arg0: i32) -> (i32, i32) {
    %c0_i32 = arith.constant 0 : i32
    %c0_i32_0 = arith.constant 0 : i32
    %c0_i32_1 = arith.constant 0 : i32
    return %c0_i32, %c0_i32_0 : i32, i32
  }
  func.func @transform_6(%arg0: i32) -> (i32, i32) {
    %c0_i32 = arith.constant 0 : i32
    %c0_i32_0 = arith.constant 0 : i32
    %c0_i32_1 = arith.constant 0 : i32
    return %c0_i32, %c0_i32_0 : i32, i32
  }
  func.func @transform_7(%arg0: i32) -> (i32, i32) {
    %c0_i32 = arith.constant 0 : i32
    %c0_i32_0 = arith.constant 0 : i32
    %c0_i32_1 = arith.constant 0 : i32
    return %c0_i32, %c0_i32_0 : i32, i32
  }
  func.func @transform_8(%arg0: i32) -> (i32, i32) {
    %c0_i32 = arith.constant 0 : i32
    %c0_i32_0 = arith.constant 0 : i32
    %c0_i32_1 = arith.constant 0 : i32
    return %c0_i32, %c0_i32_0 : i32, i32
  }
  func.func @transform_9(%arg0: i32) -> (i32, i32) {
    %c0_i32 = arith.constant 0 : i32
    %c0_i32_0 = arith.constant 0 : i32
    return %arg0, %c0_i32 : i32, i32
  }
  func.func @transform_10(%arg0: i32) -> (i32, i32) {
    %c0_i32 = arith.constant 0 : i32
    %0 = arith.subi %c0_i32, %arg0 : i32
    %c0_i32_0 = arith.constant 0 : i32
    %c0_i32_1 = arith.constant 0 : i32
    return %0, %c0_i32_0 : i32, i32
  }
  func.func @transform_11(%arg0: i32) -> (i32, i32) {
    %c0_i32 = arith.constant 0 : i32
    %c0_i32_0 = arith.constant 0 : i32
    %c0_i32_1 = arith.constant 0 : i32
    return %c0_i32, %c0_i32_0 : i32, i32
  }
  func.func @transform_12(%arg0: i32) -> (i32, i32) {
    %c0_i32 = arith.constant 0 : i32
    %c0_i32_0 = arith.constant 0 : i32
    %c0_i32_1 = arith.constant 0 : i32
    return %c0_i32, %c0_i32_0 : i32, i32
  }
  func.func @transform_13(%arg0: i32) -> (i32, i32) {
    %c0_i32 = arith.constant 0 : i32
    %c0_i32_0 = arith.constant 0 : i32
    %c0_i32_1 = arith.constant 0 : i32
    return %c0_i32, %c0_i32_0 : i32, i32
  }
  func.func @transform_14(%arg0: i32) -> (i32, i32) {
    %c0_i32 = arith.constant 0 : i32
    %c0_i32_0 = arith.constant 0 : i32
    %c0_i32_1 = arith.constant 0 : i32
    return %c0_i32, %c0_i32_0 : i32, i32
  }
}

</mosaic_0001>

<bundles_post_ra>
// kernel: tpu_custom_call.1
= control target key start
LH: loop header
LB: loop body
LE: loop exit
PB: predicated region body
PF: predicated region fallthrough
CT: control target
= control target key end

     0   :  { %20 = vsyncpa [#allocation9], 0  ;;  %s6176_s0 = inlined_call_operand.hbm [shape: bf16[64,128], index: 0, kind: input, shape index: {}]   ;;  %s6177_s1 = inlined_call_operand.hbm [shape: bf16[64,128], index: 1, kind: input, shape index: {}]   ;;  %s6178_s2 = inlined_call_operand.hbm [shape: bf16[128,512], index: 2, kind: input, shape index: {}]   ;;  %s6179_s3 = inlined_call_operand.hbm [shape: bf16[128,512], index: 3, kind: input, shape index: {}]   ;;  %s6180_s4 = inlined_call_operand.hbm [shape: bf16[128,512], index: 4, kind: input, shape index: {}]   ;;  %s6181_s5 = inlined_call_operand.hbm [shape: bf16[128,512], index: 5, kind: input, shape index: {}]   ;;  %s6182_s6 = inlined_call_operand.vmem [shape: f32[1,512], index: 6, kind: input, shape index: {}]   ;;  %s6183_s7 = inlined_call_operand.vmem [shape: f32[1,512], index: 7, kind: input, shape index: {}]   ;;  %s6184_s8 = inlined_call_operand.vmem [shape: s32[8,1], index: 8, kind: input, shape index: {}]   ;;  %s6185_s9 = inlined_call_operand.hbm [shape: bf16[64,128], index: 9, kind: output, shape index: {0}]   ;;  %s6186_s10 = inlined_call_operand.hbm [shape: bf16[64,128], index: 10, kind: output, shape index: {1}]   ;;  %s6187_s11 = inlined_call_operand.hbm [shape: f32[8,128], index: 11, kind: output, shape index: {2}]   ;;  %s6188_s12 = inlined_call_operand.hbm [shape: f32[8,128], index: 12, kind: output, shape index: {3}]   ;;  %s6189_s13 = inlined_call_operand.hbm [shape: f32[8,128], index: 13, kind: output, shape index: {4}]   ;;  %s6190_s14 = inlined_call_operand.hbm [shape: f32[8,128], index: 14, kind: output, shape index: {5}]  }
   0x1   :  { %21 = vsyncpa [#allocation12], 0 }
   0x2   :  { %22 = vsyncpa [#allocation15], 0 }
   0x3   :  { %23 = vsyncpa [#allocation18], 0 }
   0x4   :  { %24 = vsyncpa [#allocation10], 0 }
   0x5   :  { %25 = vsyncpa [#allocation21], 0 }
   0x6   :  { %26 = vsyncpa [#allocation24], 0 }
   0x7   :  { %27 = vsyncpa [#allocation27], 0  ;;  %s4675_s29 = smov [#allocation11]  }
   0x8   :  { %s49_s30 = sshll.u32 %s4675_s29, 4  ;;  %s50_s30 = int_to_ptr.vmem [resolvable:$true] %s49_s30 }
   0x9   :  { %s4427_s15 = scalar_lea.vmem %s50_s30, 512  ;;  %p4432_p1 = scmp.lt.s32.totalorder %s50_s30, %s50_s30 }
   0xa   :  { %p4428_p0 = scmp.ne.s32.totalorder %s50_s30, %s4427_s15  ;;  %p4433_p2 = scmp.lt.s32.totalorder %s4427_s15, %s4427_s15 }
   0xc   :  { %p4434_p3 = por %p4433_p2, %p4432_p1 }
   0xe   :  { %p4435_p4 = pnand %p4434_p3, %p4428_p0 }
  0x10   :  { %4438 = shalt.err (!%p4435_p4)
}
  0x11   :  { %s4676_s16 = smov 64   ;;  %s4677_s17 = smov 4  }
  0x12   :  { %55 = dma.hbm_to_vmem [thread:$0]  %s6177_s1, 512, %s50_s30, [#allocation12], %s4676_s16, %s4676_s16, %s4677_s17  }
  0x13   :  { %s4678_s20 = smov [#allocation14]   ;;  %s4679_s22 = smov [#allocation8]  }
  0x14   :  { %s73_s21 = sshll.u32 %s4678_s20, 4  ;;  %s33_s23 = sshll.u32 %s4679_s22, 4  ;;  %s74_s21 = int_to_ptr.vmem [resolvable:$true] %s73_s21  ;;  %s34_s23 = int_to_ptr.vmem [resolvable:$true] %s33_s23 }
  0x15   :  { %s4447_s24 = scalar_lea.vmem %s74_s21, 4096  ;;  %p4452_p6 = scmp.lt.s32.totalorder %s74_s21, %s74_s21 }
  0x16   :  { %p4448_p5 = scmp.ne.s32.totalorder %s74_s21, %s4447_s24  ;;  %p4453_p7 = scmp.lt.s32.totalorder %s4447_s24, %s4447_s24 }
  0x18   :  { %p4454_p8 = por %p4453_p7, %p4452_p6 }
  0x1a   :  { %p4455_p9 = pnand %p4454_p8, %p4448_p5 }
  0x1c   :  { %4458 = shalt.err (!%p4455_p9)
}
  0x1d   :  { %s4680_s25 = smov 256   ;;  %s4681_s26 = smov 16  }
  0x1e   :  { %79 = dma.hbm_to_vmem [thread:$0]  %s6179_s3, 4096, %s74_s21, [#allocation15], %s4680_s25, %s4680_s25, %s4681_s26  }
  0x1f   :  { %s4467_s1 = scalar_lea.vmem %s34_s23, 512  ;;  %p4472_p11 = scmp.lt.s32.totalorder %s34_s23, %s34_s23 }
  0x20   :  { %p4468_p10 = scmp.ne.s32.totalorder %s34_s23, %s4467_s1  ;;  %p4473_p12 = scmp.lt.s32.totalorder %s4467_s1, %s4467_s1 }
  0x22   :  { %p4474_p13 = por %p4473_p12, %p4472_p11 }
  0x24   :  { %p4475_p0 = pnand %p4474_p13, %p4468_p10 }
  0x26   :  { %4478 = shalt.err (!%p4475_p0)
}
  0x27   :  { %39 = dma.hbm_to_vmem [thread:$0]  %s6176_s0, 512, %s34_s23, [#allocation9], %s4676_s16, %s4676_s16, %s4677_s17  }
  0x28   :  { %s4682_s15 = smov [#allocation13]   ;;  %s4683_s19 = smov [#allocation16]  }
  0x29   :  { %s61_s18 = sshll.u32 %s4682_s15, 4  ;;  %s85_s3 = sshll.u32 %s4683_s19, 4  ;;  %s62_s18 = int_to_ptr.vmem [resolvable:$true] %s61_s18  ;;  %s86_s3 = int_to_ptr.vmem [resolvable:$true] %s85_s3 }
  0x2a   :  { %s4487_s20 = scalar_lea.vmem %s62_s18, 4096  ;;  %p4492_p2 = scmp.lt.s32.totalorder %s62_s18, %s62_s18 }
  0x2b   :  { %p4488_p1 = scmp.ne.s32.totalorder %s62_s18, %s4487_s20  ;;  %p4493_p3 = scmp.lt.s32.totalorder %s4487_s20, %s4487_s20 }
  0x2d   :  { %p4494_p4 = por %p4493_p3, %p4492_p2 }
  0x2f   :  { %p4495_p5 = pnand %p4494_p4, %p4488_p1 }
  0x31   :  { %4498 = shalt.err (!%p4495_p5)
}
  0x32   :  { %67 = dma.hbm_to_vmem [thread:$0]  %s6178_s2, 4096, %s62_s18, [#allocation12], %s4680_s25, %s4680_s25, %s4681_s26  }
  0x33   :  { %s4507_s0 = scalar_lea.vmem %s86_s3, 4096  ;;  %p4512_p7 = scmp.lt.s32.totalorder %s86_s3, %s86_s3 }
  0x34   :  { %p4508_p6 = scmp.ne.s32.totalorder %s86_s3, %s4507_s0  ;;  %p4513_p8 = scmp.lt.s32.totalorder %s4507_s0, %s4507_s0 }
  0x36   :  { %p4514_p9 = por %p4513_p8, %p4512_p7 }
  0x38   :  { %p4515_p10 = pnand %p4514_p9, %p4508_p6 }
  0x3a   :  { %4518 = shalt.err (!%p4515_p10)
}
  0x3b   :  { %91 = dma.hbm_to_vmem [thread:$0]  %s6180_s4, 4096, %s86_s3, [#allocation15], %s4680_s25, %s4680_s25, %s4681_s26  }
  0x3c   :  { %s4684_s27 = smov [#allocation17]  }
  0x3d   :  { %s97_s28 = sshll.u32 %s4684_s27, 4  ;;  %s98_s28 = int_to_ptr.vmem [resolvable:$true] %s97_s28 }
  0x3e   :  { %s4527_s1 = scalar_lea.vmem %s98_s28, 4096  ;;  %p4532_p12 = scmp.lt.s32.totalorder %s98_s28, %s98_s28 }
  0x3f   :  { %p4528_p11 = scmp.ne.s32.totalorder %s98_s28, %s4527_s1  ;;  %p4533_p13 = scmp.lt.s32.totalorder %s4527_s1, %s4527_s1 }
  0x41   :  { %p4534_p0 = por %p4533_p13, %p4532_p12 }
  0x43   :  { %p4535_p1 = pnand %p4534_p0, %p4528_p11 }
  0x45   :  { %4538 = shalt.err (!%p4535_p1)
}
  0x46   :  { %103 = dma.hbm_to_vmem [thread:$0]  %s6181_s5, 4096, %s98_s28, [#allocation18], %s4680_s25, %s4680_s25, %s4681_s26  }
  0x47   :  { %4659 = dma.done.wait [#allocation9], 512  }
  0x48   :  { %4660 = vsyncadd [#allocation9], 4294966784 }
  0x49   :  { %4661 = dma.done.wait [#allocation12], 4608  }
  0x4a   :  { %4662 = vsyncadd [#allocation12], 4294962688 }
  0x4b   :  { %4663 = dma.done.wait [#allocation15], 8192  }
  0x4c   :  { %4664 = vsyncadd [#allocation15], 4294959104 }
  0x4d   :  { %4665 = dma.done.wait [#allocation18], 4096  }
  0x4e   :  { %4666 = vsyncadd [#allocation18], 4294963200  ;;  %v6199_v0 = vmov 0   ;;  %v3835_v1 = vld [vmem:[#allocation13 + $0xe4] ss:$16 sps:$4 sm:$0xff]   ;;  %v3896_v44 = vld [vmem:[#allocation8 + $0x8] sm:$0xff]  }
  0x4f   :  { %421 = vmatprep.mubr.bf16.mxu0 %v6199_v0  ;;  %494 = vmatprep.mubr.bf16.mxu1 %v6199_v0  ;;  %v3837_v2 = vld [vmem:[#allocation13 + $0xec] ss:$16 sps:$4 sm:$0xff]   ;;  %v3839_v3 = vld [vmem:[#allocation13 + $0xe0] ss:$16 sps:$4 sm:$0xff]   ;;  %v3840_v4 = vld [vmem:[#allocation13 + $0xe8] ss:$16 sps:$4 sm:$0xff]  }
  0x50   :  { %3833 = vset.pattern.permute.xlu0 %v6199_v0  ;;  %3834 = vset.pattern.permute.xlu1 %v6199_v0  ;;  %v3841_v5 = vld [vmem:[#allocation13 + $0xc4] ss:$16 sps:$4 sm:$0xff]   ;;  %v3843_v6 = vld [vmem:[#allocation13 + $0xcc] ss:$16 sps:$4 sm:$0xff]   ;;  %v3845_v7 = vld [vmem:[#allocation13 + $0xc0] ss:$16 sps:$4 sm:$0xff]  }
  0x51   :  { %389 = vmatprep.subr.bf16.mxu0 %v3835_v1  ;;  %462 = vmatprep.subr.bf16.mxu1 %v3837_v2  ;;  %v3846_v8 = vld [vmem:[#allocation13 + $0xc8] ss:$16 sps:$4 sm:$0xff]   ;;  %v3847_v9 = vld [vmem:[#allocation13 + $0xa4] ss:$16 sps:$4 sm:$0xff]   ;;  %v3849_v10 = vld [vmem:[#allocation13 + $0xac] ss:$16 sps:$4 sm:$0xff]  }
  0x52   :  { %390 = vmatpush1.bf16.msra.mxu0 %v3839_v3  ;;  %463 = vmatpush1.bf16.msra.mxu1 %v3840_v4  ;;  %v3851_v11 = vld [vmem:[#allocation13 + $0xa0] ss:$16 sps:$4 sm:$0xff]   ;;  %v3852_v12 = vld [vmem:[#allocation13 + $0xa8] ss:$16 sps:$4 sm:$0xff]   ;;  %v3853_v13 = vld [vmem:[#allocation13 + $0x84] ss:$16 sps:$4 sm:$0xff]  }
  0x53   :  { %391 = vmatprep.subr.bf16.mxu0 %v3841_v5  ;;  %464 = vmatprep.subr.bf16.mxu1 %v3843_v6  ;;  %v3855_v14 = vld [vmem:[#allocation13 + $0x8c] ss:$16 sps:$4 sm:$0xff]   ;;  %v3857_v15 = vld [vmem:[#allocation13 + $0x80] ss:$16 sps:$4 sm:$0xff]   ;;  %v3858_v16 = vld [vmem:[#allocation13 + $0x88] ss:$16 sps:$4 sm:$0xff]  }
  0x54   :  { %v3859_v17 = vld [vmem:[#allocation13 + $0x64] ss:$16 sps:$4 sm:$0xff]   ;;  %v3861_v18 = vld [vmem:[#allocation13 + $0x6c] ss:$16 sps:$4 sm:$0xff]   ;;  %v3863_v19 = vld [vmem:[#allocation13 + $0x60] ss:$16 sps:$4 sm:$0xff]  }
  0x55   :  { %v3864_v20 = vld [vmem:[#allocation13 + $0x68] ss:$16 sps:$4 sm:$0xff]   ;;  %v3865_v21 = vld [vmem:[#allocation13 + $0x44] ss:$16 sps:$4 sm:$0xff]   ;;  %v3867_v22 = vld [vmem:[#allocation13 + $0x4c] ss:$16 sps:$4 sm:$0xff]  }
  0x56   :  { %392 = vmatpush1.bf16.msra.mxu0 %v3845_v7  ;;  %465 = vmatpush1.bf16.msra.mxu1 %v3846_v8  ;;  %v3869_v23 = vld [vmem:[#allocation13 + $0x40] ss:$16 sps:$4 sm:$0xff]   ;;  %v3870_v24 = vld [vmem:[#allocation13 + $0x48] ss:$16 sps:$4 sm:$0xff]   ;;  %v3871_v25 = vld [vmem:[#allocation13 + $0x24] ss:$16 sps:$4 sm:$0xff]  }
  0x57   :  { %393 = vmatprep.subr.bf16.mxu0 %v3847_v9  ;;  %466 = vmatprep.subr.bf16.mxu1 %v3849_v10  ;;  %v3873_v26 = vld [vmem:[#allocation13 + $0x2c] ss:$16 sps:$4 sm:$0xff]   ;;  %v3875_v27 = vld [vmem:[#allocation13 + $0x20] ss:$16 sps:$4 sm:$0xff]   ;;  %v3876_v28 = vld [vmem:[#allocation13 + $0x28] ss:$16 sps:$4 sm:$0xff]  }
  0x58   :  { %v3877_v29 = vld [vmem:[#allocation13 + $0x4] ss:$16 sps:$4 sm:$0xff]   ;;  %v3879_v30 = vld [vmem:[#allocation13 + $0xc] ss:$16 sps:$4 sm:$0xff]   ;;  %v3881_v31 = vld [vmem:[#allocation13] ss:$16 sps:$4 sm:$0xff]  }
  0x59   :  { %v3882_v32 = vld [vmem:[#allocation13 + $0x8] ss:$16 sps:$4 sm:$0xff]   ;;  %v3886_v33 = vld [vmem:[#allocation14 + $0xe4] ss:$16 sps:$4 sm:$0xff]   ;;  %v3889_v34 = vld [vmem:[#allocation14 + $0xec] ss:$16 sps:$4 sm:$0xff]  }
  0x5a   :  { %394 = vmatpush1.bf16.msra.mxu0 %v3851_v11  ;;  %467 = vmatpush1.bf16.msra.mxu1 %v3852_v12  ;;  %v3883_v35 = vld [vmem:[#allocation8] sm:$0xff]   ;;  %v3887_v37 = vld [vmem:[#allocation14 + $0xe8] ss:$16 sps:$4 sm:$0xff]   ;;  %v3895_v39 = vld [vmem:[#allocation14 + $0xcc] ss:$16 sps:$4 sm:$0xff]  }
  0x5b   :  { %395 = vmatprep.subr.bf16.mxu0 %v3853_v13  ;;  %468 = vmatprep.subr.bf16.mxu1 %v3855_v14  ;;  %v3884_v36 = vld [vmem:[#allocation14 + $0xe0] ss:$16 sps:$4 sm:$0xff]   ;;  %v3892_v38 = vld [vmem:[#allocation14 + $0xc4] ss:$16 sps:$4 sm:$0xff]   ;;  %v3893_v41 = vld [vmem:[#allocation14 + $0xc8] ss:$16 sps:$4 sm:$0xff]  }
  0x5c   :  { %v3890_v40 = vld [vmem:[#allocation14 + $0xc0] ss:$16 sps:$4 sm:$0xff]   ;;  %v3899_v42 = vld [vmem:[#allocation14 + $0xa4] ss:$16 sps:$4 sm:$0xff]   ;;  %v3902_v43 = vld [vmem:[#allocation14 + $0xac] ss:$16 sps:$4 sm:$0xff]  }
  0x5d   :  { %v3897_v45 = vld [vmem:[#allocation14 + $0xa0] ss:$16 sps:$4 sm:$0xff]   ;;  %v3900_v46 = vld [vmem:[#allocation14 + $0xa8] ss:$16 sps:$4 sm:$0xff]   ;;  %v3905_v47 = vld [vmem:[#allocation14 + $0x84] ss:$16 sps:$4 sm:$0xff]  }
  0x5e   :  { %396 = vmatpush1.bf16.msra.mxu0 %v3857_v15  ;;  %469 = vmatpush1.bf16.msra.mxu1 %v3858_v16  ;;  %v3908_v48 = vld [vmem:[#allocation14 + $0x8c] ss:$16 sps:$4 sm:$0xff]   ;;  %v3903_v49 = vld [vmem:[#allocation14 + $0x80] ss:$16 sps:$4 sm:$0xff]   ;;  %v3906_v50 = vld [vmem:[#allocation14 + $0x88] ss:$16 sps:$4 sm:$0xff]  }
  0x5f   :  { %397 = vmatprep.subr.bf16.mxu0 %v3859_v17  ;;  %470 = vmatprep.subr.bf16.mxu1 %v3861_v18  ;;  %v3912_v51 = vld [vmem:[#allocation14 + $0x64] ss:$16 sps:$4 sm:$0xff]   ;;  %v3915_v52 = vld [vmem:[#allocation14 + $0x6c] ss:$16 sps:$4 sm:$0xff]   ;;  %v3910_v54 = vld [vmem:[#allocation14 + $0x60] ss:$16 sps:$4 sm:$0xff]  }
  0x60   :  { %v3909_v53 = vld [vmem:[#allocation8 + $0x10] sm:$0xff]   ;;  %v3913_v55 = vld [vmem:[#allocation14 + $0x68] ss:$16 sps:$4 sm:$0xff]   ;;  %v3921_v57 = vld [vmem:[#allocation14 + $0x4c] ss:$16 sps:$4 sm:$0xff]  }
  0x61   :  { %v3918_v56 = vld [vmem:[#allocation14 + $0x44] ss:$16 sps:$4 sm:$0xff]   ;;  %v3916_v58 = vld [vmem:[#allocation14 + $0x40] ss:$16 sps:$4 sm:$0xff]   ;;  %v3919_v59 = vld [vmem:[#allocation14 + $0x48] ss:$16 sps:$4 sm:$0xff]  }
  0x62   :  { %398 = vmatpush1.bf16.msra.mxu0 %v3863_v19  ;;  %471 = vmatpush1.bf16.msra.mxu1 %v3864_v20  ;;  %v3925_v60 = vld [vmem:[#allocation14 + $0x24] ss:$16 sps:$4 sm:$0xff]   ;;  %v3928_v61 = vld [vmem:[#allocation14 + $0x2c] ss:$16 sps:$4 sm:$0xff]   ;;  %v3923_v63 = vld [vmem:[#allocation14 + $0x20] ss:$16 sps:$4 sm:$0xff]  }
  0x63   :  { %399 = vmatprep.subr.bf16.mxu0 %v3865_v21  ;;  %472 = vmatprep.subr.bf16.mxu1 %v3867_v22  ;;  %v3922_v62 = vld [vmem:[#allocation8 + $0x18] sm:$0xff]   ;;  %v3931_v2 = vld [vmem:[#allocation14 + $0x4] ss:$16 sps:$4 sm:$0xff]   ;;  %v3929_v4 = vld [vmem:[#allocation14] ss:$16 sps:$4 sm:$0xff]  }
  0x64   :  { %v3926_v1 = vld [vmem:[#allocation14 + $0x28] ss:$16 sps:$4 sm:$0xff]   ;;  %v3934_v3 = vld [vmem:[#allocation14 + $0xc] ss:$16 sps:$4 sm:$0xff]   ;;  %v4814_v6 = vld [vmem:[#allocation16 + $0xe4] ss:$16 sps:$4 sm:$0xff]  }
  0x65   :  { %v3932_v5 = vld [vmem:[#allocation14 + $0x8] ss:$16 sps:$4 sm:$0xff]   ;;  %v4816_v7 = vld [vmem:[#allocation16 + $0xec] ss:$16 sps:$4 sm:$0xff]   ;;  %v3935_v8 = vld [vmem:[#allocation11] sm:$0xff]  }
  0x66   :  { %400 = vmatpush1.bf16.msra.mxu0 %v3869_v23  ;;  %473 = vmatpush1.bf16.msra.mxu1 %v3870_v24  ;;  %v4820_v9 = vld [vmem:[#allocation16 + $0xe0] ss:$16 sps:$4 sm:$0xff]   ;;  %v4822_v10 = vld [vmem:[#allocation16 + $0xe8] ss:$16 sps:$4 sm:$0xff]   ;;  %v4826_v11 = vld [vmem:[#allocation16 + $0xc4] ss:$16 sps:$4 sm:$0xff]  }
  0x67   :  { %401 = vmatprep.subr.bf16.mxu0 %v3871_v25  ;;  %474 = vmatprep.subr.bf16.mxu1 %v3873_v26  ;;  %v4828_v12 = vld [vmem:[#allocation16 + $0xcc] ss:$16 sps:$4 sm:$0xff]   ;;  %v4830_v13 = vld [vmem:[#allocation16 + $0xc0] ss:$16 sps:$4 sm:$0xff]   ;;  %v4834_v14 = vld [vmem:[#allocation16 + $0xc8] ss:$16 sps:$4 sm:$0xff]  }
  0x68   :  { %v4836_v15 = vld [vmem:[#allocation16 + $0xa4] ss:$16 sps:$4 sm:$0xff]   ;;  %v4840_v16 = vld [vmem:[#allocation16 + $0xac] ss:$16 sps:$4 sm:$0xff]   ;;  %v4844_v18 = vld [vmem:[#allocation16 + $0xa0] ss:$16 sps:$4 sm:$0xff]  }
  0x69   :  { %v3948_v17 = vld [vmem:[#allocation11 + $0x8] sm:$0xff]   ;;  %v4850_v20 = vld [vmem:[#allocation16 + $0x84] ss:$16 sps:$4 sm:$0xff]   ;;  %v4856_v22 = vld [vmem:[#allocation16 + $0x80] ss:$16 sps:$4 sm:$0xff]  }
  0x6a   :  { %402 = vmatpush1.bf16.msra.mxu0 %v3875_v27  ;;  %475 = vmatpush1.bf16.msra.mxu1 %v3876_v28  ;;  %v4846_v19 = vld [vmem:[#allocation16 + $0xa8] ss:$16 sps:$4 sm:$0xff]   ;;  %v4854_v21 = vld [vmem:[#allocation16 + $0x8c] ss:$16 sps:$4 sm:$0xff]   ;;  %v4862_v24 = vld [vmem:[#allocation16 + $0x64] ss:$16 sps:$4 sm:$0xff]  }
  0x6b   :  { %403 = vmatprep.subr.bf16.mxu0 %v3877_v29  ;;  %476 = vmatprep.subr.bf16.mxu1 %v3879_v30  ;;  %v4860_v23 = vld [vmem:[#allocation16 + $0x88] ss:$16 sps:$4 sm:$0xff]   ;;  %v4866_v25 = vld [vmem:[#allocation16 + $0x6c] ss:$16 sps:$4 sm:$0xff]   ;;  %v3961_v26 = vld [vmem:[#allocation11 + $0x10] sm:$0xff]  }
  0x6c   :  { %v4870_v27 = vld [vmem:[#allocation16 + $0x60] ss:$16 sps:$4 sm:$0xff]   ;;  %v4872_v28 = vld [vmem:[#allocation16 + $0x68] ss:$16 sps:$4 sm:$0xff]   ;;  %v4876_v29 = vld [vmem:[#allocation16 + $0x44] ss:$16 sps:$4 sm:$0xff]  }
  0x6d   :  { %v4880_v30 = vld [vmem:[#allocation16 + $0x4c] ss:$16 sps:$4 sm:$0xff]  }
  0x6e   :  { %404 = vmatpush1.bf16.msra.mxu0 %v3881_v31  ;;  %477 = vmatpush1.bf16.msra.mxu1 %v3882_v32  ;;  %v4882_v31 = vld [vmem:[#allocation16 + $0x40] ss:$16 sps:$4 sm:$0xff]   ;;  %v4886_v32 = vld [vmem:[#allocation16 + $0x48] ss:$16 sps:$4 sm:$0xff]  }
  0x6f   :  { %813 = vmatprep.subr.bf16.mxu0 %v3886_v33  ;;  %886 = vmatprep.subr.bf16.mxu1 %v3889_v34  ;;  %v4888_v33 = vld [vmem:[#allocation16 + $0x24] ss:$16 sps:$4 sm:$0xff]   ;;  %v4892_v34 = vld [vmem:[#allocation16 + $0x2c] ss:$16 sps:$4 sm:$0xff]  }
  0x70   :  { %6295 = vst [vmem:[#allocation36_spill] sm:$0xff] %v4892_v34 }
  0x71   :  { %422 = vmatmul.mubr.bf16.vlgmr.msra.gmra.mxu0 %v3883_v35  ;;  %495 = vmatmul.mubr.bf16.vlgmr.msra.gmra.mxu1 %v3883_v35  ;;  %v3974_v35 = vld [vmem:[#allocation11 + $0x18] sm:$0xff]  }
  0x72   :  { %814 = vmatpush1.bf16.msra.mxu0 %v3884_v36  ;;  %887 = vmatpush1.bf16.msra.mxu1 %v3887_v37  ;;  %v4896_v36 = vld [vmem:[#allocation16 + $0x20] ss:$16 sps:$4 sm:$0xff]   ;;  %v4898_v37 = vld [vmem:[#allocation16 + $0x28] ss:$16 sps:$4 sm:$0xff]  }
  0x73   :  { %815 = vmatprep.subr.bf16.mxu0 %v3892_v38  ;;  %888 = vmatprep.subr.bf16.mxu1 %v3895_v39  ;;  %6296 = vst [vmem:[#allocation37_spill] sm:$0xff] %v4896_v36  ;;  %6297 = vst [vmem:[#allocation38_spill] sm:$0xff] %v4898_v37  ;;  %v4902_v38 = vld [vmem:[#allocation16 + $0x4] ss:$16 sps:$4 sm:$0xff]   ;;  %v4906_v39 = vld [vmem:[#allocation16 + $0xc] ss:$16 sps:$4 sm:$0xff]  }
  0x74   :  { %431 = vmatprep.mubr.bf16.mxu0 %v6199_v0  ;;  %504 = vmatprep.mubr.bf16.mxu1 %v6199_v0  ;;  %6298 = vst [vmem:[#allocation39_spill] sm:$0xff] %v4902_v38  ;;  %6299 = vst [vmem:[#allocation40_spill] sm:$0xff] %v4906_v39 }
  0x76   :  { %816 = vmatpush1.bf16.msra.mxu0 %v3890_v40  ;;  %889 = vmatpush1.bf16.msra.mxu1 %v3893_v41  ;;  %v4910_v40 = vld [vmem:[#allocation16] ss:$16 sps:$4 sm:$0xff]   ;;  %v4912_v41 = vld [vmem:[#allocation16 + $0x8] ss:$16 sps:$4 sm:$0xff]  }
  0x77   :  { %817 = vmatprep.subr.bf16.mxu0 %v3899_v42  ;;  %890 = vmatprep.subr.bf16.mxu1 %v3902_v43  ;;  %6300 = vst [vmem:[#allocation41_spill] sm:$0xff] %v4910_v40  ;;  %6301 = vst [vmem:[#allocation42_spill] sm:$0xff] %v4912_v41  ;;  %v4916_v42 = vld [vmem:[#allocation17 + $0xe4] ss:$16 sps:$4 sm:$0xff]   ;;  %v4918_v43 = vld [vmem:[#allocation17 + $0xec] ss:$16 sps:$4 sm:$0xff]  }
  0x78   :  { %6302 = vst [vmem:[#allocation43_spill] sm:$0xff] %v4916_v42  ;;  %6303 = vst [vmem:[#allocation44_spill] sm:$0xff] %v4918_v43 }
  0x79   :  { %432 = vmatmul.mubr.bf16.gmra.mxu0 %v3896_v44  ;;  %505 = vmatmul.mubr.bf16.gmra.mxu1 %v3896_v44  ;;  %v4923_v44 = vld [vmem:[%s6184_s8] sm:$0xff] }
  0x7a   :  { %818 = vmatpush1.bf16.msra.mxu0 %v3897_v45  ;;  %891 = vmatpush1.bf16.msra.mxu1 %v3900_v46  ;;  %vm3710_vm0 = vcmp.gt.s32.totalorder %v4923_v44, 0  ;;  %v4933_v46 = vld [vmem:[#allocation17 + $0xe0] ss:$16 sps:$4 sm:$0xff]   ;;  %vm3746_vm1 = vcmp.gt.s32.totalorder %v4923_v44, 7  ;;  %vm3758_vm2 = vcmp.gt.s32.totalorder %v4923_v44, 2  ;;  %vm3766_vm3 = vcmp.gt.s32.totalorder %v4923_v44, 3 }
  0x7b   :  { %819 = vmatprep.subr.bf16.mxu0 %v3905_v47  ;;  %892 = vmatprep.subr.bf16.mxu1 %v3908_v48  ;;  %v4929_v45 = vsel %vm3710_vm0, 1, %v6199_v0  ;;  %v4935_v47 = vld [vmem:[#allocation17 + $0xe8] ss:$16 sps:$4 sm:$0xff]   ;;  %v4939_v48 = vld [vmem:[#allocation17 + $0xc4] ss:$16 sps:$4 sm:$0xff]   ;;  %vm3770_vm4 = vcmp.gt.s32.totalorder %v4923_v44, 4 }
  0x7c   :  { %441 = vmatprep.mubr.bf16.mxu0 %v6199_v0  ;;  %514 = vmatprep.mubr.bf16.mxu1 %v6199_v0  ;;  %vm3762_vm5 = vcmp.gt.s32.totalorder %v4923_v44, 5  ;;  %vm3754_vm6 = vcmp.gt.s32.totalorder %v4923_v44, 6  ;;  %vm3750_vm7 = vcmp.gt.s32.totalorder %v4923_v44, 1 }
  0x7d   :  { %1341 = vperm.xlu0 %3833, %v4929_v45  }
  0x7e   :  { %820 = vmatpush1.bf16.msra.mxu0 %v3903_v49  ;;  %893 = vmatpush1.bf16.msra.mxu1 %v3906_v50  ;;  %v4941_v49 = vld [vmem:[#allocation17 + $0xcc] ss:$16 sps:$4 sm:$0xff]   ;;  %v6191_v50 = vmov 0.0|0.0  }
  0x7f   :  { %821 = vmatprep.subr.bf16.mxu0 %v3912_v51  ;;  %894 = vmatprep.subr.bf16.mxu1 %v3915_v52  ;;  %v4949_v51 = vld [vmem:[#allocation17 + $0xc0] ss:$16 sps:$4 sm:$0xff]   ;;  %v4951_v52 = vld [vmem:[#allocation17 + $0xc8] ss:$16 sps:$4 sm:$0xff]  }
  0x81   :  { %442 = vmatmul.mubr.bf16.gmra.mxu0 %v3909_v53  ;;  %515 = vmatmul.mubr.bf16.gmra.mxu1 %v3909_v53  ;;  %v4954_v53 = vsel %vm3746_vm1, 1, %v6199_v0 }
  0x82   :  { %822 = vmatpush1.bf16.msra.mxu0 %v3910_v54  ;;  %895 = vmatpush1.bf16.msra.mxu1 %v3913_v55  ;;  %v4958_v54 = vld [vmem:[#allocation17 + $0xa4] ss:$16 sps:$4 sm:$0xff]   ;;  %v4960_v55 = vld [vmem:[#allocation17 + $0xac] ss:$16 sps:$4 sm:$0xff]  }
  0x83   :  { %823 = vmatprep.subr.bf16.mxu0 %v3918_v56  ;;  %896 = vmatprep.subr.bf16.mxu1 %v3921_v57  ;;  %v4968_v56 = vld [vmem:[#allocation17 + $0xa0] ss:$16 sps:$4 sm:$0xff]   ;;  %v4970_v57 = vld [vmem:[#allocation17 + $0xa8] ss:$16 sps:$4 sm:$0xff]  }
  0x84   :  { %451 = vmatprep.mubr.bf16.mxu0 %v6199_v0  ;;  %524 = vmatprep.mubr.bf16.mxu1 %v6199_v0 }
  0x85   :  { %1632 = vperm.xlu0 %3833, %v4954_v53  }
  0x86   :  { %824 = vmatpush1.bf16.msra.mxu0 %v3916_v58  ;;  %897 = vmatpush1.bf16.msra.mxu1 %v3919_v59  ;;  %v4973_v58 = vsel %vm3758_vm2, 1, %v6199_v0  ;;  %v4977_v59 = vld [vmem:[#allocation17 + $0x84] ss:$16 sps:$4 sm:$0xff]  }
  0x87   :  { %825 = vmatprep.subr.bf16.mxu0 %v3925_v60  ;;  %898 = vmatprep.subr.bf16.mxu1 %v3928_v61  ;;  %v4979_v60 = vld [vmem:[#allocation17 + $0x8c] ss:$16 sps:$4 sm:$0xff]   ;;  %v4985_v61 = vld [vmem:[#allocation17 + $0x80] ss:$16 sps:$4 sm:$0xff]  }
  0x89   :  { %452 = vmatmul.mubr.bf16.gmra.mxu0 %v3922_v62  ;;  %525 = vmatmul.mubr.bf16.gmra.mxu1 %v3922_v62  ;;  %v4987_v62 = vld [vmem:[#allocation17 + $0x88] ss:$16 sps:$4 sm:$0xff]  }
  0x8a   :  { %826 = vmatpush1.bf16.msra.mxu0 %v3923_v63  ;;  %899 = vmatpush1.bf16.msra.mxu1 %v3926_v1  ;;  %6304 = vst [vmem:[#allocation45_spill] sm:$0xff] %v4987_v62  ;;  %v4990_v63 = vsel %vm3766_vm3, 1, %v6199_v0  ;;  %v4994_v1 = vld [vmem:[#allocation17 + $0x64] ss:$16 sps:$4 sm:$0xff]  }
  0x8b   :  { %827 = vmatprep.subr.bf16.mxu0 %v3931_v2  ;;  %900 = vmatprep.subr.bf16.mxu1 %v3934_v3  ;;  %6305 = vst [vmem:[#allocation46_spill] sm:$0xff] %v4994_v1  ;;  %v4996_v2 = vld [vmem:[#allocation17 + $0x6c] ss:$16 sps:$4 sm:$0xff]   ;;  %v5002_v3 = vld [vmem:[#allocation17 + $0x60] ss:$16 sps:$4 sm:$0xff]  }
  0x8c   :  { %845 = vmatprep.mubr.bf16.mxu0 %v6199_v0  ;;  %918 = vmatprep.mubr.bf16.mxu1 %v6199_v0  ;;  %6306 = vst [vmem:[#allocation47_spill] sm:$0xff] %v4996_v2  ;;  %6307 = vst [vmem:[#allocation48_spill] sm:$0xff] %v5002_v3 }
  0x8d   :  { %2028 = vperm.xlu0 %3833, %v4973_v58  }
  0x8e   :  { %828 = vmatpush1.bf16.msra.mxu0 %v3929_v4  ;;  %901 = vmatpush1.bf16.msra.mxu1 %v3932_v5  ;;  %v5004_v4 = vld [vmem:[#allocation17 + $0x68] ss:$16 sps:$4 sm:$0xff]   ;;  %v5007_v5 = vsel %vm3770_vm4, 1, %v6199_v0 }
  0x8f   :  { %1227 = vmatprep.subr.bf16.mxu0 %v4814_v6  ;;  %1268 = vmatprep.subr.bf16.mxu1 %v4816_v7  ;;  %6308 = vst [vmem:[#allocation49_spill] sm:$0xff] %v5004_v4 }
  0x91   :  { %846 = vmatmul.mubr.bf16.vlgmr.msra.gmra.mxu0 %v3935_v8  ;;  %919 = vmatmul.mubr.bf16.vlgmr.msra.gmra.mxu1 %v3935_v8  ;;  %v5011_v8 = vld [vmem:[#allocation17 + $0x44] ss:$16 sps:$4 sm:$0xff]  }
  0x92   :  { %1228 = vmatpush1.bf16.msra.mxu0 %v4820_v9  ;;  %1269 = vmatpush1.bf16.msra.mxu1 %v4822_v10  ;;  %6309 = vst [vmem:[#allocation50_spill] sm:$0xff] %v5011_v8 }
  0x93   :  { %1229 = vmatprep.subr.bf16.mxu0 %v4826_v11  ;;  %1270 = vmatprep.subr.bf16.mxu1 %v4828_v12 }
  0x94   :  { %855 = vmatprep.mubr.bf16.mxu0 %v6199_v0  ;;  %928 = vmatprep.mubr.bf16.mxu1 %v6199_v0 }
  0x95   :  { %2292 = vperm.xlu0 %3833, %v4990_v63  }
  0x96   :  { %1230 = vmatpush1.bf16.msra.mxu0 %v4830_v13  ;;  %1271 = vmatpush1.bf16.msra.mxu1 %v4834_v14 }
  0x97   :  { %1231 = vmatprep.subr.bf16.mxu0 %v4836_v15  ;;  %1272 = vmatprep.subr.bf16.mxu1 %v4840_v16 }
  0x99   :  { %856 = vmatmul.mubr.bf16.gmra.mxu0 %v3948_v17  ;;  %929 = vmatmul.mubr.bf16.gmra.mxu1 %v3948_v17  ;;  %v5013_v17 = vld [vmem:[#allocation17 + $0x4c] ss:$16 sps:$4 sm:$0xff]  }
  0x9a   :  { %1232 = vmatpush1.bf16.msra.mxu0 %v4844_v18  ;;  %1273 = vmatpush1.bf16.msra.mxu1 %v4846_v19  ;;  %6310 = vst [vmem:[#allocation51_spill] sm:$0xff] %v5013_v17 }
  0x9b   :  { %1233 = vmatprep.subr.bf16.mxu0 %v4850_v20  ;;  %1274 = vmatprep.subr.bf16.mxu1 %v4854_v21 }
  0x9c   :  { %865 = vmatprep.mubr.bf16.mxu0 %v6199_v0  ;;  %938 = vmatprep.mubr.bf16.mxu1 %v6199_v0 }
  0x9d   :  { %2555 = vperm.xlu0 %3833, %v5007_v5  }
  0x9e   :  { %1234 = vmatpush1.bf16.msra.mxu0 %v4856_v22  ;;  %1275 = vmatpush1.bf16.msra.mxu1 %v4860_v23 }
  0x9f   :  { %1235 = vmatprep.subr.bf16.mxu0 %v4862_v24  ;;  %1276 = vmatprep.subr.bf16.mxu1 %v4866_v25 }
  0xa1   :  { %866 = vmatmul.mubr.bf16.gmra.mxu0 %v3961_v26  ;;  %939 = vmatmul.mubr.bf16.gmra.mxu1 %v3961_v26  ;;  %v5019_v26 = vld [vmem:[#allocation17 + $0x40] ss:$16 sps:$4 sm:$0xff]  }
  0xa2   :  { %1236 = vmatpush1.bf16.msra.mxu0 %v4870_v27  ;;  %1277 = vmatpush1.bf16.msra.mxu1 %v4872_v28  ;;  %6311 = vst [vmem:[#allocation52_spill] sm:$0xff] %v5019_v26 }
  0xa3   :  { %1237 = vmatprep.subr.bf16.mxu0 %v4876_v29  ;;  %1278 = vmatprep.subr.bf16.mxu1 %v4880_v30 }
  0xa4   :  { %875 = vmatprep.mubr.bf16.mxu0 %v6199_v0  ;;  %948 = vmatprep.mubr.bf16.mxu1 %v6199_v0 }
  0xa6   :  { %1238 = vmatpush1.bf16.msra.mxu0 %v4882_v31  ;;  %1279 = vmatpush1.bf16.msra.mxu1 %v4886_v32 }
  0xa7   :  { %1239 = vmatprep.subr.bf16.mxu0 %v4888_v33  ;;  %1280 = vmatprep.subr.bf16.mxu1 %v4892_v34 }
  0xa9   :  { %876 = vmatmul.mubr.bf16.gmra.mxu0 %v3974_v35  ;;  %949 = vmatmul.mubr.bf16.gmra.mxu1 %v3974_v35  ;;  %v5021_v35 = vld [vmem:[#allocation17 + $0x48] ss:$16 sps:$4 sm:$0xff]  }
  0xaa   :  { %1240 = vmatpush1.bf16.msra.mxu0 %v4896_v36  ;;  %1281 = vmatpush1.bf16.msra.mxu1 %v4898_v37  ;;  %6312 = vst [vmem:[#allocation53_spill] sm:$0xff] %v5021_v35 }
  0xab   :  { %1241 = vmatprep.subr.bf16.mxu0 %v4902_v38  ;;  %1282 = vmatprep.subr.bf16.mxu1 %v4906_v39 }
  0xac   :  { %1259 = vmatprep.mubr.bf16.mxu0 %v6199_v0  ;;  %1300 = vmatprep.mubr.bf16.mxu1 %v6199_v0 }
  0xae   :  { %1242 = vmatpush1.bf16.msra.mxu0 %v4910_v40  ;;  %1283 = vmatpush1.bf16.msra.mxu1 %v4912_v41 }
  0xaf   :  { %1518 = vmatprep.subr.bf16.mxu0 %v4916_v42  ;;  %1559 = vmatprep.subr.bf16.mxu1 %v4918_v43 }
  0xb1   :  { %1260 = vmatmul.mubr.bf16.vlgmr.msra.gmra.mxu0 %v6191_v50  ;;  %1301 = vmatmul.mubr.bf16.vlgmr.msra.gmra.mxu1 %v6191_v50  ;;  %v5024_v50 = vsel %vm3762_vm5, 1, %v6199_v0 }
  0xb2   :  { %1519 = vmatpush1.bf16.msra.mxu0 %v4933_v46  ;;  %1560 = vmatpush1.bf16.msra.mxu1 %v4935_v47 }
  0xb3   :  { %1520 = vmatprep.subr.bf16.mxu0 %v4939_v48  ;;  %1561 = vmatprep.subr.bf16.mxu1 %v4941_v49 }
  0xb4   :  { %1550 = vmatprep.mubr.bf16.mxu0 %v6199_v0  ;;  %1591 = vmatprep.mubr.bf16.mxu1 %v6199_v0  ;;  %v5038_v0 = vld [vmem:[#allocation17 + $0x28] ss:$16 sps:$4 sm:$0xff]  }
  0xb5   :  { %2817 = vperm.xlu0 %3833, %v5024_v50  }
  0xb6   :  { %1521 = vmatpush1.bf16.msra.mxu0 %v4949_v51  ;;  %1562 = vmatpush1.bf16.msra.mxu1 %v4951_v52 }
  0xb7   :  { %1522 = vmatprep.subr.bf16.mxu0 %v4958_v54  ;;  %1563 = vmatprep.subr.bf16.mxu1 %v4960_v55 }
  0xba   :  { %1523 = vmatpush1.bf16.msra.mxu0 %v4968_v56  ;;  %1564 = vmatpush1.bf16.msra.mxu1 %v4970_v57 }
  0xbb   :  { %1524 = vmatprep.subr.bf16.mxu0 %v4977_v59  ;;  %1565 = vmatprep.subr.bf16.mxu1 %v4979_v60 }
  0xbe   :  { %1525 = vmatpush1.bf16.msra.mxu0 %v4985_v61  ;;  %1566 = vmatpush1.bf16.msra.mxu1 %v4987_v62  ;;  %v5047_v62 = vld [vmem:[#allocation17 + $0xc] ss:$16 sps:$4 sm:$0xff]  }
  0xbf   :  { %1526 = vmatprep.subr.bf16.mxu0 %v4994_v1  ;;  %1567 = vmatprep.subr.bf16.mxu1 %v4996_v2  ;;  %v5028_v2 = vld [vmem:[#allocation17 + $0x24] ss:$16 sps:$4 sm:$0xff]   ;;  %v5030_v1 = vld [vmem:[#allocation17 + $0x2c] ss:$16 sps:$4 sm:$0xff]  }
  0xc2   :  { %1527 = vmatpush1.bf16.msra.mxu0 %v5002_v3  ;;  %1568 = vmatpush1.bf16.msra.mxu1 %v5004_v4  ;;  %v5036_v4 = vld [vmem:[#allocation17 + $0x20] ss:$16 sps:$4 sm:$0xff]   ;;  %v6314_v3 = vmov 0  }
  0xc3   :  { %1528 = vmatprep.subr.bf16.mxu0 %v5011_v8  ;;  %1569 = vmatprep.subr.bf16.mxu1 %v5013_v17  ;;  %6313 = vst [vmem:[#allocation54_spill] sm:$0xff] %v5036_v4  ;;  %v5041_v8 = vsel %vm3754_vm6, 1, %v6314_v3  ;;  %v5045_v17 = vld [vmem:[#allocation17 + $0x4] ss:$16 sps:$4 sm:$0xff]  }
  0xc4   :  { %3079 = vperm.xlu0 %3833, %v5041_v8  }
  0xc6   :  { %1529 = vmatpush1.bf16.msra.mxu0 %v5019_v26  ;;  %1570 = vmatpush1.bf16.msra.mxu1 %v5021_v35  ;;  %v5052_v35 = vld [vmem:[#allocation17] ss:$16 sps:$4 sm:$0xff]   ;;  %v5054_v26 = vld [vmem:[#allocation17 + $0x8] ss:$16 sps:$4 sm:$0xff]  }
  0xc7   :  { %1530 = vmatprep.subr.bf16.mxu0 %v5028_v2  ;;  %1571 = vmatprep.subr.bf16.mxu1 %v5030_v1 }
  0xc8   :  { %3472 = vperm.xlu0 %3833, %v4929_v45  }
  0xca   :  { %1531 = vmatpush1.bf16.msra.mxu0 %v5036_v4  ;;  %1572 = vmatpush1.bf16.msra.mxu1 %v5038_v0  ;;  %v6315_v4 = vmov 0.0|0.0  }
  0xcb   :  { %1532 = vmatprep.subr.bf16.mxu0 %v5045_v17  ;;  %1573 = vmatprep.subr.bf16.mxu1 %v5047_v62 }
  0xce   :  { %1533 = vmatpush1.bf16.msra.mxu0 %v5052_v35  ;;  %1574 = vmatpush1.bf16.msra.mxu1 %v5054_v26 }
  0xcf   :  { %1650 = vmatprep.subr.bf16.mxu0 %v4814_v6  ;;  %1691 = vmatprep.subr.bf16.mxu1 %v4816_v7  ;;  %v185_v6 = vlaneseq }
  0xd1   :  { %1551 = vmatmul.mubr.bf16.vlgmr.msra.gmra.mxu0 %v6315_v4  ;;  %1592 = vmatmul.mubr.bf16.vlgmr.msra.gmra.mxu1 %v6315_v4  ;;  %v5099_v7 = vshrl.u32 %v185_v6, 7 }
  0xd2   :  { %1651 = vmatpush1.bf16.msra.mxu0 %v4820_v9  ;;  %1692 = vmatpush1.bf16.msra.mxu1 %v4822_v10 }
  0xd3   :  { %1652 = vmatprep.subr.bf16.mxu0 %v4826_v11  ;;  %1693 = vmatprep.subr.bf16.mxu1 %v4828_v12  ;;  %v6215_v9 = vsub.s32 2, %v5099_v7  ;;  %v6220_v10 = vsub.s32 0, %v5099_v7  ;;  %v6221_v11 = vsub.s32 3, %v5099_v7  ;;  %v183_v12 = vld [vmem:[%s6182_s6] sm:$0xf] }
  0xd4   :  { %1682 = vmatprep.mubr.bf16.mxu0 %v6314_v3  ;;  %1723 = vmatprep.mubr.bf16.mxu1 %v6314_v3 }
  0xd5   :  { %v5126_v45 = vrot.slane %v183_v12, %v6221_v11 }
  0xd6   :  { %1653 = vmatpush1.bf16.msra.mxu0 %v4830_v13  ;;  %1694 = vmatpush1.bf16.msra.mxu1 %v4834_v14 }
  0xd7   :  { %1654 = vmatprep.subr.bf16.mxu0 %v4836_v15  ;;  %1695 = vmatprep.subr.bf16.mxu1 %v4840_v16  ;;  %v5113_v15 = vrot.slane %v183_v12, %v6215_v9  ;;  %v6225_v16 = vsub.s32 1, %v5099_v7 }
  0xd9   :  { %v5130_v9 = vrot.slane %v183_v12, %v6225_v16 }
  0xda   :  { %1655 = vmatpush1.bf16.msra.mxu0 %v4844_v18  ;;  %1696 = vmatpush1.bf16.msra.mxu1 %v4846_v19 }
  0xdb   :  { %1656 = vmatprep.subr.bf16.mxu0 %v4850_v20  ;;  %1697 = vmatprep.subr.bf16.mxu1 %v4854_v21  ;;  %v5122_v20 = vrot.slane %v183_v12, %v6220_v10 }
  0xde   :  { %1657 = vmatpush1.bf16.msra.mxu0 %v4856_v22  ;;  %1698 = vmatpush1.bf16.msra.mxu1 %v4860_v23 }
  0xdf   :  { %1658 = vmatprep.subr.bf16.mxu0 %v4862_v24  ;;  %1699 = vmatprep.subr.bf16.mxu1 %v4866_v25 }
  0xe2   :  { %1659 = vmatpush1.bf16.msra.mxu0 %v4870_v27  ;;  %1700 = vmatpush1.bf16.msra.mxu1 %v4872_v28 }
  0xe3   :  { %1660 = vmatprep.subr.bf16.mxu0 %v4876_v29  ;;  %1701 = vmatprep.subr.bf16.mxu1 %v4880_v30 }
  0xe6   :  { %1661 = vmatpush1.bf16.msra.mxu0 %v4882_v31  ;;  %1702 = vmatpush1.bf16.msra.mxu1 %v4886_v32 }
  0xe7   :  { %1662 = vmatprep.subr.bf16.mxu0 %v4888_v33  ;;  %1703 = vmatprep.subr.bf16.mxu1 %v4892_v34 }
  0xea   :  { %1663 = vmatpush1.bf16.msra.mxu0 %v4896_v36  ;;  %1704 = vmatpush1.bf16.msra.mxu1 %v4898_v37 }
  0xeb   :  { %1664 = vmatprep.subr.bf16.mxu0 %v4902_v38  ;;  %1705 = vmatprep.subr.bf16.mxu1 %v4906_v39 }
  0xee   :  { %1665 = vmatpush1.bf16.msra.mxu0 %v4910_v40  ;;  %1706 = vmatpush1.bf16.msra.mxu1 %v4912_v41 }
  0xef   :  { %1782 = vmatprep.subr.bf16.mxu0 %v4916_v42  ;;  %1823 = vmatprep.subr.bf16.mxu1 %v4918_v43 }
 0x131   :  { %v5107_v13 = vpop.f32.mrf.mxu0  ;;  %v5109_v14 = vpop.f32.mrf.mxu1 }
 0x133   :  { %v5116_v18 = vpop.f32.mrf.mxu0  ;;  %v5118_v19 = vpop.f32.mrf.mxu1 }
 0x135   :  { %v427_v4 = vpop.f32.mrf.mxu0  ;;  %v500_v6 = vpop.f32.mrf.mxu1 }
 0x136   :  { %v5133_v43 = vadd.f32 %v427_v4, %v5122_v20  ;;  %v5136_v42 = vadd.f32 %v500_v6, %v5113_v15 }
 0x137   :  { %v429_v41 = vpop.f32.mrf.mxu0  ;;  %v502_v40 = vpop.f32.mrf.mxu1 }
 0x138   :  { %6316 = vst [vmem:[#allocation55_spill] sm:$0xff] %v5133_v43  ;;  %6317 = vst [vmem:[#allocation56_spill] sm:$0xff] %v5136_v42  ;;  %v5139_v10 = vadd.f32 %v429_v41, %v5130_v9  ;;  %v5142_v11 = vadd.f32 %v502_v40, %v5126_v45 }
 0x139   :  { %v433_v39 = vpop.f32.mrf.mxu0  ;;  %v506_v38 = vpop.f32.mrf.mxu1 }
 0x13a   :  { %6318 = vst [vmem:[#allocation57_spill] sm:$0xff] %v5139_v10  ;;  %6319 = vst [vmem:[#allocation58_spill] sm:$0xff] %v5142_v11  ;;  %v5145_v37 = vadd.f32 %v433_v39, %v5122_v20  ;;  %v5148_v12 = vadd.f32 %v506_v38, %v5113_v15 }
 0x13b   :  { %v435_v4 = vpop.f32.mrf.mxu0  ;;  %v508_v16 = vpop.f32.mrf.mxu1 }
 0x13c   :  { %6320 = vst [vmem:[#allocation59_spill] sm:$0xff] %v5145_v37  ;;  %6321 = vst [vmem:[#allocation60_spill] sm:$0xff] %v5148_v12  ;;  %v5151_v6 = vadd.f32 %v435_v4, %v5130_v9  ;;  %v5154_v42 = vadd.f32 %v508_v16, %v5126_v45 }
 0x13d   :  { %v437_v41 = vpop.f32.mrf.mxu0  ;;  %v510_v10 = vpop.f32.mrf.mxu1 }
 0x13e   :  { %6322 = vst [vmem:[#allocation61_spill] sm:$0xff] %v5151_v6  ;;  %6323 = vst [vmem:[#allocation62_spill] sm:$0xff] %v5154_v42  ;;  %v5157_v40 = vadd.f32 %v437_v41, %v5122_v20  ;;  %v5160_v11 = vadd.f32 %v510_v10, %v5113_v15 }
 0x13f   :  { %v439_v39 = vpop.f32.mrf.mxu0  ;;  %v512_v37 = vpop.f32.mrf.mxu1 }
 0x140   :  { %6324 = vst [vmem:[#allocation63_spill] sm:$0xff] %v5157_v40  ;;  %6325 = vst [vmem:[#allocation64_spill] sm:$0xff] %v5160_v11  ;;  %v5163_v38 = vadd.f32 %v439_v39, %v5130_v9  ;;  %v5166_v12 = vadd.f32 %v512_v37, %v5126_v45 }
 0x141   :  { %v443_v4 = vpop.f32.mrf.mxu0  ;;  %v516_v6 = vpop.f32.mrf.mxu1 }
 0x142   :  { %6326 = vst [vmem:[#allocation65_spill] sm:$0xff] %v5163_v38  ;;  %6327 = vst [vmem:[#allocation66_spill] sm:$0xff] %v5166_v12  ;;  %v5169_v16 = vadd.f32 %v443_v4, %v5122_v20  ;;  %v5172_v42 = vadd.f32 %v516_v6, %v5113_v15 }
 0x143   :  { %v445_v41 = vpop.f32.mrf.mxu0  ;;  %v518_v40 = vpop.f32.mrf.mxu1 }
 0x144   :  { %6328 = vst [vmem:[#allocation67_spill] sm:$0xff] %v5169_v16  ;;  %6329 = vst [vmem:[#allocation68_spill] sm:$0xff] %v5172_v42  ;;  %v5175_v10 = vadd.f32 %v445_v41, %v5130_v9  ;;  %v5178_v11 = vadd.f32 %v518_v40, %v5126_v45 }
 0x145   :  { %v447_v39 = vpop.f32.mrf.mxu0  ;;  %v520_v38 = vpop.f32.mrf.mxu1 }
 0x146   :  { %6330 = vst [vmem:[#allocation69_spill] sm:$0xff] %v5175_v10  ;;  %6331 = vst [vmem:[#allocation70_spill] sm:$0xff] %v5178_v11  ;;  %v5181_v37 = vadd.f32 %v447_v39, %v5122_v20  ;;  %v5184_v12 = vadd.f32 %v520_v38, %v5113_v15  ;;  %v607_v38 = vld [vmem:[%s6183_s7] sm:$0xf]  ;;  %s4687_s7 = smov [#allocation19]  }
 0x147   :  { %v449_v4 = vpop.f32.mrf.mxu0  ;;  %v522_v16 = vpop.f32.mrf.mxu1  ;;  %s3496_s30 = sshll.u32 %s4687_s7, 4  ;;  %s3497_s30 = int_to_ptr.vmem [resolvable:$true] %s3496_s30 }
 0x148   :  { %6332 = vst [vmem:[#allocation71_spill] sm:$0xff] %v5181_v37  ;;  %6333 = vst [vmem:[#allocation72_spill] sm:$0xff] %v5184_v12  ;;  %v5187_v6 = vadd.f32 %v449_v4, %v5130_v9  ;;  %v5190_v42 = vadd.f32 %v522_v16, %v5126_v45  ;;  %s4539_s15 = scalar_lea.vmem %s3497_s30, 512  ;;  %p4544_p3 = scmp.lt.s32.totalorder %s3497_s30, %s3497_s30 }
 0x149   :  { %v453_v41 = vpop.f32.mrf.mxu0  ;;  %v526_v10 = vpop.f32.mrf.mxu1  ;;  %p4540_p2 = scmp.ne.s32.totalorder %s3497_s30, %s4539_s15  ;;  %p4545_p4 = scmp.lt.s32.totalorder %s4539_s15, %s4539_s15 }
 0x14a   :  { %6334 = vst [vmem:[#allocation73_spill] sm:$0xff] %v5187_v6  ;;  %6335 = vst [vmem:[#allocation74_spill] sm:$0xff] %v5190_v42  ;;  %v5193_v40 = vadd.f32 %v453_v41, %v5122_v20  ;;  %v5196_v11 = vadd.f32 %v526_v10, %v5113_v15  ;;  %v6342_v42 = vsub.s32 0, %v5099_v7 }
 0x14b   :  { %v455_v39 = vpop.f32.mrf.mxu0  ;;  %v528_v37 = vpop.f32.mrf.mxu1  ;;  %p4546_p5 = por %p4545_p4, %p4544_p3 }
 0x14c   :  { %6336 = vst [vmem:[#allocation75_spill] sm:$0xff] %v5193_v40  ;;  %6337 = vst [vmem:[#allocation76_spill] sm:$0xff] %v5196_v11  ;;  %v5202_v4 = vadd.f32 %v455_v39, %v5130_v9  ;;  %v5205_v16 = vadd.f32 %v528_v37, %v5126_v45  ;;  %v1762_v40 = vsel %vm3750_vm7, 1, %v6314_v3  ;;  %v5217_v6 = vrot.slane %v607_v38, %v6342_v42 }
 0x14d   :  { %v457_v12 = vpop.f32.mrf.mxu0  ;;  %v530_v41 = vpop.f32.mrf.mxu1  ;;  %v6343_v39 = vsub.s32 2, %v5099_v7  ;;  %1764 = vperm.xlu1 %3834, %v1762_v40   ;;  %v6347_v42 = vsub.s32 3, %v5099_v7  ;;  %p4547_p6 = pnand %p4546_p5, %p4540_p2 }
 0x14e   :  { %6338 = vst [vmem:[#allocation77_spill] sm:$0xff] %v5202_v4  ;;  %6339 = vst [vmem:[#allocation78_spill] sm:$0xff] %v5205_v16  ;;  %v5210_v10 = vadd.f32 %v457_v12, %v5122_v20  ;;  %v5213_v11 = vadd.f32 %v530_v41, %v5113_v15  ;;  %v6346_v41 = vsub.s32 1, %v5099_v7 }
 0x14f   :  { %v5221_v37 = vrot.slane %v607_v38, %v6343_v39  ;;  %v459_v44 = vpop.f32.mrf.mxu0  ;;  %v532_v16 = vpop.f32.mrf.mxu1 }
 0x150   :  { %6340 = vst [vmem:[#allocation79_spill] sm:$0xff] %v5210_v10  ;;  %6341 = vst [vmem:[#allocation80_spill] sm:$0xff] %v5213_v11  ;;  %v5224_v4 = vadd.f32 %v459_v44, %v5130_v9  ;;  %v5227_v12 = vadd.f32 %v532_v16, %v5126_v45  ;;  %v5231_v11 = vrot.slane %v607_v38, %v6346_v41 }
 0x151   :  { %v5235_v10 = vrot.slane %v607_v38, %v6347_v42  ;;  %v847_v43 = vpop.f32.mrf.mxu0  ;;  %v920_v39 = vpop.f32.mrf.mxu1  ;;  %1896 = vperm.xlu1 %3834, %v5041_v8  }
 0x152   :  { %6344 = vst [vmem:[#allocation81_spill] sm:$0xff] %v5224_v4  ;;  %6345 = vst [vmem:[#allocation82_spill] sm:$0xff] %v5227_v12  ;;  %v5238_v36 = vadd.f32 %v847_v43, %v5217_v6  ;;  %v5241_v34 = vadd.f32 %v920_v39, %v5221_v37 }
 0x153   :  { %v849_v16 = vpop.f32.mrf.mxu0  ;;  %v922_v44 = vpop.f32.mrf.mxu1 }
 0x154   :  { %6348 = vst [vmem:[#allocation83_spill] sm:$0xff] %v5238_v36  ;;  %6349 = vst [vmem:[#allocation84_spill] sm:$0xff] %v5241_v34  ;;  %v5245_v12 = vadd.f32 %v849_v16, %v5231_v11  ;;  %v5248_v41 = vadd.f32 %v922_v44, %v5235_v10 }
 0x155   :  { %v851_v7 = vpop.f32.mrf.mxu0  ;;  %v924_v38 = vpop.f32.mrf.mxu1  ;;  %2160 = vperm.xlu1 %3834, %v5024_v50  }
 0x156   :  { %6350 = vst [vmem:[#allocation85_spill] sm:$0xff] %v5245_v12  ;;  %6351 = vst [vmem:[#allocation86_spill] sm:$0xff] %v5248_v41  ;;  %v5251_v42 = vadd.f32 %v851_v7, %v5217_v6  ;;  %v5254_v43 = vadd.f32 %v924_v38, %v5221_v37 }
 0x157   :  { %v853_v39 = vpop.f32.mrf.mxu0  ;;  %v926_v8 = vpop.f32.mrf.mxu1 }
 0x158   :  { %6352 = vst [vmem:[#allocation87_spill] sm:$0xff] %v5251_v42  ;;  %6353 = vst [vmem:[#allocation88_spill] sm:$0xff] %v5254_v43  ;;  %v5258_v34 = vadd.f32 %v853_v39, %v5231_v11  ;;  %v5261_v16 = vadd.f32 %v926_v8, %v5235_v10 }
 0x159   :  { %v857_v44 = vpop.f32.mrf.mxu0  ;;  %v930_v41 = vpop.f32.mrf.mxu1  ;;  %2424 = vperm.xlu1 %3834, %v5007_v5  }
 0x15a   :  { %6354 = vst [vmem:[#allocation89_spill] sm:$0xff] %v5258_v34  ;;  %6355 = vst [vmem:[#allocation90_spill] sm:$0xff] %v5261_v16  ;;  %v5264_v12 = vadd.f32 %v857_v44, %v5217_v6  ;;  %v5267_v7 = vadd.f32 %v930_v41, %v5221_v37 }
 0x15b   :  { %v859_v38 = vpop.f32.mrf.mxu0  ;;  %v932_v50 = vpop.f32.mrf.mxu1 }
 0x15c   :  { %6356 = vst [vmem:[#allocation91_spill] sm:$0xff] %v5264_v12  ;;  %6357 = vst [vmem:[#allocation92_spill] sm:$0xff] %v5267_v7  ;;  %v5271_v36 = vadd.f32 %v859_v38, %v5231_v11  ;;  %v5274_v39 = vadd.f32 %v932_v50, %v5235_v10 }
 0x15d   :  { %v861_v8 = vpop.f32.mrf.mxu0  ;;  %v934_v4 = vpop.f32.mrf.mxu1  ;;  %2686 = vperm.xlu1 %3834, %v4990_v63  }
 0x15e   :  { %6358 = vst [vmem:[#allocation93_spill] sm:$0xff] %v5271_v36  ;;  %6359 = vst [vmem:[#allocation94_spill] sm:$0xff] %v5274_v39  ;;  %v5277_v43 = vadd.f32 %v861_v8, %v5217_v6  ;;  %v5280_v44 = vadd.f32 %v934_v4, %v5221_v37 }
 0x15f   :  { %v863_v41 = vpop.f32.mrf.mxu0  ;;  %v936_v5 = vpop.f32.mrf.mxu1 }
 0x160   :  { %6360 = vst [vmem:[#allocation95_spill] sm:$0xff] %v5277_v43  ;;  %6361 = vst [vmem:[#allocation96_spill] sm:$0xff] %v5280_v44  ;;  %v5284_v16 = vadd.f32 %v863_v41, %v5231_v11  ;;  %v5287_v38 = vadd.f32 %v936_v5, %v5235_v10 }
 0x161   :  { %v867_v50 = vpop.f32.mrf.mxu0  ;;  %v940_v34 = vpop.f32.mrf.mxu1  ;;  %2948 = vperm.xlu1 %3834, %v4973_v58  }
 0x162   :  { %6362 = vst [vmem:[#allocation97_spill] sm:$0xff] %v5284_v16  ;;  %6363 = vst [vmem:[#allocation98_spill] sm:$0xff] %v5287_v38  ;;  %v5290_v42 = vadd.f32 %v867_v50, %v5217_v6  ;;  %v5293_v8 = vadd.f32 %v940_v34, %v5221_v37 }
 0x163   :  { %v869_v4 = vpop.f32.mrf.mxu0  ;;  %v942_v63 = vpop.f32.mrf.mxu1 }
 0x164   :  { %6364 = vst [vmem:[#allocation99_spill] sm:$0xff] %v5290_v42  ;;  %6365 = vst [vmem:[#allocation100_spill] sm:$0xff] %v5293_v8  ;;  %v5297_v7 = vadd.f32 %v869_v4, %v5231_v11  ;;  %v5300_v41 = vadd.f32 %v942_v63, %v5235_v10 }
 0x165   :  { %v871_v5 = vpop.f32.mrf.mxu0  ;;  %v944_v39 = vpop.f32.mrf.mxu1  ;;  %3210 = vperm.xlu1 %3834, %v1762_v40  }
 0x166   :  { %6366 = vst [vmem:[#allocation101_spill] sm:$0xff] %v5297_v7  ;;  %6367 = vst [vmem:[#allocation102_spill] sm:$0xff] %v5300_v41  ;;  %v5303_v36 = vadd.f32 %v871_v5, %v5217_v6  ;;  %v5306_v50 = vadd.f32 %v944_v39, %v5221_v37 }
 0x167   :  { %v873_v34 = vpop.f32.mrf.mxu0  ;;  %v946_v12 = vpop.f32.mrf.mxu1 }
 0x168   :  { %6368 = vst [vmem:[#allocation103_spill] sm:$0xff] %v5303_v36  ;;  %6369 = vst [vmem:[#allocation104_spill] sm:$0xff] %v5306_v50  ;;  %v5309_v58 = vadd.f32 %v873_v34, %v5231_v11  ;;  %v5312_v4 = vadd.f32 %v946_v12, %v5235_v10 }
 0x169   :  { %v877_v44 = vpop.f32.mrf.mxu0  ;;  %v950_v63 = vpop.f32.mrf.mxu1  ;;  %3341 = vperm.xlu1 %3834, %v4954_v53   ;;  %v426_v53 = vadd.f32 %v5116_v18, %v5130_v9 }
 0x16a   :  { %6370 = vst [vmem:[#allocation105_spill] sm:$0xff] %v5309_v58  ;;  %6371 = vst [vmem:[#allocation106_spill] sm:$0xff] %v5312_v4  ;;  %v5315_v38 = vadd.f32 %v877_v44, %v5217_v6  ;;  %v5318_v5 = vadd.f32 %v950_v63, %v5221_v37  ;;  %v424_v44 = vadd.f32 %v5107_v13, %v5122_v20 }
 0x16b   :  { %v879_v39 = vpop.f32.mrf.mxu0  ;;  %v952_v40 = vpop.f32.mrf.mxu1  ;;  %v499_v13 = vadd.f32 %v5118_v19, %v5126_v45 }
 0x16c   :  { %6372 = vst [vmem:[#allocation107_spill] sm:$0xff] %v5315_v38  ;;  %6373 = vst [vmem:[#allocation108_spill] sm:$0xff] %v5318_v5  ;;  %v5322_v16 = vadd.f32 %v879_v39, %v5231_v11  ;;  %v5325_v34 = vadd.f32 %v952_v40, %v5235_v10  ;;  %v497_v38 = vadd.f32 %v5109_v14, %v5113_v15 }
 0x16d   :  { %v881_v12 = vpop.f32.mrf.mxu0  ;;  %v954_v43 = vpop.f32.mrf.mxu1 }
 0x16e   :  { %6374 = vst [vmem:[#allocation109_spill] sm:$0xff] %v5322_v16  ;;  %6375 = vst [vmem:[#allocation110_spill] sm:$0xff] %v5325_v34 }
 0x16f   :  { %v883_v8 = vpop.f32.mrf.mxu0  ;;  %v956_v41 = vpop.f32.mrf.mxu1 }
 0x170   :  { %v884_v45 = vadd.f32 %v883_v8, %v5231_v11  ;;  %v957_v11 = vadd.f32 %v956_v41, %v5235_v10 }
 0x171   :  { %v1261_v7 = vpop.f32.mrf.mxu0  ;;  %v1302_v63 = vpop.f32.mrf.mxu1 }
 0x172   :  { %v1309_v42 = vadd.f32 %v1261_v7, %v424_v44  ;;  %v1311_v9 = vadd.f32 %v1302_v63, %v497_v38 }
 0x173   :  { %v1263_v50 = vpop.f32.mrf.mxu0  ;;  %v1304_v4 = vpop.f32.mrf.mxu1 }
 0x174   :  { %v3707_v39 = vmul.f32 -1.442695, %v1309_v42  ;;  %v1310_v58 = vadd.f32 %v1263_v50, %v426_v53  ;;  %v1312_v20 = vadd.f32 %v1304_v4, %v499_v13 }
 0x175   :  { %v1265_v36 = vpop.f32.mrf.mxu0  ;;  %v1306_v40 = vpop.f32.mrf.mxu1 }
 0x176   :  { %4035 = vpow2.f32 %v3707_v39  ;;  %v3708_v5 = vmul.f32 -1.442695, %v1310_v58  ;;  %v3709_v18 = vmul.f32 -1.442695, %v1312_v20 }
 0x177   :  { %v1266_v34 = vpop.f32.mrf.mxu0  ;;  %v1307_v16 = vpop.f32.mrf.mxu1 }
 0x178   :  { %4037 = vpow2.f32 %v3708_v5  ;;  %v882_v16 = vadd.f32 %v881_v12, %v5217_v6 }
 0x179   :  { %4039 = vtanh.f32 %v1311_v9 }
 0x17a   :  { %4041 = vpow2.f32 %v3709_v18 }
 0x183   :  { %v4036_v7 = vpop.eup %4035 }
 0x184   :  { %v1316_v44 = vadd.f32 1.0, %v4036_v7 }
 0x185   :  { %v4038_v42 = vpop.eup %4037 }
 0x186   :  { %4043 = vrcp.f32 %v1316_v44  ;;  %v1322_v36 = vadd.f32 1.0, %v4038_v42  ;;  %v4040_v50 = vpop.eup %4039  ;;  %v955_v44 = vadd.f32 %v954_v43, %v5221_v37 }
 0x187   :  { %v4042_v19 = vpop.eup %4041 }
 0x188   :  { %4045 = vrcp.f32 %v1322_v36  ;;  %v1329_v40 = vadd.f32 1.0, %v4042_v19 }
 0x191   :  { %v1552_v58 = vpop.f32.mrf.mxu0  ;;  %v1593_v5 = vpop.f32.mrf.mxu1 }
 0x192   :  { %v1600_v4 = vadd.f32 %v1552_v58, %v882_v16  ;;  %v1602_v16 = vadd.f32 %v1593_v5, %v955_v44 }
 0x193   :  { %v4044_v14 = vpop.eup %4043  ;;  %v1554_v15 = vpop.f32.mrf.mxu0 }
 0x194   :  { %v1595_v38 = vpop.f32.mrf.mxu1  ;;  %v1333_v34 = vmul.f32 %v4044_v14, %v4040_v50  ;;  %v3743_v63 = vmul.f32 -1.442695, %v1600_v4  ;;  %v1601_v53 = vadd.f32 %v1554_v15, %v884_v45  ;;  %v5342_v14 = vpop.permute.xlu0 %1341 }
 0x195   :  { %v4046_v39 = vpop.eup %4045  ;;  %v1556_v13 = vpop.f32.mrf.mxu0  ;;  %v1603_v8 = vadd.f32 %v1595_v38, %v957_v11  ;;  %vm1343_vm8 = vcmp.eq.s32.totalorder %v5342_v14, 1 }
 0x196   :  { %v1597_v20 = vpop.f32.mrf.mxu1  ;;  %v1332_v9 = vmul.f32 0.0, %v4046_v39  ;;  %4047 = vpow2.f32 %v3743_v63  ;;  %v3744_v6 = vmul.f32 -1.442695, %v1601_v53  ;;  %vm3803_vm9 = vmpackc.low %vm1343_vm8, %vm1343_vm8  ;;  %v6376_v63 = vld [vmem:[#allocation45_spill] sm:$0xff]  ;;  %v6377_v53 = vld [vmem:[#allocation46_spill] sm:$0xff] }
 0x197   :  { %v1557_v12 = vpop.f32.mrf.mxu0  ;;  %v3745_v42 = vmul.f32 -1.442695, %v1603_v8  ;;  %v6378_v39 = vld [vmem:[#allocation47_spill] sm:$0xff]  ;;  %v6380_v13 = vld [vmem:[#allocation49_spill] sm:$0xff]  ;;  %v6381_v20 = vld [vmem:[#allocation50_spill] sm:$0xff] }
 0x198   :  { %v1598_v18 = vpop.f32.mrf.mxu1  ;;  %v5337_v7 = vadd.f32 %v1333_v34, %v1332_v9  ;;  %4049 = vpow2.f32 %v3744_v6  ;;  %v6382_v9 = vld [vmem:[#allocation51_spill] sm:$0xff]  ;;  %v6383_v6 = vld [vmem:[#allocation52_spill] sm:$0xff]  ;;  %v6384_v12 = vld [vmem:[#allocation53_spill] sm:$0xff]  ;;  %v5387_v44 = vpop.permute.xlu0 %1632 }
 0x199   :  { %4051 = vrcp.f32 %v1329_v40  ;;  %v6379_v40 = vld [vmem:[#allocation48_spill] sm:$0xff]  ;;  %v6385_v18 = vld [vmem:[#allocation54_spill] sm:$0xff]  ;;  %vm1634_vm10 = vcmp.eq.s32.totalorder %v5387_v44, 1 }
 0x19a   :  { %4053 = vtanh.f32 %v5337_v7  ;;  %vm3809_vm11 = vmpackc.low %vm1634_vm10, %vm1634_vm10  ;;  %v5591_v44 = vld [vmem:[#allocation16 + $0x20] ss:$16 sps:$4 sm:$0xff]  }
 0x19b   :  { %4055 = vpow2.f32 %v3745_v42 }
 0x1a3   :  { %v4048_v36 = vpop.eup %4047 }
 0x1a4   :  { %v1607_v50 = vadd.f32 1.0, %v4048_v36 }
 0x1a5   :  { %v4050_v58 = vpop.eup %4049 }
 0x1a6   :  { %v4052_v19 = vpop.eup %4051  ;;  %4057 = vrcp.f32 %v1607_v50  ;;  %v1613_v45 = vadd.f32 1.0, %v4050_v58  ;;  %v5395_v50 = vld [vmem:[#allocation16 + $0xec] ss:$16 sps:$4 sm:$0xff]  }
 0x1a7   :  { %v4054_v4 = vpop.eup %4053  ;;  %4059 = vtanh.f32 %v1602_v16  ;;  %v5392_v16 = vld [vmem:[#allocation16 + $0xe4] ss:$16 sps:$4 sm:$0xff]  }
 0x1a8   :  { %v1336_v15 = vmul.f32 %v4054_v4, %v4052_v19  ;;  %4061 = vrcp.f32 %v1613_v45  ;;  %v4056_v41 = vpop.eup %4055  ;;  %v5407_v45 = vld [vmem:[#allocation16 + $0xe0] ss:$16 sps:$4 sm:$0xff]   ;;  %v5410_v4 = vld [vmem:[#allocation16 + $0xe8] ss:$16 sps:$4 sm:$0xff]  }
 0x1a9   :  { %v1620_v38 = vadd.f32 1.0, %v4056_v41  ;;  %v5424_v41 = vld [vmem:[#allocation16 + $0xc8] ss:$16 sps:$4 sm:$0xff]  }
 0x1aa   :  { %v3804_v10 = vpack.c.bf16 %v1336_v15, %v1336_v15  ;;  %v5350_v37 = vsel %vm1343_vm8, %v1336_v15, 0.0  ;;  %v5413_v15 = vld [vmem:[#allocation16 + $0xc4] ss:$16 sps:$4 sm:$0xff]  }
 0x1ab   :  { %v1347_v43 = vpack.c.bf16 %v5350_v37, %v5350_v37  ;;  %4063 = vrcp.f32 %v1620_v38  ;;  %v5436_v38 = vld [vmem:[#allocation16 + $0xa8] ss:$16 sps:$4 sm:$0xff]  }
 0x1ac   :  { %3805 = vmatmul.mubr.msk.bf16.vlgmr.msra.gmra.mxu0 %vm3803_vm9, %v3804_v10  ;;  %3808 = vmatmul.mubr.msk.bf16.vlgmr.msra.gmra.mxu1 %vm3803_vm9, %v3804_v10  ;;  %v5416_v10 = vld [vmem:[#allocation16 + $0xcc] ss:$16 sps:$4 sm:$0xff]   ;;  %6388 = vst [vmem:[#allocation47_spill] sm:$0xff] %v5436_v38 }
 0x1ad   :  { %1348 = vst [vmem:[#allocation19] sm:$0xf] %v1347_v43  ;;  %1783 = vmatpush1.bf16.msra.mxu0 %v4933_v46  ;;  %1824 = vmatpush1.bf16.msra.mxu1 %v4935_v47  ;;  %v5421_v43 = vld [vmem:[#allocation16 + $0xc0] ss:$16 sps:$4 sm:$0xff]  }
 0x1ae   :  { %1784 = vmatprep.subr.bf16.mxu0 %v4939_v48  ;;  %1825 = vmatprep.subr.bf16.mxu1 %v4941_v49 }
 0x1af   :  { %1814 = vmatprep.mubr.bf16.mxu0 %v6314_v3  ;;  %1855 = vmatprep.mubr.bf16.mxu1 %v6314_v3 }
 0x1b1   :  { %1785 = vmatpush1.bf16.msra.mxu0 %v4949_v51  ;;  %1826 = vmatpush1.bf16.msra.mxu1 %v4951_v52 }
 0x1b2   :  { %1786 = vmatprep.subr.bf16.mxu0 %v4958_v54  ;;  %1827 = vmatprep.subr.bf16.mxu1 %v4960_v55 }
 0x1b3   :  { %v4058_v46 = vpop.eup %4057 }
 0x1b4   :  { %v4060_v5 = vpop.eup %4059 }
 0x1b5   :  { %v4062_v47 = vpop.eup %4061  ;;  %1787 = vmatpush1.bf16.msra.mxu0 %v4968_v56  ;;  %1828 = vmatpush1.bf16.msra.mxu1 %v4970_v57  ;;  %v1624_v49 = vmul.f32 %v4060_v5, %v4058_v46  ;;  %v5427_v46 = vld [vmem:[#allocation16 + $0xa4] ss:$16 sps:$4 sm:$0xff]   ;;  %v5430_v5 = vld [vmem:[#allocation16 + $0xac] ss:$16 sps:$4 sm:$0xff]  }
 0x1b6   :  { %v1623_v48 = vmul.f32 0.0, %v4062_v47  ;;  %1788 = vmatprep.subr.bf16.mxu0 %v4977_v59  ;;  %1829 = vmatprep.subr.bf16.mxu1 %v4979_v60  ;;  %6386 = vst [vmem:[#allocation45_spill] sm:$0xff] %v5430_v5  ;;  %v5433_v47 = vld [vmem:[#allocation16 + $0xa0] ss:$16 sps:$4 sm:$0xff]  }
 0x1b7   :  { %6387 = vst [vmem:[#allocation46_spill] sm:$0xff] %v5433_v47 }
 0x1b8   :  { %v5368_v34 = vadd.f32 %v1624_v49, %v1623_v48  ;;  %v4064_v11 = vpop.eup %4063  ;;  %v5439_v48 = vld [vmem:[#allocation16 + $0x84] ss:$16 sps:$4 sm:$0xff]  }
 0x1b9   :  { %1789 = vmatpush1.bf16.msra.mxu0 %v4985_v61  ;;  %1830 = vmatpush1.bf16.msra.mxu1 %v6376_v63  ;;  %6389 = vst [vmem:[#allocation48_spill] sm:$0xff] %v5439_v48 }
 0x1ba   :  { %4065 = vtanh.f32 %v5368_v34  ;;  %1790 = vmatprep.subr.bf16.mxu0 %v6377_v53  ;;  %1831 = vmatprep.subr.bf16.mxu1 %v6378_v39 }
 0x1bd   :  { %1791 = vmatpush1.bf16.msra.mxu0 %v6379_v40  ;;  %1832 = vmatpush1.bf16.msra.mxu1 %v6380_v13 }
 0x1be   :  { %1792 = vmatprep.subr.bf16.mxu0 %v6381_v20  ;;  %1833 = vmatprep.subr.bf16.mxu1 %v6382_v9 }
 0x1c1   :  { %1793 = vmatpush1.bf16.msra.mxu0 %v6383_v6  ;;  %1834 = vmatpush1.bf16.msra.mxu1 %v6384_v12 }
 0x1c2   :  { %1794 = vmatprep.subr.bf16.mxu0 %v5028_v2  ;;  %1835 = vmatprep.subr.bf16.mxu1 %v5030_v1 }
 0x1c5   :  { %1795 = vmatpush1.bf16.msra.mxu0 %v6385_v18  ;;  %1836 = vmatpush1.bf16.msra.mxu1 %v5038_v0 }
 0x1c6   :  { %1796 = vmatprep.subr.bf16.mxu0 %v5045_v17  ;;  %1837 = vmatprep.subr.bf16.mxu1 %v5047_v62 }
 0x1c7   :  { %v4066_v8 = vpop.eup %4065 }
 0x1c8   :  { %v1627_v42 = vmul.f32 %v4066_v8, %v4064_v11 }
 0x1c9   :  { %1797 = vmatpush1.bf16.msra.mxu0 %v5052_v35  ;;  %1838 = vmatpush1.bf16.msra.mxu1 %v5054_v26 }
 0x1ca   :  { %v3810_v36 = vpack.c.bf16 %v1627_v42, %v1627_v42  ;;  %1914 = vmatprep.subr.bf16.mxu0 %v5392_v16  ;;  %1955 = vmatprep.subr.bf16.mxu1 %v5395_v50  ;;  %v5400_v58 = vsel %vm1634_vm10, %v1627_v42, 0.0 }
 0x1cb   :  { %v1638_v19 = vpack.c.bf16 %v5400_v58, %v5400_v58 }
 0x1cc   :  { %3811 = vmatmul.mubr.msk.bf16.vlgmr.msra.gmra.mxu0 %vm3809_vm11, %v3810_v36  ;;  %3814 = vmatmul.mubr.msk.bf16.vlgmr.msra.gmra.mxu1 %vm3809_vm11, %v3810_v36  ;;  %v6400_v36 = vld [vmem:[#allocation57_spill] sm:$0xff] }
 0x1cd   :  { %1915 = vmatpush1.bf16.msra.mxu0 %v5407_v45  ;;  %1956 = vmatpush1.bf16.msra.mxu1 %v5410_v4  ;;  %1640 = vst [vmem:[#allocation20 + $0x1c] sm:$0xf] %v1638_v19 }
 0x1ce   :  { %1916 = vmatprep.subr.bf16.mxu0 %v5413_v15  ;;  %1957 = vmatprep.subr.bf16.mxu1 %v5416_v10 }
 0x1cf   :  { %1946 = vmatprep.mubr.bf16.mxu0 %v6314_v3  ;;  %1987 = vmatprep.mubr.bf16.mxu1 %v6314_v3 }
 0x1d1   :  { %1917 = vmatpush1.bf16.msra.mxu0 %v5421_v43  ;;  %1958 = vmatpush1.bf16.msra.mxu1 %v5424_v41 }
 0x1d2   :  { %1918 = vmatprep.subr.bf16.mxu0 %v5427_v46  ;;  %1959 = vmatprep.subr.bf16.mxu1 %v5430_v5 }
 0x1d5   :  { %1919 = vmatpush1.bf16.msra.mxu0 %v5433_v47  ;;  %1960 = vmatpush1.bf16.msra.mxu1 %v5436_v38 }
 0x1d6   :  { %1920 = vmatprep.subr.bf16.mxu0 %v5439_v48  ;;  %1961 = vmatprep.subr.bf16.mxu1 %v4854_v21  ;;  %v6390_v21 = vld [vmem:[#allocation36_spill] sm:$0xff] }
 0x1d9   :  { %1921 = vmatpush1.bf16.msra.mxu0 %v4856_v22  ;;  %1962 = vmatpush1.bf16.msra.mxu1 %v4860_v23  ;;  %v6391_v22 = vld [vmem:[#allocation37_spill] sm:$0xff]  ;;  %v6392_v23 = vld [vmem:[#allocation38_spill] sm:$0xff] }
 0x1da   :  { %1922 = vmatprep.subr.bf16.mxu0 %v4862_v24  ;;  %1963 = vmatprep.subr.bf16.mxu1 %v4866_v25  ;;  %v6393_v24 = vld [vmem:[#allocation39_spill] sm:$0xff]  ;;  %v6394_v25 = vld [vmem:[#allocation40_spill] sm:$0xff] }
 0x1db   :  { %6420 = vst [vmem:[#allocation39_spill] sm:$0xff] %v5591_v44 }
 0x1dd   :  { %1923 = vmatpush1.bf16.msra.mxu0 %v4870_v27  ;;  %1964 = vmatpush1.bf16.msra.mxu1 %v4872_v28  ;;  %v6395_v27 = vld [vmem:[#allocation41_spill] sm:$0xff]  ;;  %v6396_v28 = vld [vmem:[#allocation42_spill] sm:$0xff] }
 0x1de   :  { %1924 = vmatprep.subr.bf16.mxu0 %v4876_v29  ;;  %1965 = vmatprep.subr.bf16.mxu1 %v4880_v30  ;;  %v6397_v29 = vld [vmem:[#allocation43_spill] sm:$0xff]  ;;  %v6398_v30 = vld [vmem:[#allocation44_spill] sm:$0xff] }
 0x1e1   :  { %1925 = vmatpush1.bf16.msra.mxu0 %v4882_v31  ;;  %1966 = vmatpush1.bf16.msra.mxu1 %v4886_v32 }
 0x1e2   :  { %1926 = vmatprep.subr.bf16.mxu0 %v4888_v33  ;;  %1967 = vmatprep.subr.bf16.mxu1 %v6390_v21  ;;  %v6399_v33 = vld [vmem:[#allocation55_spill] sm:$0xff] }
 0x1e5   :  { %1927 = vmatpush1.bf16.msra.mxu0 %v6391_v22  ;;  %1968 = vmatpush1.bf16.msra.mxu1 %v6392_v23 }
 0x1e6   :  { %1928 = vmatprep.subr.bf16.mxu0 %v6393_v24  ;;  %1969 = vmatprep.subr.bf16.mxu1 %v6394_v25 }
 0x1e9   :  { %1929 = vmatpush1.bf16.msra.mxu0 %v6395_v27  ;;  %1970 = vmatpush1.bf16.msra.mxu1 %v6396_v28  ;;  %v6401_v27 = vld [vmem:[#allocation58_spill] sm:$0xff] }
 0x1ea   :  { %2046 = vmatprep.subr.bf16.mxu0 %v6397_v29  ;;  %2087 = vmatprep.subr.bf16.mxu1 %v6398_v30  ;;  %v6402_v29 = vld [vmem:[#allocation56_spill] sm:$0xff] }
 0x26c   :  { %v1684_v31 = vpop.f32.mrf.mxu0  ;;  %v1725_v32 = vpop.f32.mrf.mxu1 }
 0x26d   :  { %v1732_v49 = vadd.f32 %v1684_v31, %v6399_v33  ;;  %v1734_v30 = vadd.f32 %v1725_v32, %v6402_v29 }
 0x26e   :  { %v1686_v11 = vpop.f32.mrf.mxu0  ;;  %v1727_v8 = vpop.f32.mrf.mxu1 }
 0x26f   :  { %v3747_v42 = vmul.f32 -1.442695, %v1732_v49  ;;  %v1733_v19 = vadd.f32 %v1686_v11, %v6400_v36  ;;  %v1735_v28 = vadd.f32 %v1727_v8, %v6401_v27 }
 0x270   :  { %v1688_v21 = vpop.f32.mrf.mxu0  ;;  %v1729_v22 = vpop.f32.mrf.mxu1 }
 0x271   :  { %4067 = vpow2.f32 %v3747_v42  ;;  %v3748_v23 = vmul.f32 -1.442695, %v1733_v19  ;;  %v3749_v48 = vmul.f32 -1.442695, %v1735_v28  ;;  %v6403_v19 = vld [vmem:[#allocation107_spill] sm:$0xff] }
 0x272   :  { %v1689_v24 = vpop.f32.mrf.mxu0  ;;  %v1730_v25 = vpop.f32.mrf.mxu1 }
 0x273   :  { %4069 = vpow2.f32 %v3748_v23  ;;  %v6404_v25 = vld [vmem:[#allocation109_spill] sm:$0xff] }
 0x274   :  { %4071 = vtanh.f32 %v1734_v30  ;;  %v1765_v30 = vpop.permute.xlu1 %1764 }
 0x275   :  { %4073 = vpow2.f32 %v3749_v48  ;;  %vm1766_vm12 = vcmp.eq.s32.totalorder %v1765_v30, 1 }
 0x27e   :  { %v4068_v38 = vpop.eup %4067 }
 0x27f   :  { %v1739_v47 = vadd.f32 1.0, %v4068_v38 }
 0x280   :  { %v4070_v31 = vpop.eup %4069 }
 0x281   :  { %4075 = vrcp.f32 %v1739_v47  ;;  %v1745_v33 = vadd.f32 1.0, %v4070_v31  ;;  %v4072_v49 = vpop.eup %4071  ;;  %v1345_v47 = vsel %vm1343_vm8, %v5337_v7, 0.0  ;;  %v6406_v7 = vld [vmem:[#allocation108_spill] sm:$0xff] }
 0x282   :  { %v4074_v36 = vpop.eup %4073 }
 0x283   :  { %4077 = vrcp.f32 %v1745_v33  ;;  %v1752_v48 = vadd.f32 1.0, %v4074_v36 }
 0x28c   :  { %v1816_v11 = vpop.f32.mrf.mxu0  ;;  %v1857_v42 = vpop.f32.mrf.mxu1 }
 0x28d   :  { %v1864_v21 = vadd.f32 %v1816_v11, %v6403_v19  ;;  %v1866_v36 = vadd.f32 %v1857_v42, %v6406_v7 }
 0x28e   :  { %v4076_v22 = vpop.eup %4075  ;;  %v1818_v23 = vpop.f32.mrf.mxu0 }
 0x28f   :  { %v1859_v8 = vpop.f32.mrf.mxu1  ;;  %v1756_v24 = vmul.f32 %v4076_v22, %v4072_v49  ;;  %v3751_v32 = vmul.f32 -1.442695, %v1864_v21  ;;  %v1865_v27 = vadd.f32 %v1818_v23, %v6404_v25  ;;  %v6405_v21 = vld [vmem:[#allocation110_spill] sm:$0xff] }
 0x290   :  { %v4078_v38 = vpop.eup %4077  ;;  %v1820_v28 = vpop.f32.mrf.mxu0  ;;  %v1867_v14 = vadd.f32 %v1859_v8, %v6405_v21 }
 0x291   :  { %v1861_v29 = vpop.f32.mrf.mxu1  ;;  %v1755_v31 = vmul.f32 %v4078_v38, %v1345_v47  ;;  %4079 = vpow2.f32 %v3751_v32  ;;  %v3752_v33 = vmul.f32 -1.442695, %v1865_v27 }
 0x292   :  { %v1821_v11 = vpop.f32.mrf.mxu0  ;;  %v3753_v22 = vmul.f32 -1.442695, %v1867_v14  ;;  %v5487_v29 = vld [vmem:[#allocation17 + $0xe8] ss:$16 sps:$4 sm:$0xff]   ;;  %v1636_v14 = vsel %vm1634_vm10, %v5368_v34, 0.0 }
 0x293   :  { %v1862_v19 = vpop.f32.mrf.mxu1  ;;  %v1757_v5 = vadd.f32 %v1756_v24, %v1755_v31  ;;  %4081 = vpow2.f32 %v3752_v33  ;;  %v5490_v31 = vld [vmem:[#allocation17 + $0xc4] ss:$16 sps:$4 sm:$0xff]   ;;  %v5558_v34 = vld [vmem:[#allocation16 + $0x88] ss:$16 sps:$4 sm:$0xff]  }
 0x294   :  { %4083 = vrcp.f32 %v1752_v48  ;;  %v5484_v48 = vld [vmem:[#allocation17 + $0xe0] ss:$16 sps:$4 sm:$0xff]  }
 0x295   :  { %4085 = vtanh.f32 %v1757_v5  ;;  %v5473_v49 = vsel %vm1766_vm12, %v1757_v5, %v1345_v47 }
 0x296   :  { %4087 = vtanh.f32 %v1866_v36 }
 0x297   :  { %4089 = vpow2.f32 %v3753_v22  ;;  %v5597_v22 = vld [vmem:[#allocation16 + $0x4] ss:$16 sps:$4 sm:$0xff]  }
 0x298   :  { %6422 = vst [vmem:[#allocation41_spill] sm:$0xff] %v5597_v22 }
 0x29e   :  { %v4080_v23 = vpop.eup %4079 }
 0x29f   :  { %v1871_v25 = vadd.f32 1.0, %v4080_v23  ;;  %v5600_v23 = vld [vmem:[#allocation16 + $0xc] ss:$16 sps:$4 sm:$0xff]  }
 0x2a0   :  { %v4082_v32 = vpop.eup %4081  ;;  %6423 = vst [vmem:[#allocation42_spill] sm:$0xff] %v5600_v23 }
 0x2a1   :  { %v4084_v27 = vpop.eup %4083  ;;  %4091 = vrcp.f32 %v1871_v25  ;;  %v1877_v38 = vadd.f32 1.0, %v4082_v32  ;;  %v5603_v25 = vld [vmem:[#allocation16] ss:$16 sps:$4 sm:$0xff]   ;;  %v5606_v32 = vld [vmem:[#allocation16 + $0x8] ss:$16 sps:$4 sm:$0xff]  }
 0x2a2   :  { %v4086_v24 = vpop.eup %4085  ;;  %6424 = vst [vmem:[#allocation43_spill] sm:$0xff] %v5603_v25  ;;  %6425 = vst [vmem:[#allocation44_spill] sm:$0xff] %v5606_v32 }
 0x2a3   :  { %v1759_v28 = vmul.f32 %v4086_v24, %v4084_v27  ;;  %4093 = vrcp.f32 %v1877_v38  ;;  %v4088_v30 = vpop.eup %4087  ;;  %v5609_v27 = vld [vmem:[#allocation17 + $0xe4] ss:$16 sps:$4 sm:$0xff]   ;;  %v5612_v38 = vld [vmem:[#allocation17 + $0xec] ss:$16 sps:$4 sm:$0xff]  }
 0x2a4   :  { %v4090_v33 = vpop.eup %4089  ;;  %6426 = vst [vmem:[#allocation55_spill] sm:$0xff] %v5609_v27  ;;  %6427 = vst [vmem:[#allocation57_spill] sm:$0xff] %v5612_v38 }
 0x2a5   :  { %v5479_v5 = vsel %vm1766_vm12, %v1759_v28, %v5350_v37  ;;  %v1769_v8 = vsel %vm1766_vm12, %v1759_v28, 0.0  ;;  %v5493_v37 = vld [vmem:[#allocation17 + $0xcc] ss:$16 sps:$4 sm:$0xff]   ;;  %v1884_v7 = vadd.f32 1.0, %v4090_v33 }
 0x2a6   :  { %v1770_v47 = vpack.c.bf16 %v1769_v8, %v1769_v8  ;;  %v1913_v42 = vpack.c.bf16 %v5479_v5, %v5479_v5  ;;  %v6428_v8 = vld [vmem:[#allocation59_spill] sm:$0xff] }
 0x2a7   :  { %4095 = vrcp.f32 %v1884_v7 }
 0x2a8   :  { %1772 = vst [vmem:[#allocation19 + $0x4] sm:$0xf] %v1770_v47  ;;  %1947 = vmatmul.mubr.bf16.vlgmr.msra.gmra.mxu0 %v1913_v42  ;;  %1988 = vmatmul.mubr.bf16.vlgmr.msra.gmra.mxu1 %v1913_v42 }
 0x2a9   :  { %2047 = vmatpush1.bf16.msra.mxu0 %v5484_v48  ;;  %2088 = vmatpush1.bf16.msra.mxu1 %v5487_v29 }
 0x2aa   :  { %2048 = vmatprep.subr.bf16.mxu0 %v5490_v31  ;;  %2089 = vmatprep.subr.bf16.mxu1 %v5493_v37 }
 0x2ab   :  { %2078 = vmatprep.mubr.bf16.mxu0 %v6314_v3  ;;  %2119 = vmatprep.mubr.bf16.mxu1 %v6314_v3 }
 0x2ad   :  { %2049 = vmatpush1.bf16.msra.mxu0 %v4949_v51  ;;  %2090 = vmatpush1.bf16.msra.mxu1 %v4951_v52  ;;  %v1897_v51 = vpop.permute.xlu1 %1896 }
 0x2ae   :  { %v4092_v11 = vpop.eup %4091  ;;  %2050 = vmatprep.subr.bf16.mxu0 %v4958_v54  ;;  %2091 = vmatprep.subr.bf16.mxu1 %v4960_v55  ;;  %vm1898_vm13 = vcmp.eq.s32.totalorder %v1897_v51, 1 }
 0x2af   :  { %v1888_v19 = vmul.f32 %v4092_v11, %v4088_v30  ;;  %v6429_v11 = vld [vmem:[#allocation61_spill] sm:$0xff] }
 0x2b0   :  { %v4094_v21 = vpop.eup %4093 }
 0x2b1   :  { %v1887_v36 = vmul.f32 %v4094_v21, %v1636_v14  ;;  %2051 = vmatpush1.bf16.msra.mxu0 %v4968_v56  ;;  %2092 = vmatpush1.bf16.msra.mxu1 %v4970_v57 }
 0x2b2   :  { %2052 = vmatprep.subr.bf16.mxu0 %v4977_v59  ;;  %2093 = vmatprep.subr.bf16.mxu1 %v4979_v60 }
 0x2b3   :  { %v1889_v52 = vadd.f32 %v1888_v19, %v1887_v36 }
 0x2b4   :  { %v4096_v55 = vpop.eup %4095 }
 0x2b5   :  { %4097 = vtanh.f32 %v1889_v52  ;;  %2053 = vmatpush1.bf16.msra.mxu0 %v4985_v61  ;;  %2094 = vmatpush1.bf16.msra.mxu1 %v6376_v63  ;;  %v5512_v54 = vsel %vm1898_vm13, %v1889_v52, %v1636_v14  ;;  %v5561_v63 = vld [vmem:[#allocation16 + $0x64] ss:$16 sps:$4 sm:$0xff]  }
 0x2b6   :  { %2054 = vmatprep.subr.bf16.mxu0 %v6377_v53  ;;  %2095 = vmatprep.subr.bf16.mxu1 %v6378_v39  ;;  %v5564_v53 = vld [vmem:[#allocation16 + $0x6c] ss:$16 sps:$4 sm:$0xff]   ;;  %v5567_v39 = vld [vmem:[#allocation16 + $0x60] ss:$16 sps:$4 sm:$0xff]  }
 0x2b7   :  { %6411 = vst [vmem:[#allocation49_spill] sm:$0xff] %v5564_v53  ;;  %6412 = vst [vmem:[#allocation50_spill] sm:$0xff] %v5567_v39  ;;  %v6430_v52 = vld [vmem:[#allocation62_spill] sm:$0xff] }
 0x2b9   :  { %2055 = vmatpush1.bf16.msra.mxu0 %v6379_v40  ;;  %2096 = vmatpush1.bf16.msra.mxu1 %v6380_v13  ;;  %v5570_v40 = vld [vmem:[#allocation16 + $0x68] ss:$16 sps:$4 sm:$0xff]   ;;  %v5573_v13 = vld [vmem:[#allocation16 + $0x44] ss:$16 sps:$4 sm:$0xff]  }
 0x2ba   :  { %2056 = vmatprep.subr.bf16.mxu0 %v6381_v20  ;;  %2097 = vmatprep.subr.bf16.mxu1 %v6382_v9  ;;  %6413 = vst [vmem:[#allocation51_spill] sm:$0xff] %v5570_v40  ;;  %6414 = vst [vmem:[#allocation52_spill] sm:$0xff] %v5573_v13  ;;  %v5576_v20 = vld [vmem:[#allocation16 + $0x4c] ss:$16 sps:$4 sm:$0xff]   ;;  %v5579_v9 = vld [vmem:[#allocation16 + $0x40] ss:$16 sps:$4 sm:$0xff]  }
 0x2bb   :  { %6415 = vst [vmem:[#allocation53_spill] sm:$0xff] %v5576_v20  ;;  %6416 = vst [vmem:[#allocation54_spill] sm:$0xff] %v5579_v9 }
 0x2bd   :  { %2057 = vmatpush1.bf16.msra.mxu0 %v6383_v6  ;;  %2098 = vmatpush1.bf16.msra.mxu1 %v6384_v12  ;;  %v5582_v6 = vld [vmem:[#allocation16 + $0x48] ss:$16 sps:$4 sm:$0xff]   ;;  %v5585_v12 = vld [vmem:[#allocation16 + $0x24] ss:$16 sps:$4 sm:$0xff]  }
 0x2be   :  { %2058 = vmatprep.subr.bf16.mxu0 %v5028_v2  ;;  %2099 = vmatprep.subr.bf16.mxu1 %v5030_v1  ;;  %v6408_v1 = vld [vmem:[#allocation46_spill] sm:$0xff]  ;;  %v6409_v2 = vld [vmem:[#allocation47_spill] sm:$0xff]  ;;  %6417 = vst [vmem:[#allocation36_spill] sm:$0xff] %v5582_v6  ;;  %6418 = vst [vmem:[#allocation37_spill] sm:$0xff] %v5585_v12 }
 0x2c1   :  { %2059 = vmatpush1.bf16.msra.mxu0 %v6385_v18  ;;  %2100 = vmatpush1.bf16.msra.mxu1 %v5038_v0  ;;  %v5588_v18 = vld [vmem:[#allocation16 + $0x2c] ss:$16 sps:$4 sm:$0xff]  }
 0x2c2   :  { %v4098_v56 = vpop.eup %4097  ;;  %2060 = vmatprep.subr.bf16.mxu0 %v5045_v17  ;;  %2101 = vmatprep.subr.bf16.mxu1 %v5047_v62  ;;  %v6407_v62 = vld [vmem:[#allocation45_spill] sm:$0xff]  ;;  %v6410_v17 = vld [vmem:[#allocation48_spill] sm:$0xff]  ;;  %6419 = vst [vmem:[#allocation38_spill] sm:$0xff] %v5588_v18 }
 0x2c3   :  { %v1891_v57 = vmul.f32 %v4098_v56, %v4096_v55  ;;  %v6431_v56 = vld [vmem:[#allocation60_spill] sm:$0xff] }
 0x2c5   :  { %2061 = vmatpush1.bf16.msra.mxu0 %v5052_v35  ;;  %2102 = vmatpush1.bf16.msra.mxu1 %v5054_v26  ;;  %v5532_v59 = vsel %vm1898_vm13, %v1891_v57, %v5400_v58  ;;  %v1901_v60 = vsel %vm1898_vm13, %v1891_v57, 0.0  ;;  %v5552_v26 = vld [vmem:[#allocation16 + $0x8c] ss:$16 sps:$4 sm:$0xff]   ;;  %v5555_v35 = vld [vmem:[#allocation16 + $0x80] ss:$16 sps:$4 sm:$0xff]  }
 0x2c6   :  { %v1902_v61 = vpack.c.bf16 %v1901_v60, %v1901_v60  ;;  %v2045_v0 = vpack.c.bf16 %v5532_v59, %v5532_v59  ;;  %2178 = vmatprep.subr.bf16.mxu0 %v5392_v16  ;;  %2219 = vmatprep.subr.bf16.mxu1 %v5395_v50  ;;  %v5594_v58 = vld [vmem:[#allocation16 + $0x28] ss:$16 sps:$4 sm:$0xff]  }
 0x2c7   :  { %6421 = vst [vmem:[#allocation40_spill] sm:$0xff] %v5594_v58 }
 0x2c8   :  { %1904 = vst [vmem:[#allocation20 + $0x18] sm:$0xf] %v1902_v61  ;;  %2079 = vmatmul.mubr.bf16.vlgmr.msra.gmra.mxu0 %v2045_v0  ;;  %2120 = vmatmul.mubr.bf16.vlgmr.msra.gmra.mxu1 %v2045_v0 }
 0x2c9   :  { %2179 = vmatpush1.bf16.msra.mxu0 %v5407_v45  ;;  %2220 = vmatpush1.bf16.msra.mxu1 %v5410_v4 }
 0x2ca   :  { %2180 = vmatprep.subr.bf16.mxu0 %v5413_v15  ;;  %2221 = vmatprep.subr.bf16.mxu1 %v5416_v10 }
 0x2cb   :  { %2210 = vmatprep.mubr.bf16.mxu0 %v6314_v3  ;;  %2251 = vmatprep.mubr.bf16.mxu1 %v6314_v3 }
 0x2cd   :  { %2181 = vmatpush1.bf16.msra.mxu0 %v5421_v43  ;;  %2222 = vmatpush1.bf16.msra.mxu1 %v5424_v41 }
 0x2ce   :  { %2182 = vmatprep.subr.bf16.mxu0 %v5427_v46  ;;  %2223 = vmatprep.subr.bf16.mxu1 %v6407_v62 }
 0x2d1   :  { %2183 = vmatpush1.bf16.msra.mxu0 %v6408_v1  ;;  %2224 = vmatpush1.bf16.msra.mxu1 %v6409_v2 }
 0x2d2   :  { %2184 = vmatprep.subr.bf16.mxu0 %v6410_v17  ;;  %2225 = vmatprep.subr.bf16.mxu1 %v5552_v26 }
 0x2d5   :  { %2185 = vmatpush1.bf16.msra.mxu0 %v5555_v35  ;;  %2226 = vmatpush1.bf16.msra.mxu1 %v5558_v34 }
 0x2d6   :  { %2186 = vmatprep.subr.bf16.mxu0 %v5561_v63  ;;  %2227 = vmatprep.subr.bf16.mxu1 %v5564_v53 }
 0x2d9   :  { %2187 = vmatpush1.bf16.msra.mxu0 %v5567_v39  ;;  %2228 = vmatpush1.bf16.msra.mxu1 %v5570_v40 }
 0x2da   :  { %2188 = vmatprep.subr.bf16.mxu0 %v5573_v13  ;;  %2229 = vmatprep.subr.bf16.mxu1 %v5576_v20 }
 0x2dd   :  { %2189 = vmatpush1.bf16.msra.mxu0 %v5579_v9  ;;  %2230 = vmatpush1.bf16.msra.mxu1 %v5582_v6 }
 0x2de   :  { %2190 = vmatprep.subr.bf16.mxu0 %v5585_v12  ;;  %2231 = vmatprep.subr.bf16.mxu1 %v5588_v18 }
 0x2e1   :  { %2191 = vmatpush1.bf16.msra.mxu0 %v5591_v44  ;;  %2232 = vmatpush1.bf16.msra.mxu1 %v5594_v58 }
 0x2e2   :  { %2192 = vmatprep.subr.bf16.mxu0 %v5597_v22  ;;  %2233 = vmatprep.subr.bf16.mxu1 %v5600_v23 }
 0x2e5   :  { %2193 = vmatpush1.bf16.msra.mxu0 %v5603_v25  ;;  %2234 = vmatpush1.bf16.msra.mxu1 %v5606_v32 }
 0x2e6   :  { %2310 = vmatprep.subr.bf16.mxu0 %v5609_v27  ;;  %2351 = vmatprep.subr.bf16.mxu1 %v5612_v38  ;;  %v2029_v38 = vpop.permute.xlu0 %2028 }
 0x2e7   :  { %vm2030_vm14 = vcmp.eq.s32.totalorder %v2029_v38, 1 }
 0x368   :  { %v1948_v24 = vpop.f32.mrf.mxu0  ;;  %v1989_v28 = vpop.f32.mrf.mxu1 }
 0x369   :  { %v1996_v47 = vadd.f32 %v1948_v24, %v6428_v8  ;;  %v1998_v57 = vadd.f32 %v1989_v28, %v6431_v56 }
 0x36a   :  { %v1950_v42 = vpop.f32.mrf.mxu0  ;;  %v1991_v30 = vpop.f32.mrf.mxu1 }
 0x36b   :  { %v3755_v33 = vmul.f32 -1.442695, %v1996_v47  ;;  %v1997_v19 = vadd.f32 %v1950_v42, %v6429_v11  ;;  %v1999_v55 = vadd.f32 %v1991_v30, %v6430_v52 }
 0x36c   :  { %v1952_v21 = vpop.f32.mrf.mxu0  ;;  %v1993_v14 = vpop.f32.mrf.mxu1 }
 0x36d   :  { %4099 = vpow2.f32 %v3755_v33  ;;  %v3756_v7 = vmul.f32 -1.442695, %v1997_v19  ;;  %v3757_v60 = vmul.f32 -1.442695, %v1999_v55  ;;  %v6432_v19 = vld [vmem:[#allocation103_spill] sm:$0xff] }
 0x36e   :  { %v1953_v36 = vpop.f32.mrf.mxu0  ;;  %v1994_v51 = vpop.f32.mrf.mxu1 }
 0x36f   :  { %4101 = vpow2.f32 %v3756_v7  ;;  %v6433_v51 = vld [vmem:[#allocation105_spill] sm:$0xff] }
 0x370   :  { %4103 = vtanh.f32 %v1998_v57 }
 0x371   :  { %4105 = vpow2.f32 %v3757_v60 }
 0x37a   :  { %v4100_v61 = vpop.eup %4099 }
 0x37b   :  { %v2003_v0 = vadd.f32 1.0, %v4100_v61 }
 0x37c   :  { %v4102_v24 = vpop.eup %4101 }
 0x37d   :  { %4107 = vrcp.f32 %v2003_v0  ;;  %v2009_v8 = vadd.f32 1.0, %v4102_v24  ;;  %v4104_v47 = vpop.eup %4103 }
 0x37e   :  { %v4106_v11 = vpop.eup %4105 }
 0x37f   :  { %4109 = vrcp.f32 %v2009_v8  ;;  %v2016_v56 = vadd.f32 1.0, %v4106_v11 }
 0x388   :  { %v2080_v42 = vpop.f32.mrf.mxu0  ;;  %v2121_v33 = vpop.f32.mrf.mxu1 }
 0x389   :  { %v2128_v21 = vadd.f32 %v2080_v42, %v6432_v19  ;;  %v6434_v42 = vld [vmem:[#allocation106_spill] sm:$0xff]  ;;  %v6435_v19 = vld [vmem:[#allocation104_spill] sm:$0xff] }
 0x38a   :  { %v4108_v14 = vpop.eup %4107  ;;  %v2082_v7 = vpop.f32.mrf.mxu0 }
 0x38b   :  { %v2123_v30 = vpop.f32.mrf.mxu1  ;;  %v2020_v36 = vmul.f32 %v4108_v14, %v4104_v47  ;;  %v3759_v28 = vmul.f32 -1.442695, %v2128_v21  ;;  %v2129_v52 = vadd.f32 %v2082_v7, %v6433_v51  ;;  %v2130_v21 = vadd.f32 %v2121_v33, %v6435_v19 }
 0x38c   :  { %v4110_v55 = vpop.eup %4109  ;;  %v2084_v57 = vpop.f32.mrf.mxu0  ;;  %v2131_v11 = vadd.f32 %v2123_v30, %v6434_v42 }
 0x38d   :  { %v2125_v60 = vpop.f32.mrf.mxu1  ;;  %v2019_v61 = vmul.f32 %v4110_v55, %v5473_v49  ;;  %4111 = vpow2.f32 %v3759_v28  ;;  %v3760_v0 = vmul.f32 -1.442695, %v2129_v52  ;;  %v5641_v57 = vld [vmem:[#allocation17 + $0xc0] ss:$16 sps:$4 sm:$0xff]  }
 0x38e   :  { %v2085_v24 = vpop.f32.mrf.mxu0  ;;  %v3761_v14 = vmul.f32 -1.442695, %v2131_v11  ;;  %v5644_v60 = vld [vmem:[#allocation17 + $0xc8] ss:$16 sps:$4 sm:$0xff]  }
 0x38f   :  { %v2126_v8 = vpop.f32.mrf.mxu1  ;;  %v2021_v27 = vadd.f32 %v2020_v36, %v2019_v61  ;;  %4113 = vpow2.f32 %v3760_v0  ;;  %v5647_v0 = vld [vmem:[#allocation17 + $0xa4] ss:$16 sps:$4 sm:$0xff]   ;;  %v5650_v24 = vld [vmem:[#allocation17 + $0xac] ss:$16 sps:$4 sm:$0xff]  }
 0x390   :  { %4115 = vrcp.f32 %v2016_v56 }
 0x391   :  { %4117 = vtanh.f32 %v2021_v27  ;;  %v5624_v47 = vsel %vm2030_vm14, %v2021_v27, %v5473_v49 }
 0x392   :  { %4119 = vtanh.f32 %v2130_v21  ;;  %v5654_v21 = vld [vmem:[#allocation17 + $0xa0] ss:$16 sps:$4 sm:$0xff]  }
 0x393   :  { %4121 = vpow2.f32 %v3761_v14  ;;  %v5657_v14 = vld [vmem:[#allocation17 + $0xa8] ss:$16 sps:$4 sm:$0xff]  }
 0x39a   :  { %v4112_v7 = vpop.eup %4111 }
 0x39b   :  { %v2135_v28 = vadd.f32 1.0, %v4112_v7  ;;  %v5660_v7 = vld [vmem:[#allocation17 + $0x84] ss:$16 sps:$4 sm:$0xff]  }
 0x39c   :  { %v4114_v51 = vpop.eup %4113 }
 0x39d   :  { %v4116_v52 = vpop.eup %4115  ;;  %4123 = vrcp.f32 %v2135_v28  ;;  %v2141_v36 = vadd.f32 1.0, %v4114_v51  ;;  %v5663_v28 = vld [vmem:[#allocation17 + $0x8c] ss:$16 sps:$4 sm:$0xff]   ;;  %v2161_v51 = vpop.permute.xlu1 %2160 }
 0x39e   :  { %v4118_v55 = vpop.eup %4117  ;;  %vm2162_vm15 = vcmp.eq.s32.totalorder %v2161_v51, 1  ;;  %v6448_v51 = vld [vmem:[#allocation57_spill] sm:$0xff] }
 0x39f   :  { %4125 = vrcp.f32 %v2141_v36  ;;  %v2023_v56 = vmul.f32 %v4118_v55, %v4116_v52  ;;  %v5666_v36 = vld [vmem:[#allocation17 + $0x80] ss:$16 sps:$4 sm:$0xff]   ;;  %v5669_v55 = vld [vmem:[#allocation17 + $0x88] ss:$16 sps:$4 sm:$0xff]  }
 0x3a1   :  { %v5630_v49 = vsel %vm2030_vm14, %v2023_v56, %v5479_v5  ;;  %v2033_v27 = vsel %vm2030_vm14, %v2023_v56, 0.0  ;;  %v4120_v5 = vpop.eup %4119 }
 0x3a2   :  { %v2034_v30 = vpack.c.bf16 %v2033_v27, %v2033_v27  ;;  %v2177_v33 = vpack.c.bf16 %v5630_v49, %v5630_v49  ;;  %v4122_v38 = vpop.eup %4121  ;;  %v5676_v27 = vld [vmem:[#allocation17 + $0x64] ss:$16 sps:$4 sm:$0xff]  }
 0x3a3   :  { %v2148_v11 = vadd.f32 1.0, %v4122_v38  ;;  %v5688_v38 = vld [vmem:[#allocation17 + $0x44] ss:$16 sps:$4 sm:$0xff]  }
 0x3a4   :  { %2036 = vst [vmem:[#allocation19 + $0x8] sm:$0xf] %v2034_v30  ;;  %2211 = vmatmul.mubr.bf16.vlgmr.msra.gmra.mxu0 %v2177_v33  ;;  %2252 = vmatmul.mubr.bf16.vlgmr.msra.gmra.mxu1 %v2177_v33  ;;  %v5679_v30 = vld [vmem:[#allocation17 + $0x6c] ss:$16 sps:$4 sm:$0xff]   ;;  %v5682_v33 = vld [vmem:[#allocation17 + $0x60] ss:$16 sps:$4 sm:$0xff]  }
 0x3a5   :  { %2311 = vmatpush1.bf16.msra.mxu0 %v5484_v48  ;;  %2352 = vmatpush1.bf16.msra.mxu1 %v5487_v29  ;;  %4127 = vrcp.f32 %v2148_v11  ;;  %6436 = vst [vmem:[#allocation58_spill] sm:$0xff] %v5682_v33  ;;  %6438 = vst [vmem:[#allocation107_spill] sm:$0xff] %v5688_v38  ;;  %v5703_v11 = vld [vmem:[#allocation17 + $0x2c] ss:$16 sps:$4 sm:$0xff]  }
 0x3a6   :  { %2312 = vmatprep.subr.bf16.mxu0 %v5490_v31  ;;  %2353 = vmatprep.subr.bf16.mxu1 %v5493_v37  ;;  %6443 = vst [vmem:[#allocation46_spill] sm:$0xff] %v5703_v11 }
 0x3a7   :  { %2342 = vmatprep.mubr.bf16.mxu0 %v6314_v3  ;;  %2383 = vmatprep.mubr.bf16.mxu1 %v6314_v3 }
 0x3a9   :  { %2313 = vmatpush1.bf16.msra.mxu0 %v5641_v57  ;;  %2354 = vmatpush1.bf16.msra.mxu1 %v5644_v60 }
 0x3aa   :  { %v4124_v61 = vpop.eup %4123  ;;  %2314 = vmatprep.subr.bf16.mxu0 %v5647_v0  ;;  %2355 = vmatprep.subr.bf16.mxu1 %v5650_v24 }
 0x3ab   :  { %v2152_v8 = vmul.f32 %v4124_v61, %v4120_v5  ;;  %v5685_v5 = vld [vmem:[#allocation17 + $0x68] ss:$16 sps:$4 sm:$0xff]   ;;  %v5694_v61 = vld [vmem:[#allocation17 + $0x40] ss:$16 sps:$4 sm:$0xff]  }
 0x3ac   :  { %v4126_v42 = vpop.eup %4125  ;;  %6437 = vst [vmem:[#allocation56_spill] sm:$0xff] %v5685_v5  ;;  %6440 = vst [vmem:[#allocation110_spill] sm:$0xff] %v5694_v61 }
 0x3ad   :  { %v2151_v19 = vmul.f32 %v4126_v42, %v5512_v54  ;;  %2315 = vmatpush1.bf16.msra.mxu0 %v5654_v21  ;;  %2356 = vmatpush1.bf16.msra.mxu1 %v5657_v14  ;;  %v5700_v42 = vld [vmem:[#allocation17 + $0x24] ss:$16 sps:$4 sm:$0xff]  }
 0x3ae   :  { %2316 = vmatprep.subr.bf16.mxu0 %v5660_v7  ;;  %2357 = vmatprep.subr.bf16.mxu1 %v5663_v28  ;;  %6442 = vst [vmem:[#allocation45_spill] sm:$0xff] %v5700_v42 }
 0x3af   :  { %v2153_v52 = vadd.f32 %v2152_v8, %v2151_v19  ;;  %v5697_v8 = vld [vmem:[#allocation17 + $0x48] ss:$16 sps:$4 sm:$0xff]  }
 0x3b0   :  { %6441 = vst [vmem:[#allocation108_spill] sm:$0xff] %v5697_v8 }
 0x3b1   :  { %4129 = vtanh.f32 %v2153_v52  ;;  %2317 = vmatpush1.bf16.msra.mxu0 %v5666_v36  ;;  %2358 = vmatpush1.bf16.msra.mxu1 %v5669_v55  ;;  %v5674_v56 = vsel %vm2162_vm15, %v2153_v52, %v5512_v54  ;;  %v5691_v54 = vld [vmem:[#allocation17 + $0x4c] ss:$16 sps:$4 sm:$0xff]   ;;  %v5706_v52 = vld [vmem:[#allocation17 + $0x20] ss:$16 sps:$4 sm:$0xff]  }
 0x3b2   :  { %2318 = vmatprep.subr.bf16.mxu0 %v5676_v27  ;;  %2359 = vmatprep.subr.bf16.mxu1 %v5679_v30  ;;  %6439 = vst [vmem:[#allocation109_spill] sm:$0xff] %v5691_v54  ;;  %v4128_v19 = vpop.eup %4127  ;;  %6444 = vst [vmem:[#allocation47_spill] sm:$0xff] %v5706_v52 }
 0x3b5   :  { %2319 = vmatpush1.bf16.msra.mxu0 %v5682_v33  ;;  %2360 = vmatpush1.bf16.msra.mxu1 %v5685_v5  ;;  %v5721_v5 = vld [vmem:[#allocation17 + $0x8] ss:$16 sps:$4 sm:$0xff]  }
 0x3b6   :  { %2320 = vmatprep.subr.bf16.mxu0 %v5688_v38  ;;  %2361 = vmatprep.subr.bf16.mxu1 %v5691_v54  ;;  %v5709_v54 = vld [vmem:[#allocation17 + $0x28] ss:$16 sps:$4 sm:$0xff]   ;;  %v5712_v38 = vld [vmem:[#allocation17 + $0x4] ss:$16 sps:$4 sm:$0xff]  }
 0x3b7   :  { %6445 = vst [vmem:[#allocation48_spill] sm:$0xff] %v5709_v54  ;;  %6446 = vst [vmem:[#allocation59_spill] sm:$0xff] %v5712_v38 }
 0x3b9   :  { %2321 = vmatpush1.bf16.msra.mxu0 %v5694_v61  ;;  %2362 = vmatpush1.bf16.msra.mxu1 %v5697_v8  ;;  %v5715_v8 = vld [vmem:[#allocation17 + $0xc] ss:$16 sps:$4 sm:$0xff]  }
 0x3ba   :  { %2322 = vmatprep.subr.bf16.mxu0 %v5700_v42  ;;  %2363 = vmatprep.subr.bf16.mxu1 %v5703_v11  ;;  %v5718_v11 = vld [vmem:[#allocation17] ss:$16 sps:$4 sm:$0xff]  }
 0x3bd   :  { %2323 = vmatpush1.bf16.msra.mxu0 %v5706_v52  ;;  %2364 = vmatpush1.bf16.msra.mxu1 %v5709_v54 }
 0x3be   :  { %v4130_v61 = vpop.eup %4129  ;;  %2324 = vmatprep.subr.bf16.mxu0 %v5712_v38  ;;  %2365 = vmatprep.subr.bf16.mxu1 %v5715_v8 }
 0x3bf   :  { %v2155_v42 = vmul.f32 %v4130_v61, %v4128_v19  ;;  %v6449_v61 = vld [vmem:[#allocation63_spill] sm:$0xff] }
 0x3c1   :  { %2325 = vmatpush1.bf16.msra.mxu0 %v5718_v11  ;;  %2366 = vmatpush1.bf16.msra.mxu1 %v5721_v5  ;;  %v5726_v54 = vsel %vm2162_vm15, %v2155_v42, %v5532_v59  ;;  %v2165_v52 = vsel %vm2162_vm15, %v2155_v42, 0.0  ;;  %v6447_v59 = vld [vmem:[#allocation55_spill] sm:$0xff] }
 0x3c2   :  { %v2166_v38 = vpack.c.bf16 %v2165_v52, %v2165_v52  ;;  %v2309_v33 = vpack.c.bf16 %v5726_v54, %v5726_v54  ;;  %2441 = vmatprep.subr.bf16.mxu0 %v5392_v16  ;;  %2482 = vmatprep.subr.bf16.mxu1 %v5395_v50 }
 0x3c4   :  { %2168 = vst [vmem:[#allocation20 + $0x14] sm:$0xf] %v2166_v38  ;;  %2343 = vmatmul.mubr.bf16.vlgmr.msra.gmra.mxu0 %v2309_v33  ;;  %2384 = vmatmul.mubr.bf16.vlgmr.msra.gmra.mxu1 %v2309_v33 }
 0x3c5   :  { %2442 = vmatpush1.bf16.msra.mxu0 %v5407_v45  ;;  %2483 = vmatpush1.bf16.msra.mxu1 %v5410_v4 }
 0x3c6   :  { %2443 = vmatprep.subr.bf16.mxu0 %v5413_v15  ;;  %2484 = vmatprep.subr.bf16.mxu1 %v5416_v10 }
 0x3c7   :  { %2473 = vmatprep.mubr.bf16.mxu0 %v6314_v3  ;;  %2514 = vmatprep.mubr.bf16.mxu1 %v6314_v3 }
 0x3c9   :  { %2444 = vmatpush1.bf16.msra.mxu0 %v5421_v43  ;;  %2485 = vmatpush1.bf16.msra.mxu1 %v5424_v41 }
 0x3ca   :  { %2445 = vmatprep.subr.bf16.mxu0 %v5427_v46  ;;  %2486 = vmatprep.subr.bf16.mxu1 %v6407_v62 }
 0x3cd   :  { %2446 = vmatpush1.bf16.msra.mxu0 %v6408_v1  ;;  %2487 = vmatpush1.bf16.msra.mxu1 %v6409_v2 }
 0x3ce   :  { %2447 = vmatprep.subr.bf16.mxu0 %v6410_v17  ;;  %2488 = vmatprep.subr.bf16.mxu1 %v5552_v26 }
 0x3d1   :  { %2448 = vmatpush1.bf16.msra.mxu0 %v5555_v35  ;;  %2489 = vmatpush1.bf16.msra.mxu1 %v5558_v34 }
 0x3d2   :  { %2449 = vmatprep.subr.bf16.mxu0 %v5561_v63  ;;  %2490 = vmatprep.subr.bf16.mxu1 %v5564_v53 }
 0x3d5   :  { %2450 = vmatpush1.bf16.msra.mxu0 %v5567_v39  ;;  %2491 = vmatpush1.bf16.msra.mxu1 %v5570_v40  ;;  %v2293_v39 = vpop.permute.xlu0 %2292 }
 0x3d6   :  { %2451 = vmatprep.subr.bf16.mxu0 %v5573_v13  ;;  %2492 = vmatprep.subr.bf16.mxu1 %v5576_v20  ;;  %vm2294_vm0 = vcmp.eq.s32.totalorder %v2293_v39, 1 }
 0x3d9   :  { %2452 = vmatpush1.bf16.msra.mxu0 %v5579_v9  ;;  %2493 = vmatpush1.bf16.msra.mxu1 %v5582_v6  ;;  %v6452_v9 = vld [vmem:[#allocation64_spill] sm:$0xff] }
 0x3da   :  { %2453 = vmatprep.subr.bf16.mxu0 %v5585_v12  ;;  %2494 = vmatprep.subr.bf16.mxu1 %v5588_v18 }
 0x3dd   :  { %2454 = vmatpush1.bf16.msra.mxu0 %v5591_v44  ;;  %2495 = vmatpush1.bf16.msra.mxu1 %v5594_v58  ;;  %v6450_v58 = vld [vmem:[#allocation65_spill] sm:$0xff] }
 0x3de   :  { %2455 = vmatprep.subr.bf16.mxu0 %v5597_v22  ;;  %2496 = vmatprep.subr.bf16.mxu1 %v5600_v23 }
 0x3e1   :  { %2456 = vmatpush1.bf16.msra.mxu0 %v5603_v25  ;;  %2497 = vmatpush1.bf16.msra.mxu1 %v5606_v32  ;;  %v6451_v32 = vld [vmem:[#allocation66_spill] sm:$0xff] }
 0x3e2   :  { %2572 = vmatprep.subr.bf16.mxu0 %v6447_v59  ;;  %2613 = vmatprep.subr.bf16.mxu1 %v6448_v51 }
 0x464   :  { %v2212_v33 = vpop.f32.mrf.mxu0  ;;  %v2253_v38 = vpop.f32.mrf.mxu1 }
 0x465   :  { %v2260_v42 = vadd.f32 %v2212_v33, %v6449_v61  ;;  %v2262_v51 = vadd.f32 %v2253_v38, %v6452_v9 }
 0x466   :  { %v2214_v19 = vpop.f32.mrf.mxu0  ;;  %v2255_v52 = vpop.f32.mrf.mxu1 }
 0x467   :  { %v3763_v44 = vmul.f32 -1.442695, %v2260_v42  ;;  %v2261_v18 = vadd.f32 %v2214_v19, %v6450_v58  ;;  %v2263_v59 = vadd.f32 %v2255_v52, %v6451_v32 }
 0x468   :  { %v2216_v22 = vpop.f32.mrf.mxu0  ;;  %v2257_v12 = vpop.f32.mrf.mxu1 }
 0x469   :  { %4131 = vpow2.f32 %v3763_v44  ;;  %v3764_v23 = vmul.f32 -1.442695, %v2261_v18  ;;  %v3765_v20 = vmul.f32 -1.442695, %v2263_v59  ;;  %v6453_v22 = vld [vmem:[#allocation99_spill] sm:$0xff]  ;;  %v6454_v59 = vld [vmem:[#allocation101_spill] sm:$0xff] }
 0x46a   :  { %v2217_v25 = vpop.f32.mrf.mxu0  ;;  %v2258_v6 = vpop.f32.mrf.mxu1 }
 0x46b   :  { %4133 = vpow2.f32 %v3764_v23 }
 0x46c   :  { %4135 = vtanh.f32 %v2262_v51 }
 0x46d   :  { %4137 = vpow2.f32 %v3765_v20 }
 0x476   :  { %v4132_v13 = vpop.eup %4131 }
 0x477   :  { %v2267_v40 = vadd.f32 1.0, %v4132_v13 }
 0x478   :  { %v4134_v33 = vpop.eup %4133 }
 0x479   :  { %4139 = vrcp.f32 %v2267_v40  ;;  %v2273_v61 = vadd.f32 1.0, %v4134_v33  ;;  %v4136_v58 = vpop.eup %4135 }
 0x47a   :  { %v4138_v18 = vpop.eup %4137 }
 0x47b   :  { %4141 = vrcp.f32 %v2273_v61  ;;  %v2280_v51 = vadd.f32 1.0, %v4138_v18 }
 0x484   :  { %v2344_v12 = vpop.f32.mrf.mxu0  ;;  %v2385_v44 = vpop.f32.mrf.mxu1 }
 0x485   :  { %v2392_v6 = vadd.f32 %v2344_v12, %v6453_v22  ;;  %v6455_v12 = vld [vmem:[#allocation102_spill] sm:$0xff]  ;;  %v6456_v22 = vld [vmem:[#allocation100_spill] sm:$0xff] }
 0x486   :  { %v4140_v23 = vpop.eup %4139  ;;  %v2346_v25 = vpop.f32.mrf.mxu0 }
 0x487   :  { %v2387_v32 = vpop.f32.mrf.mxu1  ;;  %v2284_v42 = vmul.f32 %v4140_v23, %v4136_v58  ;;  %v3767_v9 = vmul.f32 -1.442695, %v2392_v6  ;;  %v2393_v38 = vadd.f32 %v2346_v25, %v6454_v59  ;;  %v2394_v6 = vadd.f32 %v2385_v44, %v6456_v22  ;;  %v6457_v22 = vld [vmem:[#allocation58_spill] sm:$0xff] }
 0x488   :  { %v4142_v13 = vpop.eup %4141  ;;  %v2348_v19 = vpop.f32.mrf.mxu0  ;;  %v2395_v18 = vadd.f32 %v2387_v32, %v6455_v12 }
 0x489   :  { %v2389_v20 = vpop.f32.mrf.mxu1  ;;  %v2283_v40 = vmul.f32 %v4142_v13, %v5624_v47  ;;  %4143 = vpow2.f32 %v3767_v9  ;;  %v3768_v52 = vmul.f32 -1.442695, %v2393_v38 }
 0x48a   :  { %v2349_v33 = vpop.f32.mrf.mxu0  ;;  %v3769_v23 = vmul.f32 -1.442695, %v2395_v18 }
 0x48b   :  { %v2390_v61 = vpop.f32.mrf.mxu1  ;;  %v2285_v53 = vadd.f32 %v2284_v42, %v2283_v40  ;;  %4145 = vpow2.f32 %v3768_v52 }
 0x48c   :  { %4147 = vrcp.f32 %v2280_v51  ;;  %v2425_v61 = vpop.permute.xlu1 %2424 }
 0x48d   :  { %4149 = vtanh.f32 %v2285_v53  ;;  %v5776_v58 = vsel %vm2294_vm0, %v2285_v53, %v5624_v47  ;;  %vm2426_vm1 = vcmp.eq.s32.totalorder %v2425_v61, 1 }
 0x48e   :  { %4151 = vtanh.f32 %v2394_v6  ;;  %v6458_v6 = vld [vmem:[#allocation56_spill] sm:$0xff] }
 0x48f   :  { %4153 = vpow2.f32 %v3769_v23  ;;  %v6459_v23 = vld [vmem:[#allocation107_spill] sm:$0xff] }
 0x496   :  { %v4144_v25 = vpop.eup %4143 }
 0x497   :  { %v2399_v9 = vadd.f32 1.0, %v4144_v25  ;;  %v6460_v25 = vld [vmem:[#allocation109_spill] sm:$0xff] }
 0x498   :  { %v4146_v59 = vpop.eup %4145 }
 0x499   :  { %v4148_v38 = vpop.eup %4147  ;;  %4155 = vrcp.f32 %v2399_v9  ;;  %v2405_v42 = vadd.f32 1.0, %v4146_v59  ;;  %v6461_v9 = vld [vmem:[#allocation110_spill] sm:$0xff]  ;;  %v6462_v59 = vld [vmem:[#allocation108_spill] sm:$0xff] }
 0x49a   :  { %v4150_v13 = vpop.eup %4149 }
 0x49b   :  { %4157 = vrcp.f32 %v2405_v42  ;;  %v2287_v51 = vmul.f32 %v4150_v13, %v4148_v38  ;;  %v4152_v39 = vpop.eup %4151  ;;  %v6463_v38 = vld [vmem:[#allocation45_spill] sm:$0xff]  ;;  %v6465_v13 = vld [vmem:[#allocation47_spill] sm:$0xff] }
 0x49d   :  { %v5782_v53 = vsel %vm2294_vm0, %v2287_v51, %v5630_v49  ;;  %v2297_v47 = vsel %vm2294_vm0, %v2287_v51, 0.0  ;;  %v4154_v49 = vpop.eup %4153  ;;  %v6466_v51 = vld [vmem:[#allocation48_spill] sm:$0xff] }
 0x49e   :  { %v2298_v32 = vpack.c.bf16 %v2297_v47, %v2297_v47  ;;  %v2440_v44 = vpack.c.bf16 %v5782_v53, %v5782_v53  ;;  %v2412_v52 = vadd.f32 1.0, %v4154_v49 }
 0x4a0   :  { %2300 = vst [vmem:[#allocation19 + $0xc] sm:$0xf] %v2298_v32  ;;  %2474 = vmatmul.mubr.bf16.vlgmr.msra.gmra.mxu0 %v2440_v44  ;;  %2515 = vmatmul.mubr.bf16.vlgmr.msra.gmra.mxu1 %v2440_v44  ;;  %4159 = vrcp.f32 %v2412_v52  ;;  %v6467_v32 = vld [vmem:[#allocation59_spill] sm:$0xff] }
 0x4a1   :  { %2573 = vmatpush1.bf16.msra.mxu0 %v5484_v48  ;;  %2614 = vmatpush1.bf16.msra.mxu1 %v5487_v29  ;;  %v6483_v52 = vld [vmem:[#allocation55_spill] sm:$0xff] }
 0x4a2   :  { %2574 = vmatprep.subr.bf16.mxu0 %v5490_v31  ;;  %2615 = vmatprep.subr.bf16.mxu1 %v5493_v37 }
 0x4a3   :  { %2604 = vmatprep.mubr.bf16.mxu0 %v6314_v3  ;;  %2645 = vmatprep.mubr.bf16.mxu1 %v6314_v3 }
 0x4a5   :  { %2575 = vmatpush1.bf16.msra.mxu0 %v5641_v57  ;;  %2616 = vmatpush1.bf16.msra.mxu1 %v5644_v60 }
 0x4a6   :  { %v4156_v19 = vpop.eup %4155  ;;  %2576 = vmatprep.subr.bf16.mxu0 %v5647_v0  ;;  %2617 = vmatprep.subr.bf16.mxu1 %v5650_v24 }
 0x4a7   :  { %v2416_v20 = vmul.f32 %v4156_v19, %v4152_v39 }
 0x4a8   :  { %v4158_v40 = vpop.eup %4157 }
 0x4a9   :  { %v2415_v33 = vmul.f32 %v4158_v40, %v5674_v56  ;;  %2577 = vmatpush1.bf16.msra.mxu0 %v5654_v21  ;;  %2618 = vmatpush1.bf16.msra.mxu1 %v5657_v14  ;;  %v6482_v40 = vld [vmem:[#allocation44_spill] sm:$0xff] }
 0x4aa   :  { %2578 = vmatprep.subr.bf16.mxu0 %v5660_v7  ;;  %2619 = vmatprep.subr.bf16.mxu1 %v5663_v28 }
 0x4ab   :  { %v2417_v12 = vadd.f32 %v2416_v20, %v2415_v33  ;;  %v6484_v33 = vld [vmem:[#allocation57_spill] sm:$0xff] }
 0x4ad   :  { %4161 = vtanh.f32 %v2417_v12  ;;  %2579 = vmatpush1.bf16.msra.mxu0 %v5666_v36  ;;  %2620 = vmatpush1.bf16.msra.mxu1 %v5669_v55  ;;  %v5806_v18 = vsel %vm2426_vm1, %v2417_v12, %v5674_v56  ;;  %v6464_v56 = vld [vmem:[#allocation46_spill] sm:$0xff]  ;;  %v4160_v42 = vpop.eup %4159 }
 0x4ae   :  { %2580 = vmatprep.subr.bf16.mxu0 %v5676_v27  ;;  %2621 = vmatprep.subr.bf16.mxu1 %v5679_v30 }
 0x4b1   :  { %2581 = vmatpush1.bf16.msra.mxu0 %v6457_v22  ;;  %2622 = vmatpush1.bf16.msra.mxu1 %v6458_v6 }
 0x4b2   :  { %2582 = vmatprep.subr.bf16.mxu0 %v6459_v23  ;;  %2623 = vmatprep.subr.bf16.mxu1 %v6460_v25 }
 0x4b5   :  { %2583 = vmatpush1.bf16.msra.mxu0 %v6461_v9  ;;  %2624 = vmatpush1.bf16.msra.mxu1 %v6462_v59 }
 0x4b6   :  { %2584 = vmatprep.subr.bf16.mxu0 %v6463_v38  ;;  %2625 = vmatprep.subr.bf16.mxu1 %v6464_v56 }
 0x4b9   :  { %2585 = vmatpush1.bf16.msra.mxu0 %v6465_v13  ;;  %2626 = vmatpush1.bf16.msra.mxu1 %v6466_v51 }
 0x4ba   :  { %v4162_v47 = vpop.eup %4161  ;;  %2586 = vmatprep.subr.bf16.mxu0 %v6467_v32  ;;  %2627 = vmatprep.subr.bf16.mxu1 %v5715_v8 }
 0x4bb   :  { %v2419_v44 = vmul.f32 %v4162_v47, %v4160_v42  ;;  %v6485_v42 = vld [vmem:[#allocation67_spill] sm:$0xff] }
 0x4bd   :  { %2587 = vmatpush1.bf16.msra.mxu0 %v5718_v11  ;;  %2628 = vmatpush1.bf16.msra.mxu1 %v5721_v5  ;;  %v5826_v39 = vsel %vm2426_vm1, %v2419_v44, %v5726_v54  ;;  %v2429_v49 = vsel %vm2426_vm1, %v2419_v44, 0.0  ;;  %v6481_v54 = vld [vmem:[#allocation43_spill] sm:$0xff] }
 0x4be   :  { %v2430_v19 = vpack.c.bf16 %v2429_v49, %v2429_v49  ;;  %v2571_v20 = vpack.c.bf16 %v5826_v39, %v5826_v39  ;;  %2703 = vmatprep.subr.bf16.mxu0 %v5392_v16  ;;  %2744 = vmatprep.subr.bf16.mxu1 %v5395_v50  ;;  %v6468_v16 = vld [vmem:[#allocation49_spill] sm:$0xff]  ;;  %v6469_v50 = vld [vmem:[#allocation50_spill] sm:$0xff] }
 0x4c0   :  { %2432 = vst [vmem:[#allocation20 + $0x10] sm:$0xf] %v2430_v19  ;;  %2605 = vmatmul.mubr.bf16.vlgmr.msra.gmra.mxu0 %v2571_v20  ;;  %2646 = vmatmul.mubr.bf16.vlgmr.msra.gmra.mxu1 %v2571_v20  ;;  %v6486_v20 = vld [vmem:[#allocation69_spill] sm:$0xff] }
 0x4c1   :  { %2704 = vmatpush1.bf16.msra.mxu0 %v5407_v45  ;;  %2745 = vmatpush1.bf16.msra.mxu1 %v5410_v4  ;;  %v6470_v45 = vld [vmem:[#allocation51_spill] sm:$0xff]  ;;  %v6471_v4 = vld [vmem:[#allocation52_spill] sm:$0xff] }
 0x4c2   :  { %2705 = vmatprep.subr.bf16.mxu0 %v5413_v15  ;;  %2746 = vmatprep.subr.bf16.mxu1 %v5416_v10  ;;  %v6472_v15 = vld [vmem:[#allocation53_spill] sm:$0xff]  ;;  %v6473_v10 = vld [vmem:[#allocation54_spill] sm:$0xff] }
 0x4c3   :  { %2735 = vmatprep.mubr.bf16.mxu0 %v6314_v3  ;;  %2776 = vmatprep.mubr.bf16.mxu1 %v6314_v3 }
 0x4c5   :  { %2706 = vmatpush1.bf16.msra.mxu0 %v5421_v43  ;;  %2747 = vmatpush1.bf16.msra.mxu1 %v5424_v41  ;;  %v6474_v43 = vld [vmem:[#allocation36_spill] sm:$0xff]  ;;  %v6475_v41 = vld [vmem:[#allocation37_spill] sm:$0xff] }
 0x4c6   :  { %2707 = vmatprep.subr.bf16.mxu0 %v5427_v46  ;;  %2748 = vmatprep.subr.bf16.mxu1 %v6407_v62  ;;  %v6476_v46 = vld [vmem:[#allocation38_spill] sm:$0xff]  ;;  %v6477_v62 = vld [vmem:[#allocation39_spill] sm:$0xff] }
 0x4c9   :  { %2708 = vmatpush1.bf16.msra.mxu0 %v6408_v1  ;;  %2749 = vmatpush1.bf16.msra.mxu1 %v6409_v2  ;;  %v6478_v1 = vld [vmem:[#allocation40_spill] sm:$0xff]  ;;  %v6479_v2 = vld [vmem:[#allocation41_spill] sm:$0xff] }
 0x4ca   :  { %2709 = vmatprep.subr.bf16.mxu0 %v6410_v17  ;;  %2750 = vmatprep.subr.bf16.mxu1 %v5552_v26  ;;  %v6480_v17 = vld [vmem:[#allocation42_spill] sm:$0xff] }
 0x4cd   :  { %2710 = vmatpush1.bf16.msra.mxu0 %v5555_v35  ;;  %2751 = vmatpush1.bf16.msra.mxu1 %v5558_v34 }
 0x4ce   :  { %2711 = vmatprep.subr.bf16.mxu0 %v5561_v63  ;;  %2752 = vmatprep.subr.bf16.mxu1 %v6468_v16 }
 0x4d1   :  { %2712 = vmatpush1.bf16.msra.mxu0 %v6469_v50  ;;  %2753 = vmatpush1.bf16.msra.mxu1 %v6470_v45 }
 0x4d2   :  { %2713 = vmatprep.subr.bf16.mxu0 %v6471_v4  ;;  %2754 = vmatprep.subr.bf16.mxu1 %v6472_v15  ;;  %v2556_v4 = vpop.permute.xlu0 %2555 }
 0x4d3   :  { %vm2557_vm2 = vcmp.eq.s32.totalorder %v2556_v4, 1 }
 0x4d5   :  { %2714 = vmatpush1.bf16.msra.mxu0 %v6473_v10  ;;  %2755 = vmatpush1.bf16.msra.mxu1 %v6474_v43 }
 0x4d6   :  { %2715 = vmatprep.subr.bf16.mxu0 %v6475_v41  ;;  %2756 = vmatprep.subr.bf16.mxu1 %v6476_v46  ;;  %v6488_v41 = vld [vmem:[#allocation68_spill] sm:$0xff] }
 0x4d9   :  { %2716 = vmatpush1.bf16.msra.mxu0 %v6477_v62  ;;  %2757 = vmatpush1.bf16.msra.mxu1 %v6478_v1 }
 0x4da   :  { %2717 = vmatprep.subr.bf16.mxu0 %v6479_v2  ;;  %2758 = vmatprep.subr.bf16.mxu1 %v6480_v17 }
 0x4dd   :  { %2718 = vmatpush1.bf16.msra.mxu0 %v6481_v54  ;;  %2759 = vmatpush1.bf16.msra.mxu1 %v6482_v40  ;;  %v6487_v40 = vld [vmem:[#allocation70_spill] sm:$0xff] }
 0x4de   :  { %2834 = vmatprep.subr.bf16.mxu0 %v6483_v52  ;;  %2875 = vmatprep.subr.bf16.mxu1 %v6484_v33 }
 0x560   :  { %v2475_v61 = vpop.f32.mrf.mxu0  ;;  %v2516_v12 = vpop.f32.mrf.mxu1 }
 0x561   :  { %v2523_v47 = vadd.f32 %v2475_v61, %v6485_v42  ;;  %v2525_v33 = vadd.f32 %v2516_v12, %v6488_v41 }
 0x562   :  { %v2477_v44 = vpop.f32.mrf.mxu0  ;;  %v2518_v49 = vpop.f32.mrf.mxu1 }
 0x563   :  { %v3771_v19 = vmul.f32 -1.442695, %v2523_v47  ;;  %v2524_v1 = vadd.f32 %v2477_v44, %v6486_v20  ;;  %v2526_v52 = vadd.f32 %v2518_v49, %v6487_v40 }
 0x564   :  { %v2479_v2 = vpop.f32.mrf.mxu0  ;;  %v2520_v62 = vpop.f32.mrf.mxu1 }
 0x565   :  { %4163 = vpow2.f32 %v3771_v19  ;;  %v3772_v17 = vmul.f32 -1.442695, %v2524_v1  ;;  %v3773_v43 = vmul.f32 -1.442695, %v2526_v52  ;;  %v6490_v52 = vld [vmem:[#allocation97_spill] sm:$0xff] }
 0x566   :  { %v2480_v54 = vpop.f32.mrf.mxu0  ;;  %v2521_v46 = vpop.f32.mrf.mxu1 }
 0x567   :  { %4165 = vpow2.f32 %v3772_v17  ;;  %v6489_v54 = vld [vmem:[#allocation95_spill] sm:$0xff] }
 0x568   :  { %4167 = vtanh.f32 %v2525_v33 }
 0x569   :  { %4169 = vpow2.f32 %v3773_v43 }
 0x572   :  { %v4164_v10 = vpop.eup %4163 }
 0x573   :  { %v2530_v15 = vadd.f32 1.0, %v4164_v10 }
 0x574   :  { %v4166_v61 = vpop.eup %4165 }
 0x575   :  { %4171 = vrcp.f32 %v2530_v15  ;;  %v2536_v42 = vadd.f32 1.0, %v4166_v61  ;;  %v4168_v2 = vpop.eup %4167 }
 0x576   :  { %v4170_v1 = vpop.eup %4169 }
 0x577   :  { %4173 = vrcp.f32 %v2536_v42  ;;  %v2543_v33 = vadd.f32 1.0, %v4170_v1 }
 0x580   :  { %v2606_v62 = vpop.f32.mrf.mxu0  ;;  %v2647_v47 = vpop.f32.mrf.mxu1 }
 0x581   :  { %v2654_v46 = vadd.f32 %v2606_v62, %v6489_v54  ;;  %v6491_v62 = vld [vmem:[#allocation98_spill] sm:$0xff]  ;;  %v6492_v54 = vld [vmem:[#allocation96_spill] sm:$0xff] }
 0x582   :  { %v4172_v17 = vpop.eup %4171  ;;  %v2608_v44 = vpop.f32.mrf.mxu0 }
 0x583   :  { %v2649_v40 = vpop.f32.mrf.mxu1  ;;  %v2547_v49 = vmul.f32 %v4172_v17, %v4168_v2  ;;  %v3775_v41 = vmul.f32 -1.442695, %v2654_v46  ;;  %v2655_v12 = vadd.f32 %v2608_v44, %v6490_v52  ;;  %v2656_v46 = vadd.f32 %v2647_v47, %v6492_v54 }
 0x584   :  { %v4174_v10 = vpop.eup %4173  ;;  %v2610_v19 = vpop.f32.mrf.mxu0  ;;  %v2657_v1 = vadd.f32 %v2649_v40, %v6491_v62 }
 0x585   :  { %v2651_v43 = vpop.f32.mrf.mxu1  ;;  %v2546_v15 = vmul.f32 %v4174_v10, %v5776_v58  ;;  %4175 = vpow2.f32 %v3775_v41  ;;  %v3776_v20 = vmul.f32 -1.442695, %v2655_v12 }
 0x586   :  { %v2611_v61 = vpop.f32.mrf.mxu0  ;;  %v3777_v17 = vmul.f32 -1.442695, %v2657_v1  ;;  %v2687_v43 = vpop.permute.xlu1 %2686 }
 0x587   :  { %v2652_v42 = vpop.f32.mrf.mxu1  ;;  %v2548_v45 = vadd.f32 %v2547_v49, %v2546_v15  ;;  %4177 = vpow2.f32 %v3776_v20  ;;  %vm2688_vm3 = vcmp.eq.s32.totalorder %v2687_v43, 1  ;;  %v6508_v43 = vld [vmem:[#allocation44_spill] sm:$0xff] }
 0x588   :  { %4179 = vrcp.f32 %v2543_v33 }
 0x589   :  { %4181 = vtanh.f32 %v2548_v45  ;;  %v5876_v2 = vsel %vm2557_vm2, %v2548_v45, %v5776_v58 }
 0x58a   :  { %4183 = vtanh.f32 %v2656_v46 }
 0x58b   :  { %4185 = vpow2.f32 %v3777_v17  ;;  %v5931_v17 = vld [vmem:[#allocation16 + $0xe4] ss:$16 sps:$4 sm:$0xff]  }
 0x592   :  { %v4176_v44 = vpop.eup %4175 }
 0x593   :  { %v2661_v41 = vadd.f32 1.0, %v4176_v44  ;;  %v5934_v44 = vld [vmem:[#allocation16 + $0xec] ss:$16 sps:$4 sm:$0xff]  }
 0x594   :  { %v4178_v52 = vpop.eup %4177 }
 0x595   :  { %v4180_v12 = vpop.eup %4179  ;;  %4187 = vrcp.f32 %v2661_v41  ;;  %v2667_v49 = vadd.f32 1.0, %v4178_v52  ;;  %v5937_v41 = vld [vmem:[#allocation16 + $0xe0] ss:$16 sps:$4 sm:$0xff]   ;;  %v5943_v52 = vld [vmem:[#allocation16 + $0xc4] ss:$16 sps:$4 sm:$0xff]  }
 0x596   :  { %v4182_v10 = vpop.eup %4181 }
 0x597   :  { %4189 = vrcp.f32 %v2667_v49  ;;  %v2550_v33 = vmul.f32 %v4182_v10, %v4180_v12  ;;  %v5946_v12 = vld [vmem:[#allocation16 + $0xcc] ss:$16 sps:$4 sm:$0xff]   ;;  %v5951_v49 = vld [vmem:[#allocation16 + $0xc0] ss:$16 sps:$4 sm:$0xff]   ;;  %v5954_v10 = vld [vmem:[#allocation16 + $0xc8] ss:$16 sps:$4 sm:$0xff]  }
 0x599   :  { %v5882_v58 = vsel %vm2557_vm2, %v2550_v33, %v5782_v53  ;;  %v2560_v45 = vsel %vm2557_vm2, %v2550_v33, 0.0  ;;  %v4184_v53 = vpop.eup %4183  ;;  %v5957_v33 = vld [vmem:[#allocation16 + $0xa4] ss:$16 sps:$4 sm:$0xff]  }
 0x59a   :  { %v2561_v40 = vpack.c.bf16 %v2560_v45, %v2560_v45  ;;  %v2702_v47 = vpack.c.bf16 %v5882_v58, %v5882_v58  ;;  %v4186_v4 = vpop.eup %4185  ;;  %v5960_v45 = vld [vmem:[#allocation16 + $0xac] ss:$16 sps:$4 sm:$0xff]  }
 0x59c   :  { %2563 = vst [vmem:[#allocation19 + $0x10] sm:$0xf] %v2561_v40  ;;  %2736 = vmatmul.mubr.bf16.vlgmr.msra.gmra.mxu0 %v2702_v47  ;;  %2777 = vmatmul.mubr.bf16.vlgmr.msra.gmra.mxu1 %v2702_v47  ;;  %v5963_v40 = vld [vmem:[#allocation16 + $0xa0] ss:$16 sps:$4 sm:$0xff]   ;;  %v5966_v47 = vld [vmem:[#allocation16 + $0xa8] ss:$16 sps:$4 sm:$0xff]  }
 0x59d   :  { %2835 = vmatpush1.bf16.msra.mxu0 %v5484_v48  ;;  %2876 = vmatpush1.bf16.msra.mxu1 %v5487_v29  ;;  %6493 = vst [vmem:[#allocation61_spill] sm:$0xff] %v5963_v40  ;;  %6494 = vst [vmem:[#allocation62_spill] sm:$0xff] %v5966_v47 }
 0x59e   :  { %2836 = vmatprep.subr.bf16.mxu0 %v5490_v31  ;;  %2877 = vmatprep.subr.bf16.mxu1 %v5493_v37  ;;  %v2674_v31 = vadd.f32 1.0, %v4186_v4  ;;  %v6496_v4 = vld [vmem:[#allocation51_spill] sm:$0xff] }
 0x59f   :  { %2866 = vmatprep.mubr.bf16.mxu0 %v6314_v3  ;;  %2907 = vmatprep.mubr.bf16.mxu1 %v6314_v3 }
 0x5a0   :  { %4191 = vrcp.f32 %v2674_v31  ;;  %v6500_v31 = vld [vmem:[#allocation36_spill] sm:$0xff] }
 0x5a1   :  { %2837 = vmatpush1.bf16.msra.mxu0 %v5641_v57  ;;  %2878 = vmatpush1.bf16.msra.mxu1 %v5644_v60 }
 0x5a2   :  { %v4188_v19 = vpop.eup %4187  ;;  %2838 = vmatprep.subr.bf16.mxu0 %v5647_v0  ;;  %2879 = vmatprep.subr.bf16.mxu1 %v5650_v24 }
 0x5a3   :  { %v2678_v48 = vmul.f32 %v4188_v19, %v4184_v53  ;;  %v5969_v53 = vld [vmem:[#allocation16 + $0x84] ss:$16 sps:$4 sm:$0xff]  }
 0x5a4   :  { %v4190_v29 = vpop.eup %4189  ;;  %6495 = vst [vmem:[#allocation60_spill] sm:$0xff] %v5969_v53  ;;  %v6497_v19 = vld [vmem:[#allocation52_spill] sm:$0xff] }
 0x5a5   :  { %v2677_v37 = vmul.f32 %v4190_v29, %v5806_v18  ;;  %2839 = vmatpush1.bf16.msra.mxu0 %v5654_v21  ;;  %2880 = vmatpush1.bf16.msra.mxu1 %v5657_v14  ;;  %v6499_v29 = vld [vmem:[#allocation54_spill] sm:$0xff] }
 0x5a6   :  { %2840 = vmatprep.subr.bf16.mxu0 %v5660_v7  ;;  %2881 = vmatprep.subr.bf16.mxu1 %v5663_v28 }
 0x5a7   :  { %v2679_v15 = vadd.f32 %v2678_v48, %v2677_v37  ;;  %v6498_v48 = vld [vmem:[#allocation53_spill] sm:$0xff]  ;;  %v6507_v37 = vld [vmem:[#allocation43_spill] sm:$0xff] }
 0x5a9   :  { %4193 = vtanh.f32 %v2679_v15  ;;  %2841 = vmatpush1.bf16.msra.mxu0 %v5666_v36  ;;  %2882 = vmatpush1.bf16.msra.mxu1 %v5669_v55  ;;  %v5906_v20 = vsel %vm2688_vm3, %v2679_v15, %v5806_v18  ;;  %v6509_v15 = vld [vmem:[#allocation55_spill] sm:$0xff] }
 0x5aa   :  { %2842 = vmatprep.subr.bf16.mxu0 %v5676_v27  ;;  %2883 = vmatprep.subr.bf16.mxu1 %v5679_v30 }
 0x5ad   :  { %2843 = vmatpush1.bf16.msra.mxu0 %v6457_v22  ;;  %2884 = vmatpush1.bf16.msra.mxu1 %v6458_v6  ;;  %v4192_v18 = vpop.eup %4191 }
 0x5ae   :  { %2844 = vmatprep.subr.bf16.mxu0 %v6459_v23  ;;  %2885 = vmatprep.subr.bf16.mxu1 %v6460_v25 }
 0x5b1   :  { %2845 = vmatpush1.bf16.msra.mxu0 %v6461_v9  ;;  %2886 = vmatpush1.bf16.msra.mxu1 %v6462_v59 }
 0x5b2   :  { %2846 = vmatprep.subr.bf16.mxu0 %v6463_v38  ;;  %2887 = vmatprep.subr.bf16.mxu1 %v6464_v56 }
 0x5b5   :  { %2847 = vmatpush1.bf16.msra.mxu0 %v6465_v13  ;;  %2888 = vmatpush1.bf16.msra.mxu1 %v6466_v51 }
 0x5b6   :  { %v4194_v61 = vpop.eup %4193  ;;  %2848 = vmatprep.subr.bf16.mxu0 %v6467_v32  ;;  %2889 = vmatprep.subr.bf16.mxu1 %v5715_v8 }
 0x5b7   :  { %v2681_v42 = vmul.f32 %v4194_v61, %v4192_v18  ;;  %v6510_v18 = vld [vmem:[#allocation57_spill] sm:$0xff] }
 0x5b9   :  { %2849 = vmatpush1.bf16.msra.mxu0 %v5718_v11  ;;  %2890 = vmatpush1.bf16.msra.mxu1 %v5721_v5  ;;  %v5926_v62 = vsel %vm2688_vm3, %v2681_v42, %v5826_v39  ;;  %v2691_v1 = vsel %vm2688_vm3, %v2681_v42, 0.0  ;;  %v5940_v39 = vld [vmem:[#allocation16 + $0xe8] ss:$16 sps:$4 sm:$0xff]  }
 0x5ba   :  { %v2692_v54 = vpack.c.bf16 %v2691_v1, %v2691_v1  ;;  %v2833_v46 = vpack.c.bf16 %v5926_v62, %v5926_v62  ;;  %2965 = vmatprep.subr.bf16.mxu0 %v5931_v17  ;;  %3006 = vmatprep.subr.bf16.mxu1 %v5934_v44  ;;  %v6511_v1 = vld [vmem:[#allocation71_spill] sm:$0xff] }
 0x5bc   :  { %2694 = vst [vmem:[#allocation20 + $0xc] sm:$0xf] %v2692_v54  ;;  %2867 = vmatmul.mubr.bf16.vlgmr.msra.gmra.mxu0 %v2833_v46  ;;  %2908 = vmatmul.mubr.bf16.vlgmr.msra.gmra.mxu1 %v2833_v46 }
 0x5bd   :  { %2966 = vmatpush1.bf16.msra.mxu0 %v5937_v41  ;;  %3007 = vmatpush1.bf16.msra.mxu1 %v5940_v39 }
 0x5be   :  { %2967 = vmatprep.subr.bf16.mxu0 %v5943_v52  ;;  %3008 = vmatprep.subr.bf16.mxu1 %v5946_v12 }
 0x5bf   :  { %2997 = vmatprep.mubr.bf16.mxu0 %v6314_v3  ;;  %3038 = vmatprep.mubr.bf16.mxu1 %v6314_v3 }
 0x5c1   :  { %2968 = vmatpush1.bf16.msra.mxu0 %v5951_v49  ;;  %3009 = vmatpush1.bf16.msra.mxu1 %v5954_v10 }
 0x5c2   :  { %2969 = vmatprep.subr.bf16.mxu0 %v5957_v33  ;;  %3010 = vmatprep.subr.bf16.mxu1 %v5960_v45 }
 0x5c5   :  { %2970 = vmatpush1.bf16.msra.mxu0 %v5963_v40  ;;  %3011 = vmatpush1.bf16.msra.mxu1 %v5966_v47  ;;  %v2818_v47 = vpop.permute.xlu0 %2817 }
 0x5c6   :  { %2971 = vmatprep.subr.bf16.mxu0 %v5969_v53  ;;  %3012 = vmatprep.subr.bf16.mxu1 %v5552_v26  ;;  %v6501_v26 = vld [vmem:[#allocation37_spill] sm:$0xff]  ;;  %vm2819_vm4 = vcmp.eq.s32.totalorder %v2818_v47, 1 }
 0x5c9   :  { %2972 = vmatpush1.bf16.msra.mxu0 %v5555_v35  ;;  %3013 = vmatpush1.bf16.msra.mxu1 %v5558_v34  ;;  %v6502_v35 = vld [vmem:[#allocation38_spill] sm:$0xff]  ;;  %v6503_v34 = vld [vmem:[#allocation39_spill] sm:$0xff] }
 0x5ca   :  { %2973 = vmatprep.subr.bf16.mxu0 %v5561_v63  ;;  %3014 = vmatprep.subr.bf16.mxu1 %v6468_v16  ;;  %v6504_v63 = vld [vmem:[#allocation40_spill] sm:$0xff]  ;;  %v6505_v16 = vld [vmem:[#allocation41_spill] sm:$0xff] }
 0x5cd   :  { %2974 = vmatpush1.bf16.msra.mxu0 %v6469_v50  ;;  %3015 = vmatpush1.bf16.msra.mxu1 %v6496_v4  ;;  %v6506_v50 = vld [vmem:[#allocation42_spill] sm:$0xff] }
 0x5ce   :  { %2975 = vmatprep.subr.bf16.mxu0 %v6497_v19  ;;  %3016 = vmatprep.subr.bf16.mxu1 %v6498_v48  ;;  %v6512_v48 = vld [vmem:[#allocation73_spill] sm:$0xff] }
 0x5d1   :  { %2976 = vmatpush1.bf16.msra.mxu0 %v6499_v29  ;;  %3017 = vmatpush1.bf16.msra.mxu1 %v6500_v31 }
 0x5d2   :  { %2977 = vmatprep.subr.bf16.mxu0 %v6501_v26  ;;  %3018 = vmatprep.subr.bf16.mxu1 %v6502_v35 }
 0x5d5   :  { %2978 = vmatpush1.bf16.msra.mxu0 %v6503_v34  ;;  %3019 = vmatpush1.bf16.msra.mxu1 %v6504_v63 }
 0x5d6   :  { %2979 = vmatprep.subr.bf16.mxu0 %v6505_v16  ;;  %3020 = vmatprep.subr.bf16.mxu1 %v6506_v50  ;;  %v6513_v16 = vld [vmem:[#allocation74_spill] sm:$0xff] }
 0x5d9   :  { %2980 = vmatpush1.bf16.msra.mxu0 %v6507_v37  ;;  %3021 = vmatpush1.bf16.msra.mxu1 %v6508_v43  ;;  %v6514_v37 = vld [vmem:[#allocation72_spill] sm:$0xff] }
 0x5da   :  { %3096 = vmatprep.subr.bf16.mxu0 %v6509_v15  ;;  %3137 = vmatprep.subr.bf16.mxu1 %v6510_v18 }
 0x65c   :  { %v2737_v61 = vpop.f32.mrf.mxu0  ;;  %v2778_v42 = vpop.f32.mrf.mxu1 }
 0x65d   :  { %v2785_v54 = vadd.f32 %v2737_v61, %v6511_v1  ;;  %v2787_v43 = vadd.f32 %v2778_v42, %v6514_v37 }
 0x65e   :  { %v2739_v46 = vpop.f32.mrf.mxu0  ;;  %v2780_v4 = vpop.f32.mrf.mxu1 }
 0x65f   :  { %v3779_v19 = vmul.f32 -1.442695, %v2785_v54  ;;  %v2786_v29 = vadd.f32 %v2739_v46, %v6512_v48  ;;  %v2788_v50 = vadd.f32 %v2780_v4, %v6513_v16 }
 0x660   :  { %v2741_v31 = vpop.f32.mrf.mxu0  ;;  %v2782_v26 = vpop.f32.mrf.mxu1 }
 0x661   :  { %4195 = vpow2.f32 %v3779_v19  ;;  %v3780_v35 = vmul.f32 -1.442695, %v2786_v29  ;;  %v3781_v15 = vmul.f32 -1.442695, %v2788_v50  ;;  %v6515_v29 = vld [vmem:[#allocation91_spill] sm:$0xff] }
 0x662   :  { %v2742_v34 = vpop.f32.mrf.mxu0  ;;  %v2783_v63 = vpop.f32.mrf.mxu1 }
 0x663   :  { %4197 = vpow2.f32 %v3780_v35  ;;  %v6516_v63 = vld [vmem:[#allocation93_spill] sm:$0xff] }
 0x664   :  { %4199 = vtanh.f32 %v2787_v43 }
 0x665   :  { %4201 = vpow2.f32 %v3781_v15 }
 0x66e   :  { %v4196_v18 = vpop.eup %4195 }
 0x66f   :  { %v2792_v53 = vadd.f32 1.0, %v4196_v18 }
 0x670   :  { %v4198_v61 = vpop.eup %4197 }
 0x671   :  { %4203 = vrcp.f32 %v2792_v53  ;;  %v2798_v1 = vadd.f32 1.0, %v4198_v61  ;;  %v4200_v54 = vpop.eup %4199 }
 0x672   :  { %v4202_v48 = vpop.eup %4201 }
 0x673   :  { %4205 = vrcp.f32 %v2798_v1  ;;  %v2805_v37 = vadd.f32 1.0, %v4202_v48 }
 0x67c   :  { %v2868_v46 = vpop.f32.mrf.mxu0  ;;  %v2909_v19 = vpop.f32.mrf.mxu1 }
 0x67d   :  { %v2916_v31 = vadd.f32 %v2868_v46, %v6515_v29  ;;  %v6517_v46 = vld [vmem:[#allocation94_spill] sm:$0xff]  ;;  %v6518_v29 = vld [vmem:[#allocation92_spill] sm:$0xff] }
 0x67e   :  { %v4204_v26 = vpop.eup %4203  ;;  %v2870_v35 = vpop.f32.mrf.mxu0 }
 0x67f   :  { %v2911_v4 = vpop.f32.mrf.mxu1  ;;  %v2809_v34 = vmul.f32 %v4204_v26, %v4200_v54  ;;  %v3783_v42 = vmul.f32 -1.442695, %v2916_v31  ;;  %v2917_v16 = vadd.f32 %v2870_v35, %v6516_v63  ;;  %v2918_v31 = vadd.f32 %v2909_v19, %v6518_v29 }
 0x680   :  { %v4206_v50 = vpop.eup %4205  ;;  %v2872_v43 = vpop.f32.mrf.mxu0  ;;  %v2919_v48 = vadd.f32 %v2911_v4, %v6517_v46 }
 0x681   :  { %v2913_v15 = vpop.f32.mrf.mxu1  ;;  %v2808_v53 = vmul.f32 %v4206_v50, %v5876_v2  ;;  %4207 = vpow2.f32 %v3783_v42  ;;  %v3784_v18 = vmul.f32 -1.442695, %v2917_v16  ;;  %v6013_v43 = vld [vmem:[#allocation17 + $0xe0] ss:$16 sps:$4 sm:$0xff]  }
 0x682   :  { %v2873_v61 = vpop.f32.mrf.mxu0  ;;  %v3785_v26 = vmul.f32 -1.442695, %v2919_v48  ;;  %v6016_v15 = vld [vmem:[#allocation17 + $0xe8] ss:$16 sps:$4 sm:$0xff]  }
 0x683   :  { %v2914_v1 = vpop.f32.mrf.mxu1  ;;  %v2810_v40 = vadd.f32 %v2809_v34, %v2808_v53  ;;  %4209 = vpow2.f32 %v3784_v18  ;;  %v6019_v53 = vld [vmem:[#allocation17 + $0xc4] ss:$16 sps:$4 sm:$0xff]  }
 0x684   :  { %4211 = vrcp.f32 %v2805_v37 }
 0x685   :  { %4213 = vtanh.f32 %v2810_v40  ;;  %v6002_v54 = vsel %vm2819_vm4, %v2810_v40, %v5876_v2 }
 0x686   :  { %4215 = vtanh.f32 %v2918_v31 }
 0x687   :  { %4217 = vpow2.f32 %v3785_v26 }
 0x68e   :  { %v4208_v35 = vpop.eup %4207 }
 0x68f   :  { %v2923_v42 = vadd.f32 1.0, %v4208_v35 }
 0x690   :  { %v4210_v63 = vpop.eup %4209 }
 0x691   :  { %v4212_v16 = vpop.eup %4211  ;;  %4219 = vrcp.f32 %v2923_v42  ;;  %v2929_v34 = vadd.f32 1.0, %v4210_v63  ;;  %v6523_v42 = vld [vmem:[#allocation77_spill] sm:$0xff] }
 0x692   :  { %v4214_v50 = vpop.eup %4213 }
 0x693   :  { %4221 = vrcp.f32 %v2929_v34  ;;  %v2812_v37 = vmul.f32 %v4214_v50, %v4212_v16  ;;  %v4216_v47 = vpop.eup %4215 }
 0x694   :  { %v4218_v18 = vpop.eup %4217 }
 0x695   :  { %v6008_v2 = vsel %vm2819_vm4, %v2812_v37, %v5882_v58  ;;  %v2822_v40 = vsel %vm2819_vm4, %v2812_v37, 0.0  ;;  %v6022_v58 = vld [vmem:[#allocation17 + $0xcc] ss:$16 sps:$4 sm:$0xff]   ;;  %v2936_v48 = vadd.f32 1.0, %v4218_v18 }
 0x696   :  { %v2823_v4 = vpack.c.bf16 %v2822_v40, %v2822_v40  ;;  %v2964_v19 = vpack.c.bf16 %v6008_v2, %v6008_v2 }
 0x697   :  { %4223 = vrcp.f32 %v2936_v48 }
 0x698   :  { %2825 = vst [vmem:[#allocation19 + $0x14] sm:$0xf] %v2823_v4  ;;  %2998 = vmatmul.mubr.bf16.vlgmr.msra.gmra.mxu0 %v2964_v19  ;;  %3039 = vmatmul.mubr.bf16.vlgmr.msra.gmra.mxu1 %v2964_v19  ;;  %v6524_v4 = vld [vmem:[#allocation78_spill] sm:$0xff] }
 0x699   :  { %3097 = vmatpush1.bf16.msra.mxu0 %v6013_v43  ;;  %3138 = vmatpush1.bf16.msra.mxu1 %v6016_v15 }
 0x69a   :  { %3098 = vmatprep.subr.bf16.mxu0 %v6019_v53  ;;  %3139 = vmatprep.subr.bf16.mxu1 %v6022_v58 }
 0x69b   :  { %3128 = vmatprep.mubr.bf16.mxu0 %v6314_v3  ;;  %3169 = vmatprep.mubr.bf16.mxu1 %v6314_v3 }
 0x69d   :  { %3099 = vmatpush1.bf16.msra.mxu0 %v5641_v57  ;;  %3140 = vmatpush1.bf16.msra.mxu1 %v5644_v60  ;;  %v2949_v57 = vpop.permute.xlu1 %2948 }
 0x69e   :  { %v4220_v61 = vpop.eup %4219  ;;  %3100 = vmatprep.subr.bf16.mxu0 %v5647_v0  ;;  %3141 = vmatprep.subr.bf16.mxu1 %v5650_v24  ;;  %vm2950_vm5 = vcmp.eq.s32.totalorder %v2949_v57, 1 }
 0x69f   :  { %v2940_v1 = vmul.f32 %v4220_v61, %v4216_v47  ;;  %v6525_v47 = vld [vmem:[#allocation76_spill] sm:$0xff] }
 0x6a0   :  { %v4222_v46 = vpop.eup %4221 }
 0x6a1   :  { %v2939_v29 = vmul.f32 %v4222_v46, %v5906_v20  ;;  %3101 = vmatpush1.bf16.msra.mxu0 %v5654_v21  ;;  %3142 = vmatpush1.bf16.msra.mxu1 %v5657_v14 }
 0x6a2   :  { %3102 = vmatprep.subr.bf16.mxu0 %v5660_v7  ;;  %3143 = vmatprep.subr.bf16.mxu1 %v5663_v28 }
 0x6a3   :  { %v2941_v60 = vadd.f32 %v2940_v1, %v2939_v29 }
 0x6a4   :  { %v4224_v24 = vpop.eup %4223 }
 0x6a5   :  { %4225 = vtanh.f32 %v2941_v60  ;;  %3103 = vmatpush1.bf16.msra.mxu0 %v5666_v36  ;;  %3144 = vmatpush1.bf16.msra.mxu1 %v5669_v55  ;;  %v6040_v0 = vsel %vm2950_vm5, %v2941_v60, %v5906_v20  ;;  %v4385_v20 = vld [vmem:[#allocation16 + $0x20] ss:$16 sps:$4 sm:$0xff]  }
 0x6a6   :  { %3104 = vmatprep.subr.bf16.mxu0 %v5676_v27  ;;  %3145 = vmatprep.subr.bf16.mxu1 %v5679_v30  ;;  %v6519_v27 = vld [vmem:[#allocation61_spill] sm:$0xff]  ;;  %v6520_v30 = vld [vmem:[#allocation62_spill] sm:$0xff] }
 0x6a9   :  { %3105 = vmatpush1.bf16.msra.mxu0 %v6457_v22  ;;  %3146 = vmatpush1.bf16.msra.mxu1 %v6458_v6  ;;  %v4374_v22 = vld [vmem:[#allocation16 + $0x88] ss:$16 sps:$4 sm:$0xff]   ;;  %v4375_v6 = vld [vmem:[#allocation16 + $0x64] ss:$16 sps:$4 sm:$0xff]  }
 0x6aa   :  { %3106 = vmatprep.subr.bf16.mxu0 %v6459_v23  ;;  %3147 = vmatprep.subr.bf16.mxu1 %v6460_v25  ;;  %v4376_v23 = vld [vmem:[#allocation16 + $0x6c] ss:$16 sps:$4 sm:$0xff]   ;;  %v4377_v25 = vld [vmem:[#allocation16 + $0x60] ss:$16 sps:$4 sm:$0xff]  }
 0x6ad   :  { %3107 = vmatpush1.bf16.msra.mxu0 %v6461_v9  ;;  %3148 = vmatpush1.bf16.msra.mxu1 %v6462_v59  ;;  %v4378_v9 = vld [vmem:[#allocation16 + $0x68] ss:$16 sps:$4 sm:$0xff]   ;;  %v4379_v59 = vld [vmem:[#allocation16 + $0x44] ss:$16 sps:$4 sm:$0xff]  }
 0x6ae   :  { %3108 = vmatprep.subr.bf16.mxu0 %v6463_v38  ;;  %3149 = vmatprep.subr.bf16.mxu1 %v6464_v56  ;;  %v4380_v38 = vld [vmem:[#allocation16 + $0x4c] ss:$16 sps:$4 sm:$0xff]   ;;  %v4381_v56 = vld [vmem:[#allocation16 + $0x40] ss:$16 sps:$4 sm:$0xff]  }
 0x6b1   :  { %3109 = vmatpush1.bf16.msra.mxu0 %v6465_v13  ;;  %3150 = vmatpush1.bf16.msra.mxu1 %v6466_v51  ;;  %v4382_v13 = vld [vmem:[#allocation16 + $0x48] ss:$16 sps:$4 sm:$0xff]   ;;  %v4383_v51 = vld [vmem:[#allocation16 + $0x24] ss:$16 sps:$4 sm:$0xff]  }
 0x6b2   :  { %v4226_v21 = vpop.eup %4225  ;;  %3110 = vmatprep.subr.bf16.mxu0 %v6467_v32  ;;  %3151 = vmatprep.subr.bf16.mxu1 %v5715_v8  ;;  %v4372_v8 = vld [vmem:[#allocation16 + $0x8c] ss:$16 sps:$4 sm:$0xff]  }
 0x6b3   :  { %v2943_v14 = vmul.f32 %v4226_v21, %v4224_v24  ;;  %v4384_v32 = vld [vmem:[#allocation16 + $0x2c] ss:$16 sps:$4 sm:$0xff]  }
 0x6b5   :  { %3111 = vmatpush1.bf16.msra.mxu0 %v5718_v11  ;;  %3152 = vmatpush1.bf16.msra.mxu1 %v5721_v5  ;;  %v6060_v7 = vsel %vm2950_vm5, %v2943_v14, %v5926_v62  ;;  %v2953_v28 = vsel %vm2950_vm5, %v2943_v14, 0.0  ;;  %v6521_v5 = vld [vmem:[#allocation60_spill] sm:$0xff]  ;;  %v4386_v62 = vld [vmem:[#allocation16 + $0x28] ss:$16 sps:$4 sm:$0xff]  }
 0x6b6   :  { %v2954_v36 = vpack.c.bf16 %v2953_v28, %v2953_v28  ;;  %v3095_v55 = vpack.c.bf16 %v6060_v7, %v6060_v7  ;;  %3227 = vmatprep.subr.bf16.mxu0 %v5931_v17  ;;  %3268 = vmatprep.subr.bf16.mxu1 %v5934_v44  ;;  %v4373_v11 = vld [vmem:[#allocation16 + $0x80] ss:$16 sps:$4 sm:$0xff]   ;;  %v4387_v17 = vld [vmem:[#allocation16 + $0x4] ss:$16 sps:$4 sm:$0xff]   ;;  %v4388_v44 = vld [vmem:[#allocation16 + $0xc] ss:$16 sps:$4 sm:$0xff]  }
 0x6b7   :  { %v6526_v14 = vld [vmem:[#allocation87_spill] sm:$0xff] }
 0x6b8   :  { %2956 = vst [vmem:[#allocation20 + $0x8] sm:$0xf] %v2954_v36  ;;  %3129 = vmatmul.mubr.bf16.vlgmr.msra.gmra.mxu0 %v3095_v55  ;;  %3170 = vmatmul.mubr.bf16.vlgmr.msra.gmra.mxu1 %v3095_v55 }
 0x6b9   :  { %3228 = vmatpush1.bf16.msra.mxu0 %v5937_v41  ;;  %3269 = vmatpush1.bf16.msra.mxu1 %v5940_v39  ;;  %v4389_v41 = vld [vmem:[#allocation16] ss:$16 sps:$4 sm:$0xff]   ;;  %v4390_v39 = vld [vmem:[#allocation16 + $0x8] ss:$16 sps:$4 sm:$0xff]  }
 0x6ba   :  { %3229 = vmatprep.subr.bf16.mxu0 %v5943_v52  ;;  %3270 = vmatprep.subr.bf16.mxu1 %v5946_v12  ;;  %v4391_v52 = vld [vmem:[#allocation17 + $0xe4] ss:$16 sps:$4 sm:$0xff]   ;;  %v4392_v12 = vld [vmem:[#allocation17 + $0xec] ss:$16 sps:$4 sm:$0xff]  }
 0x6bb   :  { %3259 = vmatprep.mubr.bf16.mxu0 %v6314_v3  ;;  %3300 = vmatprep.mubr.bf16.mxu1 %v6314_v3 }
 0x6bd   :  { %3230 = vmatpush1.bf16.msra.mxu0 %v5951_v49  ;;  %3271 = vmatpush1.bf16.msra.mxu1 %v5954_v10 }
 0x6be   :  { %3231 = vmatprep.subr.bf16.mxu0 %v5957_v33  ;;  %3272 = vmatprep.subr.bf16.mxu1 %v5960_v45  ;;  %v6522_v33 = vld [vmem:[#allocation75_spill] sm:$0xff] }
 0x6c1   :  { %3232 = vmatpush1.bf16.msra.mxu0 %v6519_v27  ;;  %3273 = vmatpush1.bf16.msra.mxu1 %v6520_v30 }
 0x6c2   :  { %3233 = vmatprep.subr.bf16.mxu0 %v6521_v5  ;;  %3274 = vmatprep.subr.bf16.mxu1 %v4372_v8  ;;  %v6527_v8 = vld [vmem:[#allocation89_spill] sm:$0xff] }
 0x6c5   :  { %3234 = vmatpush1.bf16.msra.mxu0 %v4373_v11  ;;  %3275 = vmatpush1.bf16.msra.mxu1 %v4374_v22 }
 0x6c6   :  { %3235 = vmatprep.subr.bf16.mxu0 %v4375_v6  ;;  %3276 = vmatprep.subr.bf16.mxu1 %v4376_v23 }
 0x6c9   :  { %3236 = vmatpush1.bf16.msra.mxu0 %v4377_v25  ;;  %3277 = vmatpush1.bf16.msra.mxu1 %v4378_v9 }
 0x6ca   :  { %3237 = vmatprep.subr.bf16.mxu0 %v4379_v59  ;;  %3278 = vmatprep.subr.bf16.mxu1 %v4380_v38 }
 0x6cd   :  { %3238 = vmatpush1.bf16.msra.mxu0 %v4381_v56  ;;  %3279 = vmatpush1.bf16.msra.mxu1 %v4382_v13  ;;  %v3080_v13 = vpop.permute.xlu0 %3079 }
 0x6ce   :  { %3239 = vmatprep.subr.bf16.mxu0 %v4383_v51  ;;  %3280 = vmatprep.subr.bf16.mxu1 %v4384_v32  ;;  %vm3081_vm6 = vcmp.eq.s32.totalorder %v3080_v13, 1 }
 0x6d1   :  { %3240 = vmatpush1.bf16.msra.mxu0 %v4385_v20  ;;  %3281 = vmatpush1.bf16.msra.mxu1 %v4386_v62  ;;  %v6528_v20 = vld [vmem:[#allocation90_spill] sm:$0xff] }
 0x6d2   :  { %3241 = vmatprep.subr.bf16.mxu0 %v4387_v17  ;;  %3282 = vmatprep.subr.bf16.mxu1 %v4388_v44  ;;  %v6529_v17 = vld [vmem:[#allocation88_spill] sm:$0xff] }
 0x6d5   :  { %3242 = vmatpush1.bf16.msra.mxu0 %v4389_v41  ;;  %3283 = vmatpush1.bf16.msra.mxu1 %v4390_v39 }
 0x6d6   :  { %3358 = vmatprep.subr.bf16.mxu0 %v4391_v52  ;;  %3399 = vmatprep.subr.bf16.mxu1 %v4392_v12 }
 0x758   :  { %v2999_v49 = vpop.f32.mrf.mxu0  ;;  %v3040_v10 = vpop.f32.mrf.mxu1 }
 0x759   :  { %v3047_v45 = vadd.f32 %v2999_v49, %v6522_v33  ;;  %v3049_v18 = vadd.f32 %v3040_v10, %v6525_v47  ;;  %v3211_v47 = vpop.permute.xlu1 %3210 }
 0x75a   :  { %v3001_v31 = vpop.f32.mrf.mxu0  ;;  %v3042_v26 = vpop.f32.mrf.mxu1  ;;  %vm3212_vm7 = vcmp.eq.s32.totalorder %v3211_v47, 1  ;;  %v6535_v47 = vld [vmem:[#allocation85_spill] sm:$0xff] }
 0x75b   :  { %v3787_v35 = vmul.f32 -1.442695, %v3047_v45  ;;  %v3048_v63 = vadd.f32 %v3001_v31, %v6523_v42  ;;  %v3050_v19 = vadd.f32 %v3042_v26, %v6524_v4  ;;  %v4398_v4 = vld [vmem:[#allocation17 + $0xa8] ss:$16 sps:$4 sm:$0xff]  }
 0x75c   :  { %v3003_v16 = vpop.f32.mrf.mxu0  ;;  %v3044_v34 = vpop.f32.mrf.mxu1 }
 0x75d   :  { %4227 = vpow2.f32 %v3787_v35  ;;  %v3788_v50 = vmul.f32 -1.442695, %v3048_v63  ;;  %v3789_v61 = vmul.f32 -1.442695, %v3050_v19  ;;  %v4393_v63 = vld [vmem:[#allocation17 + $0xc0] ss:$16 sps:$4 sm:$0xff]  }
 0x75e   :  { %v3004_v37 = vpop.f32.mrf.mxu0  ;;  %v3045_v40 = vpop.f32.mrf.mxu1  ;;  %v4394_v16 = vld [vmem:[#allocation17 + $0xc8] ss:$16 sps:$4 sm:$0xff]   ;;  %v4400_v19 = vld [vmem:[#allocation17 + $0x8c] ss:$16 sps:$4 sm:$0xff]  }
 0x75f   :  { %4229 = vpow2.f32 %v3788_v50  ;;  %v4395_v50 = vld [vmem:[#allocation17 + $0xa4] ss:$16 sps:$4 sm:$0xff]   ;;  %v4397_v40 = vld [vmem:[#allocation17 + $0xa0] ss:$16 sps:$4 sm:$0xff]  }
 0x760   :  { %4231 = vtanh.f32 %v3049_v18 }
 0x761   :  { %4233 = vpow2.f32 %v3789_v61  ;;  %v4401_v61 = vld [vmem:[#allocation17 + $0x80] ss:$16 sps:$4 sm:$0xff]  }
 0x76a   :  { %v4228_v1 = vpop.eup %4227 }
 0x76b   :  { %v3054_v46 = vadd.f32 1.0, %v4228_v1  ;;  %v4402_v1 = vld [vmem:[#allocation17 + $0x88] ss:$16 sps:$4 sm:$0xff]  }
 0x76c   :  { %v4230_v48 = vpop.eup %4229 }
 0x76d   :  { %4235 = vrcp.f32 %v3054_v46  ;;  %v3060_v29 = vadd.f32 1.0, %v4230_v48  ;;  %v4232_v57 = vpop.eup %4231  ;;  %v4403_v48 = vld [vmem:[#allocation17 + $0x64] ss:$16 sps:$4 sm:$0xff]  }
 0x76e   :  { %v4234_v21 = vpop.eup %4233 }
 0x76f   :  { %4237 = vrcp.f32 %v3060_v29  ;;  %v3067_v6 = vadd.f32 1.0, %v4234_v21  ;;  %v4404_v29 = vld [vmem:[#allocation17 + $0x6c] ss:$16 sps:$4 sm:$0xff]  }
 0x770   :  { %v4408_v21 = vld [vmem:[#allocation17 + $0x4c] ss:$16 sps:$4 sm:$0xff]  }
 0x778   :  { %v3130_v60 = vpop.f32.mrf.mxu0  ;;  %v3171_v24 = vpop.f32.mrf.mxu1 }
 0x779   :  { %v3178_v28 = vadd.f32 %v3130_v60, %v6526_v14  ;;  %v3180_v44 = vadd.f32 %v3171_v24, %v6529_v17  ;;  %v4406_v60 = vld [vmem:[#allocation17 + $0x68] ss:$16 sps:$4 sm:$0xff]   ;;  %v4407_v24 = vld [vmem:[#allocation17 + $0x44] ss:$16 sps:$4 sm:$0xff]   ;;  %v4409_v14 = vld [vmem:[#allocation17 + $0x40] ss:$16 sps:$4 sm:$0xff]  }
 0x77a   :  { %v4236_v36 = vpop.eup %4235  ;;  %v3132_v55 = vpop.f32.mrf.mxu0 }
 0x77b   :  { %v3173_v27 = vpop.f32.mrf.mxu1  ;;  %v3071_v30 = vmul.f32 %v4236_v36, %v4232_v57  ;;  %v3791_v5 = vmul.f32 -1.442695, %v3178_v28  ;;  %v3179_v11 = vadd.f32 %v3132_v55, %v6527_v8  ;;  %v4405_v57 = vld [vmem:[#allocation17 + $0x60] ss:$16 sps:$4 sm:$0xff]   ;;  %v4410_v28 = vld [vmem:[#allocation17 + $0x48] ss:$16 sps:$4 sm:$0xff]  }
 0x77c   :  { %v4238_v22 = vpop.eup %4237  ;;  %v3134_v23 = vpop.f32.mrf.mxu0  ;;  %v3181_v62 = vadd.f32 %v3173_v27, %v6528_v20  ;;  %v4411_v36 = vld [vmem:[#allocation17 + $0x24] ss:$16 sps:$4 sm:$0xff]   ;;  %v4413_v27 = vld [vmem:[#allocation17 + $0x20] ss:$16 sps:$4 sm:$0xff]  }
 0x77d   :  { %v3175_v25 = vpop.f32.mrf.mxu1  ;;  %v3070_v9 = vmul.f32 %v4238_v22, %v6002_v54  ;;  %4239 = vpow2.f32 %v3791_v5  ;;  %v3792_v59 = vmul.f32 -1.442695, %v3179_v11  ;;  %v4415_v8 = vld [vmem:[#allocation17 + $0x4] ss:$16 sps:$4 sm:$0xff]   ;;  %v4416_v11 = vld [vmem:[#allocation17 + $0xc] ss:$16 sps:$4 sm:$0xff]  }
 0x77e   :  { %v3135_v38 = vpop.f32.mrf.mxu0  ;;  %v3793_v41 = vmul.f32 -1.442695, %v3181_v62  ;;  %v4418_v23 = vld [vmem:[#allocation17 + $0x8] ss:$16 sps:$4 sm:$0xff]  }
 0x77f   :  { %v3176_v56 = vpop.f32.mrf.mxu1  ;;  %v3072_v51 = vadd.f32 %v3071_v30, %v3070_v9  ;;  %4241 = vpow2.f32 %v3792_v59  ;;  %v4414_v30 = vld [vmem:[#allocation17 + $0x28] ss:$16 sps:$4 sm:$0xff]  }
 0x780   :  { %4243 = vrcp.f32 %v3067_v6  ;;  %v4417_v6 = vld [vmem:[#allocation17] ss:$16 sps:$4 sm:$0xff]  }
 0x781   :  { %4245 = vtanh.f32 %v3072_v51  ;;  %v6089_v32 = vsel %vm3081_vm6, %v3072_v51, %v6002_v54  ;;  %v6530_v51 = vld [vmem:[#allocation79_spill] sm:$0xff] }
 0x782   :  { %4247 = vtanh.f32 %v3180_v44 }
 0x783   :  { %4249 = vpow2.f32 %v3793_v41  ;;  %v6531_v41 = vld [vmem:[#allocation81_spill] sm:$0xff] }
 0x78a   :  { %v4240_v39 = vpop.eup %4239 }
 0x78b   :  { %v3185_v52 = vadd.f32 1.0, %v4240_v39 }
 0x78c   :  { %v4242_v12 = vpop.eup %4241 }
 0x78d   :  { %v4244_v49 = vpop.eup %4243  ;;  %4251 = vrcp.f32 %v3185_v52  ;;  %v3191_v10 = vadd.f32 1.0, %v4242_v12 }
 0x78e   :  { %v4246_v33 = vpop.eup %4245 }
 0x78f   :  { %4253 = vrcp.f32 %v3191_v10  ;;  %v3074_v45 = vmul.f32 %v4246_v33, %v4244_v49  ;;  %v6532_v33 = vld [vmem:[#allocation82_spill] sm:$0xff] }
 0x791   :  { %v6095_v54 = vsel %vm3081_vm6, %v3074_v45, %v6008_v2  ;;  %v3084_v31 = vsel %vm3081_vm6, %v3074_v45, 0.0  ;;  %v4248_v2 = vpop.eup %4247 }
 0x792   :  { %v3085_v26 = vpack.c.bf16 %v3084_v31, %v3084_v31  ;;  %v3226_v35 = vpack.c.bf16 %v6095_v54, %v6095_v54  ;;  %v4250_v42 = vpop.eup %4249  ;;  %v6533_v31 = vld [vmem:[#allocation80_spill] sm:$0xff] }
 0x794   :  { %3087 = vst [vmem:[#allocation19 + $0x18] sm:$0xf] %v3085_v26  ;;  %3260 = vmatmul.mubr.bf16.vlgmr.msra.gmra.mxu0 %v3226_v35  ;;  %3301 = vmatmul.mubr.bf16.vlgmr.msra.gmra.mxu1 %v3226_v35 }
 0x795   :  { %3359 = vmatpush1.bf16.msra.mxu0 %v6013_v43  ;;  %3400 = vmatpush1.bf16.msra.mxu1 %v6016_v15  ;;  %v4396_v43 = vld [vmem:[#allocation17 + $0xac] ss:$16 sps:$4 sm:$0xff]  }
 0x796   :  { %3360 = vmatprep.subr.bf16.mxu0 %v6019_v53  ;;  %3401 = vmatprep.subr.bf16.mxu1 %v6022_v58  ;;  %v3198_v53 = vadd.f32 1.0, %v4250_v42 }
 0x797   :  { %3390 = vmatprep.mubr.bf16.mxu0 %v6314_v3  ;;  %3431 = vmatprep.mubr.bf16.mxu1 %v6314_v3  ;;  %v4399_v3 = vld [vmem:[#allocation17 + $0x84] ss:$16 sps:$4 sm:$0xff]  }
 0x798   :  { %4255 = vrcp.f32 %v3198_v53 }
 0x799   :  { %3361 = vmatpush1.bf16.msra.mxu0 %v4393_v63  ;;  %3402 = vmatpush1.bf16.msra.mxu1 %v4394_v16 }
 0x79a   :  { %v4252_v34 = vpop.eup %4251  ;;  %3362 = vmatprep.subr.bf16.mxu0 %v4395_v50  ;;  %3403 = vmatprep.subr.bf16.mxu1 %v4396_v43 }
 0x79b   :  { %v3202_v15 = vmul.f32 %v4252_v34, %v4248_v2 }
 0x79c   :  { %v4254_v37 = vpop.eup %4253 }
 0x79d   :  { %v3201_v58 = vmul.f32 %v4254_v37, %v6040_v0  ;;  %3363 = vmatpush1.bf16.msra.mxu0 %v4397_v40  ;;  %3404 = vmatpush1.bf16.msra.mxu1 %v4398_v4  ;;  %v6534_v37 = vld [vmem:[#allocation83_spill] sm:$0xff] }
 0x79e   :  { %3364 = vmatprep.subr.bf16.mxu0 %v4399_v3  ;;  %3405 = vmatprep.subr.bf16.mxu1 %v4400_v19 }
 0x79f   :  { %v3203_v18 = vadd.f32 %v3202_v15, %v3201_v58 }
 0x7a1   :  { %4257 = vtanh.f32 %v3203_v18  ;;  %3365 = vmatpush1.bf16.msra.mxu0 %v4401_v61  ;;  %3406 = vmatpush1.bf16.msra.mxu1 %v4402_v1  ;;  %v6109_v46 = vsel %vm3212_vm7, %v3203_v18, %v6040_v0  ;;  %v4412_v0 = vld [vmem:[#allocation17 + $0x2c] ss:$16 sps:$4 sm:$0xff]  }
 0x7a2   :  { %3366 = vmatprep.subr.bf16.mxu0 %v4403_v48  ;;  %3407 = vmatprep.subr.bf16.mxu1 %v4404_v29 }
 0x7a5   :  { %3367 = vmatpush1.bf16.msra.mxu0 %v4405_v57  ;;  %3408 = vmatpush1.bf16.msra.mxu1 %v4406_v60  ;;  %v4256_v55 = vpop.eup %4255  ;;  %v3342_v57 = vpop.permute.xlu1 %3341 }
 0x7a6   :  { %3368 = vmatprep.subr.bf16.mxu0 %v4407_v24  ;;  %3409 = vmatprep.subr.bf16.mxu1 %v4408_v21  ;;  %vm3343_vm8 = vcmp.eq.s32.totalorder %v3342_v57, 1 }
 0x7a9   :  { %3369 = vmatpush1.bf16.msra.mxu0 %v4409_v14  ;;  %3410 = vmatpush1.bf16.msra.mxu1 %v4410_v28 }
 0x7aa   :  { %3370 = vmatprep.subr.bf16.mxu0 %v4411_v36  ;;  %3411 = vmatprep.subr.bf16.mxu1 %v4412_v0  ;;  %v6536_v0 = vld [vmem:[#allocation86_spill] sm:$0xff] }
 0x7ad   :  { %3371 = vmatpush1.bf16.msra.mxu0 %v4413_v27  ;;  %3412 = vmatpush1.bf16.msra.mxu1 %v4414_v30  ;;  %v6537_v27 = vld [vmem:[#allocation84_spill] sm:$0xff] }
 0x7ae   :  { %v4258_v5 = vpop.eup %4257  ;;  %3372 = vmatprep.subr.bf16.mxu0 %v4415_v8  ;;  %3413 = vmatprep.subr.bf16.mxu1 %v4416_v11 }
 0x7af   :  { %v3205_v22 = vmul.f32 %v4258_v5, %v4256_v55 }
 0x7b1   :  { %3373 = vmatpush1.bf16.msra.mxu0 %v4417_v6  ;;  %3414 = vmatpush1.bf16.msra.mxu1 %v4418_v23  ;;  %v6113_v25 = vsel %vm3212_vm7, %v3205_v22, %v6060_v7  ;;  %v3215_v9 = vsel %vm3212_vm7, %v3205_v22, 0.0 }
 0x7b2   :  { %v3216_v59 = vpack.c.bf16 %v3215_v9, %v3215_v9  ;;  %v3357_v38 = vpack.c.bf16 %v6113_v25, %v6113_v25 }
 0x7b4   :  { %3218 = vst [vmem:[#allocation20 + $0x4] sm:$0xf] %v3216_v59  ;;  %3391 = vmatmul.mubr.bf16.vlgmr.msra.gmra.mxu0 %v3357_v38  ;;  %3432 = vmatmul.mubr.bf16.vlgmr.msra.gmra.mxu1 %v3357_v38 }
 0x854   :  { %v3261_v56 = vpop.f32.mrf.mxu0  ;;  %v3302_v13 = vpop.f32.mrf.mxu1 }
 0x855   :  { %v3309_v20 = vadd.f32 %v3261_v56, %v6530_v51  ;;  %v3311_v26 = vadd.f32 %v3302_v13, %v6533_v31 }
 0x856   :  { %v3263_v62 = vpop.f32.mrf.mxu0  ;;  %v3304_v17 = vpop.f32.mrf.mxu1 }
 0x857   :  { %v3795_v44 = vmul.f32 -1.442695, %v3309_v20  ;;  %v3310_v39 = vadd.f32 %v3263_v62, %v6531_v41  ;;  %v3312_v45 = vadd.f32 %v3304_v17, %v6532_v33 }
 0x858   :  { %v3265_v7 = vpop.f32.mrf.mxu0  ;;  %v3306_v52 = vpop.f32.mrf.mxu1 }
 0x859   :  { %4259 = vpow2.f32 %v3795_v44  ;;  %v3796_v12 = vmul.f32 -1.442695, %v3310_v39  ;;  %v3797_v35 = vmul.f32 -1.442695, %v3312_v45 }
 0x85a   :  { %v3266_v49 = vpop.f32.mrf.mxu0  ;;  %v3307_v10 = vpop.f32.mrf.mxu1 }
 0x85b   :  { %4261 = vpow2.f32 %v3796_v12 }
 0x85c   :  { %4263 = vtanh.f32 %v3311_v26 }
 0x85d   :  { %4265 = vpow2.f32 %v3797_v35 }
 0x866   :  { %v4260_v2 = vpop.eup %4259 }
 0x867   :  { %v3316_v42 = vadd.f32 1.0, %v4260_v2 }
 0x868   :  { %v4262_v63 = vpop.eup %4261 }
 0x869   :  { %4267 = vrcp.f32 %v3316_v42  ;;  %v3322_v16 = vadd.f32 1.0, %v4262_v63  ;;  %v4264_v34 = vpop.eup %4263 }
 0x86a   :  { %v4266_v15 = vpop.eup %4265 }
 0x86b   :  { %4269 = vrcp.f32 %v3322_v16  ;;  %v3329_v1 = vadd.f32 1.0, %v4266_v15 }
 0x874   :  { %v3392_v50 = vpop.f32.mrf.mxu0  ;;  %v3433_v43 = vpop.f32.mrf.mxu1 }
 0x875   :  { %v3440_v53 = vadd.f32 %v3392_v50, %v6534_v37  ;;  %v3442_v30 = vadd.f32 %v3433_v43, %v6537_v27 }
 0x876   :  { %v4268_v58 = vpop.eup %4267  ;;  %v3394_v40 = vpop.f32.mrf.mxu0 }
 0x877   :  { %v3435_v4 = vpop.f32.mrf.mxu1  ;;  %v3333_v3 = vmul.f32 %v4268_v58, %v4264_v34  ;;  %v3799_v19 = vmul.f32 -1.442695, %v3440_v53  ;;  %v3441_v18 = vadd.f32 %v3394_v40, %v6535_v47 }
 0x878   :  { %v4270_v61 = vpop.eup %4269  ;;  %v3396_v48 = vpop.f32.mrf.mxu0  ;;  %v3443_v55 = vadd.f32 %v3435_v4, %v6536_v0 }
 0x879   :  { %v3437_v29 = vpop.f32.mrf.mxu1  ;;  %v3332_v60 = vmul.f32 %v4270_v61, %v6089_v32  ;;  %4271 = vpow2.f32 %v3799_v19  ;;  %v3800_v24 = vmul.f32 -1.442695, %v3441_v18 }
 0x87a   :  { %v3397_v21 = vpop.f32.mrf.mxu0  ;;  %v3801_v5 = vmul.f32 -1.442695, %v3443_v55 }
 0x87b   :  { %v3438_v14 = vpop.f32.mrf.mxu1  ;;  %v3334_v28 = vadd.f32 %v3333_v3, %v3332_v60  ;;  %4273 = vpow2.f32 %v3800_v24 }
 0x87c   :  { %4275 = vrcp.f32 %v3329_v1 }
 0x87d   :  { %4277 = vtanh.f32 %v3334_v28  ;;  %v3345_v36 = vsel %vm3343_vm8, %v3334_v28, %v6089_v32 }
 0x87e   :  { %3488 = vst [vmem:[#allocation25] sm:$0xff] %v3345_v36  ;;  %4279 = vtanh.f32 %v3442_v30 }
 0x87f   :  { %4281 = vpow2.f32 %v3801_v5 }
 0x886   :  { %v4272_v8 = vpop.eup %4271 }
 0x887   :  { %v3447_v11 = vadd.f32 1.0, %v4272_v8 }
 0x888   :  { %v4274_v22 = vpop.eup %4273 }
 0x889   :  { %v4276_v6 = vpop.eup %4275  ;;  %4283 = vrcp.f32 %v3447_v11  ;;  %v3453_v23 = vadd.f32 1.0, %v4274_v22 }
 0x88a   :  { %v4278_v9 = vpop.eup %4277 }
 0x88b   :  { %v3336_v59 = vmul.f32 %v4278_v9, %v4276_v6  ;;  %4285 = vrcp.f32 %v3453_v23 }
 0x88d   :  { %v3346_v32 = vsel %vm3343_vm8, %v3336_v59, 0.0  ;;  %v3344_v38 = vsel %vm3343_vm8, %v3336_v59, %v6095_v54 }
 0x88e   :  { %v3347_v56 = vpack.c.bf16 %v3346_v32, %v3346_v32  ;;  %3487 = vst [vmem:[#allocation22] sm:$0xff] %v3344_v38 }
 0x890   :  { %3349 = vst [vmem:[#allocation19 + $0x1c] sm:$0xf] %v3347_v56 }
 0x891   :  { %4550 = shalt.err (!%p4547_p6)
}
 0x892   :  { %3502 = dma.vmem_to_hbm [thread:$0]  %s3497_s30, 512, %s6185_s9, [#allocation10], %s4676_s16, %s4676_s16, %s4677_s17   ;;  %v4280_v13 = vpop.eup %4279  ;;  %v3473_v44 = vpop.permute.xlu0 %3472 }
 0x893   :  { %v4282_v54 = vpop.eup %4281  ;;  %s4688_s3 = smov [#allocation26]   ;;  %vm3474_vm9 = vcmp.eq.s32.totalorder %v3473_v44, 1 }
 0x894   :  { %v3460_v17 = vadd.f32 1.0, %v4282_v54  ;;  %s3555_s20 = sshll.u32 %s4688_s3, 4  ;;  %s3556_s20 = int_to_ptr.vmem [resolvable:$true] %s3555_s20 }
 0x895   :  { %s4559_s9 = scalar_lea.vmem %s3556_s20, 128  ;;  %p4564_p8 = scmp.lt.s32.totalorder %s3556_s20, %s3556_s20 }
 0x896   :  { %v4284_v51 = vpop.eup %4283  ;;  %4287 = vrcp.f32 %v3460_v17  ;;  %p4560_p7 = scmp.ne.s32.totalorder %s3556_s20, %s4559_s9  ;;  %p4565_p9 = scmp.lt.s32.totalorder %s4559_s9, %s4559_s9 }
 0x897   :  { %v3464_v20 = vmul.f32 %v4284_v51, %v4280_v13 }
 0x898   :  { %v4286_v62 = vpop.eup %4285  ;;  %p4566_p10 = por %p4565_p9, %p4564_p8 }
 0x899   :  { %v3463_v41 = vmul.f32 %v4286_v62, %v6109_v46 }
 0x89a   :  { %p4567_p11 = pnand %p4566_p10, %p4560_p7 }
 0x89b   :  { %v3465_v39 = vadd.f32 %v3464_v20, %v3463_v41 }
 0x89d   :  { %4289 = vtanh.f32 %v3465_v39  ;;  %v3476_v7 = vsel %vm3474_vm9, %v3465_v39, %v6109_v46 }
 0x89e   :  { %3490 = vst [vmem:[#allocation26] sm:$0xff] %v3476_v7 }
 0x89f   :  { %4570 = shalt.err (!%p4567_p11)
}
 0x8a0   :  { %3558 = dma.vmem_to_hbm [thread:$0]  %s3556_s20, 128, %s6190_s14, [#allocation27]  }
 0x8a1   :  { %s4689_s0 = smov [#allocation23]   ;;  %s4690_s24 = smov [#allocation25]  }
 0x8a2   :  { %s3535_s23 = sshll.u32 %s4689_s0, 4  ;;  %s3545_s27 = sshll.u32 %s4690_s24, 4  ;;  %s3536_s23 = int_to_ptr.vmem [resolvable:$true] %s3535_s23  ;;  %s3546_s27 = int_to_ptr.vmem [resolvable:$true] %s3545_s27 }
 0x8a3   :  { %v4288_v52 = vpop.eup %4287  ;;  %s4691_s28 = smov [#allocation20]   ;;  %s4692_s2 = smov [#allocation22]  }
 0x8a4   :  { %s3512_s1 = sshll.u32 %s4691_s28, 4  ;;  %s3525_s29 = sshll.u32 %s4692_s2, 4  ;;  %s6147_s1 = int_to_ptr.vmem [resolvable:$true] %s3512_s1  ;;  %s6149_s29 = int_to_ptr.vmem [resolvable:$true] %s3525_s29 }
 0x8a5   :  { %s4579_s14 = scalar_lea.vmem %s3536_s23, 128  ;;  %p4584_p13 = scmp.lt.s32.totalorder %s3536_s23, %s3536_s23 }
 0x8a6   :  { %p4580_p12 = scmp.ne.s32.totalorder %s3536_s23, %s4579_s14  ;;  %p4585_p0 = scmp.lt.s32.totalorder %s4579_s14, %s4579_s14 }
 0x8a8   :  { %p4586_p1 = por %p4585_p0, %p4584_p13 }
 0x8aa   :  { %v4290_v12 = vpop.eup %4289  ;;  %p4587_p2 = pnand %p4586_p1, %p4580_p12 }
 0x8ab   :  { %v3467_v49 = vmul.f32 %v4290_v12, %v4288_v52 }
 0x8ad   :  { %v3477_v46 = vsel %vm3474_vm9, %v3467_v49, 0.0  ;;  %v3475_v10 = vsel %vm3474_vm9, %v3467_v49, %v6113_v25 }
 0x8ae   :  { %v3478_v33 = vpack.c.bf16 %v3477_v46, %v3477_v46  ;;  %3489 = vst [vmem:[#allocation23] sm:$0xff] %v3475_v10 }
 0x8af   :  { %4590 = shalt.err (!%p4587_p2)
}
 0x8b0   :  { %3538 = dma.vmem_to_hbm [thread:$0]  %s3536_s23, 128, %s6188_s12, [#allocation24]   ;;  %3479 = vst [vmem:[#allocation20] sm:$0xf] %v3478_v33 }
 0x8b1   :  { %s4599_s8 = scalar_lea.vmem %s3546_s27, 128  ;;  %p4604_p4 = scmp.lt.s32.totalorder %s3546_s27, %s3546_s27 }
 0x8b2   :  { %p4600_p3 = scmp.ne.s32.totalorder %s3546_s27, %s4599_s8  ;;  %p4605_p5 = scmp.lt.s32.totalorder %s4599_s8, %s4599_s8 }
 0x8b4   :  { %p4606_p6 = por %p4605_p5, %p4604_p4 }
 0x8b6   :  { %p4607_p7 = pnand %p4606_p6, %p4600_p3 }
 0x8b8   :  { %4610 = shalt.err (!%p4607_p7)
}
 0x8b9   :  { %3548 = dma.vmem_to_hbm [thread:$0]  %s3546_s27, 128, %s6189_s13, [#allocation24]  }
 0x8ba   :  { %s4619_s26 = scalar_lea.vmem %s6147_s1, 512  ;;  %p4624_p9 = scmp.lt.s32.totalorder %s6147_s1, %s6147_s1 }
 0x8bb   :  { %p4620_p8 = scmp.ne.s32.totalorder %s6147_s1, %s4619_s26  ;;  %p4625_p10 = scmp.lt.s32.totalorder %s4619_s26, %s4619_s26 }
 0x8bd   :  { %p4626_p11 = por %p4625_p10, %p4624_p9 }
 0x8bf   :  { %p4627_p12 = pnand %p4626_p11, %p4620_p8 }
 0x8c1   :  { %4630 = shalt.err (!%p4627_p12)
}
 0x8c2   :  { %3518 = dma.vmem_to_hbm [thread:$0]  %s6147_s1, 512, %s6186_s10, [#allocation21], %s4676_s16, %s4676_s16, %s4677_s17  }
 0x8c3   :  { %s4639_s13 = scalar_lea.vmem %s6149_s29, 128  ;;  %p4644_p0 = scmp.lt.s32.totalorder %s6149_s29, %s6149_s29 }
 0x8c4   :  { %p4640_p13 = scmp.ne.s32.totalorder %s6149_s29, %s4639_s13  ;;  %p4645_p1 = scmp.lt.s32.totalorder %s4639_s13, %s4639_s13 }
 0x8c6   :  { %p4646_p2 = por %p4645_p1, %p4644_p0 }
 0x8c8   :  { %p4647_p3 = pnand %p4646_p2, %p4640_p13 }
 0x8ca   :  { %4650 = shalt.err (!%p4647_p3)
}
 0x8cb   :  { %3528 = dma.vmem_to_hbm [thread:$0]  %s6149_s29, 128, %s6187_s11, [#allocation21]  }
 0x8cc   :  { %4667 = dma.done.wait [#allocation10], 512  }
 0x8cd   :  { %4668 = vsyncadd [#allocation10], 4294966784 }
 0x8ce   :  { %4669 = dma.done.wait [#allocation21], 640  }
 0x8cf   :  { %4670 = vsyncadd [#allocation21], 4294966656 }
 0x8d0   :  { %4671 = dma.done.wait [#allocation24], 256  }
 0x8d1   :  { %4672 = vsyncadd [#allocation24], 4294967040 }
 0x8d2   :  { %4673 = dma.done.wait [#allocation27], 128  }
 0x8d3   :  { %4674 = vsyncadd [#allocation27], 4294967168 }
 0x8d4   :  { %3577 = vsyncpa [#allocation9], 1 }
 0x8d5   :  { %3578 = vsyncpa [#allocation12], 1 }
 0x8d6   :  { %3579 = vsyncpa [#allocation15], 1 }
 0x8d7   :  { %3580 = vsyncpa [#allocation18], 1 }
 0x8d8   :  { %3581 = vsyncpa [#allocation10], 1 }
 0x8d9   :  { %3582 = vsyncpa [#allocation21], 1 }
 0x8da   :  { %3583 = vsyncpa [#allocation24], 1 }
 0x8db   :  { %3584 = vsyncpa [#allocation27], 1 }

</bundles_post_ra>
